<compile_context>
chip_gen: v7x
topology: tpu7x:2x2x1
jax: 0.10.0
libtpu: 0.0.40
codegen_flags: <defaults>
</compile_context>

<pallas_src>
import numpy as np
import jax
import jax.numpy as jnp
from jax import lax
from jax.experimental import pallas as pl
from jax.experimental.pallas import tpu as pltpu


IMGS_PER_STEP = 2  # images packed into the sublane (M) dim of every matmul


# ---------------------------------------------------------------------------
# Fused Net_8 forward kernel (C images per grid step).
# ---------------------------------------------------------------------------
def _make_net8_kernel(C):
    H1 = C * 48   # stacked conv1 output rows
    H2 = C * 20   # stacked conv2 output rows
    f32 = jnp.float32

    def kernel(x_ref, bt1_ref, b1_ref, pr1_ref, s1_ref,
               bt2_ref, b2_ref, pr2_ref, s2_ref,
               wfc1_ref, bfc1_ref, wfc2_ref, bfc2_ref, wfc3_ref, bfc3_ref,
               o_ref,
               a1_sc, h1_sc, p1_sc, a2_sc, h2_sc, p2_sc, flat_sc):
        # ---- conv1 LHS: concat the 5 kh-shifted slices along K (per image) --
        for c in range(C):
            for kh in range(5):
                a1_sc[c * 48:(c + 1) * 48, kh * 52:(kh + 1) * 52] = \
                    x_ref[c, kh:kh + 48, :]
        # ---- conv1 (1->6, 5x5, VALID) as ONE matmul: (C*48,260)@(260,288) ---
        h1 = jnp.dot(a1_sc[...], bt1_ref[...].astype(f32),
                     preferred_element_type=f32)
        h1_sc[...] = jnp.maximum(h1 + b1_ref[...], 0.0)     # (C*48, 288)

        # ---- ReLU'd conv1 -> 2x2/2 max pool ---------------------------------
        m1 = jnp.maximum(
            jnp.maximum(h1_sc[0:H1 - 1, 0:282], h1_sc[1:H1, 0:282]),
            jnp.maximum(h1_sc[0:H1 - 1, 6:288], h1_sc[1:H1, 6:288]))
        t1 = jnp.dot(pr1_ref[...], m1, preferred_element_type=f32)
        p1_sc[...] = jnp.dot(t1, s1_ref[...].astype(f32),
                             preferred_element_type=f32)     # (C*24, 144)

        # ---- conv2 LHS (C*20, 720), conv2 (6->16, 5x5) as ONE matmul --------
        for c in range(C):
            for kh in range(5):
                a2_sc[c * 20:(c + 1) * 20, kh * 144:(kh + 1) * 144] = \
                    p1_sc[c * 24 + kh: c * 24 + kh + 20, :]
        h2 = jnp.dot(a2_sc[...], bt2_ref[...].astype(f32),
                     preferred_element_type=f32)
        h2_sc[...] = jnp.maximum(h2 + b2_ref[...], 0.0)      # (C*20, 320)

        m2 = jnp.maximum(
            jnp.maximum(h2_sc[0:H2 - 1, 0:304], h2_sc[1:H2, 0:304]),
            jnp.maximum(h2_sc[0:H2 - 1, 16:320], h2_sc[1:H2, 16:320]))
        t2 = jnp.dot(pr2_ref[...], m2, preferred_element_type=f32)
        p2_sc[...] = jnp.dot(t2, s2_ref[...].astype(f32),
                             preferred_element_type=f32)     # (C*10, 160), oh-major rows

        # ---- flatten: one sublane->lane relayout, (C*10,160) -> (C,1600) ----
        for oh in range(10):
            flat_sc[:, oh * 160:(oh + 1) * 160] = p2_sc[oh * C:(oh + 1) * C, :]

        # ---- fc1 -> ReLU -> fc2 -> ReLU -> fc3 (all with M = C) -------------
        hfc = jnp.maximum(
            jnp.dot(flat_sc[...], wfc1_ref[...].astype(f32),
                    preferred_element_type=f32) + bfc1_ref[...], 0.0)
        hfc = jnp.maximum(
            jnp.dot(hfc, wfc2_ref[...], preferred_element_type=f32)
            + bfc2_ref[...], 0.0)
        o_ref[...] = (jnp.dot(hfc, wfc3_ref[...], preferred_element_type=f32)
                      + bfc3_ref[...])

    return kernel


# ---------------------------------------------------------------------------
# One-time host-side weight repacking.
# ---------------------------------------------------------------------------
def _col_select(npairs, ch):
    # ((2*npairs-1)*ch, npairs*ch) 0/1 matrix: output column j*ch+c selects
    # input column 2*j*ch+c  -> even-ow down-sample as an MXU matmul.
    s = np.zeros(((2 * npairs - 1) * ch, npairs * ch), np.float32)
    for j in range(npairs):
        for c in range(ch):
            s[2 * j * ch + c, j * ch + c] = 1.0
    return s


def _row_select_stage1(C):
    # (C*24, C*48-1): picks row c*48 + 2*i of the stacked row-pair-max slab.
    p = np.zeros((C * 24, C * 48 - 1), np.float32)
    for c in range(C):
        for i in range(24):
            p[c * 24 + i, c * 48 + 2 * i] = 1.0
    return p


def _row_select_stage2(C):
    # (C*10, C*20-1): oh-major output rows (row oh*C + c picks c*20 + 2*oh),
    # so the fc1 flatten can take contiguous (C, 160) slabs per oh.
    p = np.zeros((C * 10, C * 20 - 1), np.float32)
    for c in range(C):
        for oh in range(10):
            p[oh * C + c, c * 20 + 2 * oh] = 1.0
    return p


def prepare_params(params, imgs_per_step=IMGS_PER_STEP):
    C = imgs_per_step
    w1 = np.asarray(params["conv1_w"], np.float32)   # (5, 5, 1, 6)   HWIO
    w2 = np.asarray(params["conv2_w"], np.float32)   # (5, 5, 6, 16)  HWIO

    # Toeplitz ("shift-and-matmul") slab for conv1: (5*52, 48*6) = (260, 288)
    bt1 = np.zeros((5, 52, 48, 6), np.float32)
    for kh in range(5):
        for kw in range(5):
            for ow in range(48):
                bt1[kh, ow + kw, ow, :] = w1[kh, kw, 0, :]
    bt1 = bt1.reshape(5 * 52, 48 * 6)

    # Toeplitz slab for conv2: (5*144, 20*16) = (720, 320)
    bt2 = np.zeros((5, 24, 6, 20, 16), np.float32)
    for kh in range(5):
        for kw in range(5):
            for ow in range(20):
                bt2[kh, ow + kw, :, ow, :] = w2[kh, kw, :, :]
    bt2 = bt2.reshape(5 * 144, 20 * 16)

    # Per-lane bias rows matching the [ow*C + co] lane layout.
    b1 = np.tile(np.asarray(params["conv1_b"], np.float32).reshape(1, -1), (1, 48))
    b2 = np.tile(np.asarray(params["conv2_b"], np.float32).reshape(1, -1), (1, 20))

    # fc1 weight permuted so the kernel flatten order (oh, ow, co) matches
    # PyTorch's view(-1, 16*10*10) = (co, oh, ow) order, as one (1600, 120).
    wfc1 = np.asarray(params["fc1_w"], np.float32).reshape(16, 10, 10, 120)
    wfc1 = np.transpose(wfc1, (1, 2, 0, 3)).reshape(1600, 120)

    bf16 = jnp.bfloat16
    return {
        "bt1": jnp.asarray(bt1, bf16),
        "b1": jnp.asarray(b1),
        "pr1": jnp.asarray(_row_select_stage1(C)),
        "s1": jnp.asarray(_col_select(24, 6), bf16),     # (282, 144), exact in bf16
        "bt2": jnp.asarray(bt2, bf16),
        "b2": jnp.asarray(b2),
        "pr2": jnp.asarray(_row_select_stage2(C)),
        "s2": jnp.asarray(_col_select(10, 16), bf16),    # (304, 160)
        "wfc1": jnp.asarray(wfc1, bf16),
        "bfc1": jnp.asarray(np.asarray(params["fc1_b"], np.float32).reshape(1, -1)),
        "wfc2": jnp.asarray(np.asarray(params["fc2_w"], np.float32)),
        "bfc2": jnp.asarray(np.asarray(params["fc2_b"], np.float32).reshape(1, -1)),
        "wfc3": jnp.asarray(np.asarray(params["fc3_w"], np.float32)),
        "bfc3": jnp.asarray(np.asarray(params["fc3_b"], np.float32).reshape(1, -1)),
    }


# ---------------------------------------------------------------------------
# Full Net_8 forward (NCHW input, like the PyTorch module)
# ---------------------------------------------------------------------------
@jax.jit
def net8_forward(x_nchw, prep):
    N = x_nchw.shape[0]
    C = IMGS_PER_STEP
    assert N % C == 0, "batch must be a multiple of IMGS_PER_STEP"
    x2d = x_nchw[:, 0, :, :]                         # Cin == 1 -> (N, 52, 52)
    inv2 = lambda n: (0, 0)                          # grid-invariant weights

    out = pl.pallas_call(
        _make_net8_kernel(C),
        out_shape=jax.ShapeDtypeStruct((N, 10), jnp.float32),
        grid=(N // C,),
        in_specs=[
            pl.BlockSpec((C, 52, 52), lambda n: (n, 0, 0)),       # image chunk
            pl.BlockSpec((260, 288), inv2),                        # bt1 (bf16)
            pl.BlockSpec((1, 288), inv2),                          # b1 row
            pl.BlockSpec((C * 24, C * 48 - 1), inv2),              # pr1
            pl.BlockSpec((282, 144), inv2),                        # s1 (bf16)
            pl.BlockSpec((720, 320), inv2),                        # bt2 (bf16)
            pl.BlockSpec((1, 320), inv2),                          # b2 row
            pl.BlockSpec((C * 10, C * 20 - 1), inv2),              # pr2
            pl.BlockSpec((304, 160), inv2),                        # s2 (bf16)
            pl.BlockSpec((1600, 120), inv2),                       # fc1 w (bf16)
            pl.BlockSpec((1, 120), inv2),                          # fc1 b
            pl.BlockSpec((120, 84), inv2),                         # fc2 w
            pl.BlockSpec((1, 84), inv2),                           # fc2 b
            pl.BlockSpec((84, 10), inv2),                          # fc3 w
            pl.BlockSpec((1, 10), inv2),                           # fc3 b
        ],
        out_specs=pl.BlockSpec((C, 10), lambda n: (n, 0)),
        scratch_shapes=[
            pltpu.VMEM((C * 48, 260), jnp.float32),   # conv1 LHS (concat-K)
            pltpu.VMEM((C * 48, 288), jnp.float32),   # conv1 post-ReLU
            pltpu.VMEM((C * 24, 144), jnp.float32),   # pooled conv1
            pltpu.VMEM((C * 20, 720), jnp.float32),   # conv2 LHS (concat-K)
            pltpu.VMEM((C * 20, 320), jnp.float32),   # conv2 post-ReLU
            pltpu.VMEM((C * 10, 160), jnp.float32),   # pooled conv2 (oh-major)
            pltpu.VMEM((C, 1600), jnp.float32),       # flattened fc1 input
        ],
        compiler_params=pltpu.CompilerParams(
            dimension_semantics=("parallel",)),
    )(x2d, prep["bt1"], prep["b1"], prep["pr1"], prep["s1"],
      prep["bt2"], prep["b2"], prep["pr2"], prep["s2"],
      prep["wfc1"], prep["bfc1"], prep["wfc2"], prep["bfc2"],
      prep["wfc3"], prep["bfc3"])
    return out


# Pure-JAX high-precision reference for validation.
def net8_reference(x_nchw, params):
    with jax.default_matmul_precision("highest"):
        x = jnp.transpose(x_nchw, (0, 2, 3, 1))

        def conv_block(x, w, b):
            y = lax.conv_general_dilated(
                x, w, window_strides=(1, 1), padding="VALID",
                dimension_numbers=("NHWC", "HWIO", "NHWC"))
            y = jnp.maximum(y + b.reshape(1, 1, 1, -1), 0.0)
            return lax.reduce_window(y, -jnp.inf, lax.max,
                                     (1, 2, 2, 1), (1, 2, 2, 1), "VALID")

        x = conv_block(x, params["conv1_w"], params["conv1_b"])
        x = conv_block(x, params["conv2_w"], params["conv2_b"])
        x = jnp.transpose(x, (0, 3, 1, 2)).reshape(x.shape[0], -1)
        h = jnp.maximum(x @ params["fc1_w"] + params["fc1_b"], 0.0)
        h = jnp.maximum(h @ params["fc2_w"] + params["fc2_b"], 0.0)
        return h @ params["fc3_w"] + params["fc3_b"]


if __name__ == "__main__":
    key = jax.random.PRNGKey(0)
    ks = jax.random.split(key, 11)
    # Deterministic synthetic parameters (shapes from Net_8.__init__):
    #   conv weights stored as (KH, KW, Cin, Cout), linear weights as (in, out).
    params = {
        "conv1_w": jax.random.normal(ks[0], (5, 5, 1, 6), jnp.float32) * 0.10,
        "conv1_b": jax.random.normal(ks[1], (1, 6), jnp.float32) * 0.10,
        "conv2_w": jax.random.normal(ks[2], (5, 5, 6, 16), jnp.float32) * 0.05,
        "conv2_b": jax.random.normal(ks[3], (1, 16), jnp.float32) * 0.05,
        "fc1_w": jax.random.normal(ks[4], (1600, 120), jnp.float32) * 0.02,
        "fc1_b": jax.random.normal(ks[5], (1, 120), jnp.float32) * 0.02,
        "fc2_w": jax.random.normal(ks[6], (120, 84), jnp.float32) * 0.05,
        "fc2_b": jax.random.normal(ks[7], (1, 84), jnp.float32) * 0.05,
        "fc3_w": jax.random.normal(ks[8], (84, 10), jnp.float32) * 0.05,
        "fc3_b": jax.random.normal(ks[9], (1, 10), jnp.float32) * 0.05,
    }

    # Input implied by the module: batch=2, 1 channel, 52x52 spatial.
    x = jax.random.normal(ks[10], (2, 1, 52, 52), jnp.float32)

    prep = prepare_params(params)
    out = jax.block_until_ready(net8_forward(x, prep))
    assert out.shape == (2, 10) and out.dtype == jnp.float32

    ref = net8_reference(x, params)
    max_diff = float(jnp.max(jnp.abs(out - ref)))
    # Tolerance accounts for bf16 storage of the large weight slabs
    # (accumulation stays f32 via preferred_element_type).
    assert jnp.allclose(out, ref, atol=1e-2, rtol=1e-2), f"max diff {max_diff}"

    print("KERNEL_OK")
</pallas_src>

<mosaic_0001>
module attributes {stable_mosaic.version = 11 : i64} {
  func.func @kernel(%arg0: i32, %arg1: memref<2x52x52xf32, #tpu.memory_space<vmem>>, %arg2: memref<260x288xbf16, #tpu.memory_space<vmem>>, %arg3: memref<1x288xf32, #tpu.memory_space<vmem>>, %arg4: memref<48x95xf32, #tpu.memory_space<vmem>>, %arg5: memref<282x144xbf16, #tpu.memory_space<vmem>>, %arg6: memref<720x320xbf16, #tpu.memory_space<vmem>>, %arg7: memref<1x320xf32, #tpu.memory_space<vmem>>, %arg8: memref<20x39xf32, #tpu.memory_space<vmem>>, %arg9: memref<304x160xbf16, #tpu.memory_space<vmem>>, %arg10: memref<1600x120xbf16, #tpu.memory_space<vmem>>, %arg11: memref<1x120xf32, #tpu.memory_space<vmem>>, %arg12: memref<120x84xf32, #tpu.memory_space<vmem>>, %arg13: memref<1x84xf32, #tpu.memory_space<vmem>>, %arg14: memref<84x10xf32, #tpu.memory_space<vmem>>, %arg15: memref<1x10xf32, #tpu.memory_space<vmem>>, %arg16: memref<2x10xf32, #tpu.memory_space<vmem>>, %arg17: memref<96x260xf32, #tpu.memory_space<vmem>>, %arg18: memref<96x288xf32, #tpu.memory_space<vmem>>, %arg19: memref<48x144xf32, #tpu.memory_space<vmem>>, %arg20: memref<40x720xf32, #tpu.memory_space<vmem>>, %arg21: memref<40x320xf32, #tpu.memory_space<vmem>>, %arg22: memref<20x160xf32, #tpu.memory_space<vmem>>, %arg23: memref<2x1600xf32, #tpu.memory_space<vmem>>) attributes {dimension_semantics = [#tpu.dimension_semantics<parallel>], iteration_bounds = array<i64: 1>, scalar_prefetch = 0 : i64, scratch_operands = 7 : i64, tpu.core_type = #tpu.core_type<tc>, window_params = [{transform_indices = @transform_0, window_bounds = array<i64: 2, 52, 52>}, {pipeline_mode = #tpu.pipeline_mode<synchronous>, transform_indices = @transform_1, window_bounds = array<i64: 260, 288>}, {pipeline_mode = #tpu.pipeline_mode<synchronous>, transform_indices = @transform_2, window_bounds = array<i64: 1, 288>}, {pipeline_mode = #tpu.pipeline_mode<synchronous>, transform_indices = @transform_3, window_bounds = array<i64: 48, 95>}, {pipeline_mode = #tpu.pipeline_mode<synchronous>, transform_indices = @transform_4, window_bounds = array<i64: 282, 144>}, {pipeline_mode = #tpu.pipeline_mode<synchronous>, transform_indices = @transform_5, window_bounds = array<i64: 720, 320>}, {pipeline_mode = #tpu.pipeline_mode<synchronous>, transform_indices = @transform_6, window_bounds = array<i64: 1, 320>}, {pipeline_mode = #tpu.pipeline_mode<synchronous>, transform_indices = @transform_7, window_bounds = array<i64: 20, 39>}, {pipeline_mode = #tpu.pipeline_mode<synchronous>, transform_indices = @transform_8, window_bounds = array<i64: 304, 160>}, {pipeline_mode = #tpu.pipeline_mode<synchronous>, transform_indices = @transform_9, window_bounds = array<i64: 1600, 120>}, {pipeline_mode = #tpu.pipeline_mode<synchronous>, transform_indices = @transform_10, window_bounds = array<i64: 1, 120>}, {pipeline_mode = #tpu.pipeline_mode<synchronous>, transform_indices = @transform_11, window_bounds = array<i64: 120, 84>}, {pipeline_mode = #tpu.pipeline_mode<synchronous>, transform_indices = @transform_12, window_bounds = array<i64: 1, 84>}, {pipeline_mode = #tpu.pipeline_mode<synchronous>, transform_indices = @transform_13, window_bounds = array<i64: 84, 10>}, {pipeline_mode = #tpu.pipeline_mode<synchronous>, transform_indices = @transform_14, window_bounds = array<i64: 1, 10>}, {transform_indices = @transform_15, window_bounds = array<i64: 2, 10>}]} {
    %c0 = arith.constant 0 : index
    %c0_0 = arith.constant 0 : index
    %c0_1 = arith.constant 0 : index
    %0 = vector.load %arg1[%c0, %c0_0, %c0_1] : memref<2x52x52xf32, #tpu.memory_space<vmem>>, vector<1x48x52xf32>
    %1 = vector.shape_cast %0 : vector<1x48x52xf32> to vector<48x52xf32>
    %c0_2 = arith.constant 0 : index
    %c0_3 = arith.constant 0 : index
    %2 = vector.load %arg17[%c0_2, %c0_3] : memref<96x260xf32, #tpu.memory_space<vmem>>, vector<48x52xf32>
    tpu.vector_store %arg17[%c0_2, %c0_3], %1 {strides = array<i32>} : memref<96x260xf32, #tpu.memory_space<vmem>>, vector<48x52xf32>,
    %c0_4 = arith.constant 0 : index
    %c1 = arith.constant 1 : index
    %c0_5 = arith.constant 0 : index
    %3 = vector.load %arg1[%c0_4, %c1, %c0_5] : memref<2x52x52xf32, #tpu.memory_space<vmem>>, vector<1x48x52xf32>
    %4 = vector.shape_cast %3 : vector<1x48x52xf32> to vector<48x52xf32>
    %c0_6 = arith.constant 0 : index
    %c52 = arith.constant 52 : index
    %5 = vector.load %arg17[%c0_6, %c52] : memref<96x260xf32, #tpu.memory_space<vmem>>, vector<48x52xf32>
    tpu.vector_store %arg17[%c0_6, %c52], %4 {strides = array<i32>} : memref<96x260xf32, #tpu.memory_space<vmem>>, vector<48x52xf32>,
    %c0_7 = arith.constant 0 : index
    %c2 = arith.constant 2 : index
    %c0_8 = arith.constant 0 : index
    %6 = vector.load %arg1[%c0_7, %c2, %c0_8] : memref<2x52x52xf32, #tpu.memory_space<vmem>>, vector<1x48x52xf32>
    %7 = vector.shape_cast %6 : vector<1x48x52xf32> to vector<48x52xf32>
    %c0_9 = arith.constant 0 : index
    %c104 = arith.constant 104 : index
    %8 = vector.load %arg17[%c0_9, %c104] : memref<96x260xf32, #tpu.memory_space<vmem>>, vector<48x52xf32>
    tpu.vector_store %arg17[%c0_9, %c104], %7 {strides = array<i32>} : memref<96x260xf32, #tpu.memory_space<vmem>>, vector<48x52xf32>,
    %c0_10 = arith.constant 0 : index
    %c3 = arith.constant 3 : index
    %c0_11 = arith.constant 0 : index
    %9 = vector.load %arg1[%c0_10, %c3, %c0_11] : memref<2x52x52xf32, #tpu.memory_space<vmem>>, vector<1x48x52xf32>
    %10 = vector.shape_cast %9 : vector<1x48x52xf32> to vector<48x52xf32>
    %c0_12 = arith.constant 0 : index
    %c156 = arith.constant 156 : index
    %11 = vector.load %arg17[%c0_12, %c156] : memref<96x260xf32, #tpu.memory_space<vmem>>, vector<48x52xf32>
    tpu.vector_store %arg17[%c0_12, %c156], %10 {strides = array<i32>} : memref<96x260xf32, #tpu.memory_space<vmem>>, vector<48x52xf32>,
    %c0_13 = arith.constant 0 : index
    %c4 = arith.constant 4 : index
    %c0_14 = arith.constant 0 : index
    %12 = vector.load %arg1[%c0_13, %c4, %c0_14] : memref<2x52x52xf32, #tpu.memory_space<vmem>>, vector<1x48x52xf32>
    %13 = vector.shape_cast %12 : vector<1x48x52xf32> to vector<48x52xf32>
    %c0_15 = arith.constant 0 : index
    %c208 = arith.constant 208 : index
    %14 = vector.load %arg17[%c0_15, %c208] : memref<96x260xf32, #tpu.memory_space<vmem>>, vector<48x52xf32>
    tpu.vector_store %arg17[%c0_15, %c208], %13 {strides = array<i32>} : memref<96x260xf32, #tpu.memory_space<vmem>>, vector<48x52xf32>,
    %c1_16 = arith.constant 1 : index
    %c0_17 = arith.constant 0 : index
    %c0_18 = arith.constant 0 : index
    %15 = vector.load %arg1[%c1_16, %c0_17, %c0_18] : memref<2x52x52xf32, #tpu.memory_space<vmem>>, vector<1x48x52xf32>
    %16 = vector.shape_cast %15 : vector<1x48x52xf32> to vector<48x52xf32>
    %c48 = arith.constant 48 : index
    %c0_19 = arith.constant 0 : index
    %17 = vector.load %arg17[%c48, %c0_19] : memref<96x260xf32, #tpu.memory_space<vmem>>, vector<48x52xf32>
    tpu.vector_store %arg17[%c48, %c0_19], %16 {strides = array<i32>} : memref<96x260xf32, #tpu.memory_space<vmem>>, vector<48x52xf32>,
    %c1_20 = arith.constant 1 : index
    %c1_21 = arith.constant 1 : index
    %c0_22 = arith.constant 0 : index
    %18 = vector.load %arg1[%c1_20, %c1_21, %c0_22] : memref<2x52x52xf32, #tpu.memory_space<vmem>>, vector<1x48x52xf32>
    %19 = vector.shape_cast %18 : vector<1x48x52xf32> to vector<48x52xf32>
    %c48_23 = arith.constant 48 : index
    %c52_24 = arith.constant 52 : index
    %20 = vector.load %arg17[%c48_23, %c52_24] : memref<96x260xf32, #tpu.memory_space<vmem>>, vector<48x52xf32>
    tpu.vector_store %arg17[%c48_23, %c52_24], %19 {strides = array<i32>} : memref<96x260xf32, #tpu.memory_space<vmem>>, vector<48x52xf32>,
    %c1_25 = arith.constant 1 : index
    %c2_26 = arith.constant 2 : index
    %c0_27 = arith.constant 0 : index
    %21 = vector.load %arg1[%c1_25, %c2_26, %c0_27] : memref<2x52x52xf32, #tpu.memory_space<vmem>>, vector<1x48x52xf32>
    %22 = vector.shape_cast %21 : vector<1x48x52xf32> to vector<48x52xf32>
    %c48_28 = arith.constant 48 : index
    %c104_29 = arith.constant 104 : index
    %23 = vector.load %arg17[%c48_28, %c104_29] : memref<96x260xf32, #tpu.memory_space<vmem>>, vector<48x52xf32>
    tpu.vector_store %arg17[%c48_28, %c104_29], %22 {strides = array<i32>} : memref<96x260xf32, #tpu.memory_space<vmem>>, vector<48x52xf32>,
    %c1_30 = arith.constant 1 : index
    %c3_31 = arith.constant 3 : index
    %c0_32 = arith.constant 0 : index
    %24 = vector.load %arg1[%c1_30, %c3_31, %c0_32] : memref<2x52x52xf32, #tpu.memory_space<vmem>>, vector<1x48x52xf32>
    %25 = vector.shape_cast %24 : vector<1x48x52xf32> to vector<48x52xf32>
    %c48_33 = arith.constant 48 : index
    %c156_34 = arith.constant 156 : index
    %26 = vector.load %arg17[%c48_33, %c156_34] : memref<96x260xf32, #tpu.memory_space<vmem>>, vector<48x52xf32>
    tpu.vector_store %arg17[%c48_33, %c156_34], %25 {strides = array<i32>} : memref<96x260xf32, #tpu.memory_space<vmem>>, vector<48x52xf32>,
    %c1_35 = arith.constant 1 : index
    %c4_36 = arith.constant 4 : index
    %c0_37 = arith.constant 0 : index
    %27 = vector.load %arg1[%c1_35, %c4_36, %c0_37] : memref<2x52x52xf32, #tpu.memory_space<vmem>>, vector<1x48x52xf32>
    %28 = vector.shape_cast %27 : vector<1x48x52xf32> to vector<48x52xf32>
    %c48_38 = arith.constant 48 : index
    %c208_39 = arith.constant 208 : index
    %29 = vector.load %arg17[%c48_38, %c208_39] : memref<96x260xf32, #tpu.memory_space<vmem>>, vector<48x52xf32>
    tpu.vector_store %arg17[%c48_38, %c208_39], %28 {strides = array<i32>} : memref<96x260xf32, #tpu.memory_space<vmem>>, vector<48x52xf32>,
    %c0_40 = arith.constant 0 : index
    %c0_41 = arith.constant 0 : index
    %30 = vector.load %arg17[%c0_40, %c0_41] : memref<96x260xf32, #tpu.memory_space<vmem>>, vector<96x260xf32>
    %c0_42 = arith.constant 0 : index
    %c0_43 = arith.constant 0 : index
    %31 = vector.load %arg2[%c0_42, %c0_43] : memref<260x288xbf16, #tpu.memory_space<vmem>>, vector<260x288xbf16>
    %32 = arith.extf %31 : vector<260x288xbf16> to vector<260x288xf32>
    %cst = arith.constant dense<0.000000e+00> : vector<96x288xf32>
    %33 = tpu.matmul %30, %32, %cst {dimension_numbers = #tpu.dot_dimension_numbers<[1], [0], [0], [1], [0, 0, 1, 1], [], []>} : vector<96x260xf32>, vector<260x288xf32>, vector<96x288xf32> -> vector<96x288xf32>
    %c0_44 = arith.constant 0 : index
    %c0_45 = arith.constant 0 : index
    %34 = vector.load %arg3[%c0_44, %c0_45] : memref<1x288xf32, #tpu.memory_space<vmem>>, vector<1x288xf32>
    %35 = vector.broadcast %34 : vector<1x288xf32> to vector<96x288xf32>
    %36 = arith.addf %33, %35 : vector<96x288xf32>
    %cst_46 = arith.constant 0.000000e+00 : f32
    %37 = vector.broadcast %cst_46 : f32 to vector<96x288xf32>
    %38 = arith.maximumf %36, %37 : vector<96x288xf32>
    %c0_47 = arith.constant 0 : index
    %c0_48 = arith.constant 0 : index
    %39 = vector.load %arg18[%c0_47, %c0_48] : memref<96x288xf32, #tpu.memory_space<vmem>>, vector<96x288xf32>
    tpu.vector_store %arg18[%c0_47, %c0_48], %38 {strides = array<i32>} : memref<96x288xf32, #tpu.memory_space<vmem>>, vector<96x288xf32>,
    %c0_49 = arith.constant 0 : index
    %c0_50 = arith.constant 0 : index
    %40 = vector.load %arg18[%c0_49, %c0_50] : memref<96x288xf32, #tpu.memory_space<vmem>>, vector<95x282xf32>
    %c1_51 = arith.constant 1 : index
    %c0_52 = arith.constant 0 : index
    %41 = vector.load %arg18[%c1_51, %c0_52] : memref<96x288xf32, #tpu.memory_space<vmem>>, vector<95x282xf32>
    %42 = arith.maximumf %40, %41 : vector<95x282xf32>
    %c0_53 = arith.constant 0 : index
    %c6 = arith.constant 6 : index
    %43 = vector.load %arg18[%c0_53, %c6] : memref<96x288xf32, #tpu.memory_space<vmem>>, vector<95x282xf32>
    %c1_54 = arith.constant 1 : index
    %c6_55 = arith.constant 6 : index
    %44 = vector.load %arg18[%c1_54, %c6_55] : memref<96x288xf32, #tpu.memory_space<vmem>>, vector<95x282xf32>
    %45 = arith.maximumf %43, %44 : vector<95x282xf32>
    %46 = arith.maximumf %42, %45 : vector<95x282xf32>
    %c0_56 = arith.constant 0 : index
    %c0_57 = arith.constant 0 : index
    %47 = vector.load %arg4[%c0_56, %c0_57] : memref<48x95xf32, #tpu.memory_space<vmem>>, vector<48x95xf32>
    %cst_58 = arith.constant dense<0.000000e+00> : vector<48x282xf32>
    %48 = tpu.matmul %47, %46, %cst_58 {dimension_numbers = #tpu.dot_dimension_numbers<[1], [0], [0], [1], [0, 0, 1, 1], [], []>} : vector<48x95xf32>, vector<95x282xf32>, vector<48x282xf32> -> vector<48x282xf32>
    %c0_59 = arith.constant 0 : index
    %c0_60 = arith.constant 0 : index
    %49 = vector.load %arg5[%c0_59, %c0_60] : memref<282x144xbf16, #tpu.memory_space<vmem>>, vector<282x144xbf16>
    %50 = arith.extf %49 : vector<282x144xbf16> to vector<282x144xf32>
    %cst_61 = arith.constant dense<0.000000e+00> : vector<48x144xf32>
    %51 = tpu.matmul %48, %50, %cst_61 {dimension_numbers = #tpu.dot_dimension_numbers<[1], [0], [0], [1], [0, 0, 1, 1], [], []>} : vector<48x282xf32>, vector<282x144xf32>, vector<48x144xf32> -> vector<48x144xf32>
    %c0_62 = arith.constant 0 : index
    %c0_63 = arith.constant 0 : index
    %52 = vector.load %arg19[%c0_62, %c0_63] : memref<48x144xf32, #tpu.memory_space<vmem>>, vector<48x144xf32>
    tpu.vector_store %arg19[%c0_62, %c0_63], %51 {strides = array<i32>} : memref<48x144xf32, #tpu.memory_space<vmem>>, vector<48x144xf32>,
    %c0_64 = arith.constant 0 : index
    %c0_65 = arith.constant 0 : index
    %53 = vector.load %arg19[%c0_64, %c0_65] : memref<48x144xf32, #tpu.memory_space<vmem>>, vector<20x144xf32>
    %c0_66 = arith.constant 0 : index
    %c0_67 = arith.constant 0 : index
    %54 = vector.load %arg20[%c0_66, %c0_67] : memref<40x720xf32, #tpu.memory_space<vmem>>, vector<20x144xf32>
    tpu.vector_store %arg20[%c0_66, %c0_67], %53 {strides = array<i32>} : memref<40x720xf32, #tpu.memory_space<vmem>>, vector<20x144xf32>,
    %c1_68 = arith.constant 1 : index
    %c0_69 = arith.constant 0 : index
    %55 = vector.load %arg19[%c1_68, %c0_69] : memref<48x144xf32, #tpu.memory_space<vmem>>, vector<20x144xf32>
    %c0_70 = arith.constant 0 : index
    %c144 = arith.constant 144 : index
    %56 = vector.load %arg20[%c0_70, %c144] : memref<40x720xf32, #tpu.memory_space<vmem>>, vector<20x144xf32>
    tpu.vector_store %arg20[%c0_70, %c144], %55 {strides = array<i32>} : memref<40x720xf32, #tpu.memory_space<vmem>>, vector<20x144xf32>,
    %c2_71 = arith.constant 2 : index
    %c0_72 = arith.constant 0 : index
    %57 = vector.load %arg19[%c2_71, %c0_72] : memref<48x144xf32, #tpu.memory_space<vmem>>, vector<20x144xf32>
    %c0_73 = arith.constant 0 : index
    %c288 = arith.constant 288 : index
    %58 = vector.load %arg20[%c0_73, %c288] : memref<40x720xf32, #tpu.memory_space<vmem>>, vector<20x144xf32>
    tpu.vector_store %arg20[%c0_73, %c288], %57 {strides = array<i32>} : memref<40x720xf32, #tpu.memory_space<vmem>>, vector<20x144xf32>,
    %c3_74 = arith.constant 3 : index
    %c0_75 = arith.constant 0 : index
    %59 = vector.load %arg19[%c3_74, %c0_75] : memref<48x144xf32, #tpu.memory_space<vmem>>, vector<20x144xf32>
    %c0_76 = arith.constant 0 : index
    %c432 = arith.constant 432 : index
    %60 = vector.load %arg20[%c0_76, %c432] : memref<40x720xf32, #tpu.memory_space<vmem>>, vector<20x144xf32>
    tpu.vector_store %arg20[%c0_76, %c432], %59 {strides = array<i32>} : memref<40x720xf32, #tpu.memory_space<vmem>>, vector<20x144xf32>,
    %c4_77 = arith.constant 4 : index
    %c0_78 = arith.constant 0 : index
    %61 = vector.load %arg19[%c4_77, %c0_78] : memref<48x144xf32, #tpu.memory_space<vmem>>, vector<20x144xf32>
    %c0_79 = arith.constant 0 : index
    %c576 = arith.constant 576 : index
    %62 = vector.load %arg20[%c0_79, %c576] : memref<40x720xf32, #tpu.memory_space<vmem>>, vector<20x144xf32>
    tpu.vector_store %arg20[%c0_79, %c576], %61 {strides = array<i32>} : memref<40x720xf32, #tpu.memory_space<vmem>>, vector<20x144xf32>,
    %c24 = arith.constant 24 : index
    %c0_80 = arith.constant 0 : index
    %63 = vector.load %arg19[%c24, %c0_80] : memref<48x144xf32, #tpu.memory_space<vmem>>, vector<20x144xf32>
    %c20 = arith.constant 20 : index
    %c0_81 = arith.constant 0 : index
    %64 = vector.load %arg20[%c20, %c0_81] : memref<40x720xf32, #tpu.memory_space<vmem>>, vector<20x144xf32>
    tpu.vector_store %arg20[%c20, %c0_81], %63 {strides = array<i32>} : memref<40x720xf32, #tpu.memory_space<vmem>>, vector<20x144xf32>,
    %c25 = arith.constant 25 : index
    %c0_82 = arith.constant 0 : index
    %65 = vector.load %arg19[%c25, %c0_82] : memref<48x144xf32, #tpu.memory_space<vmem>>, vector<20x144xf32>
    %c20_83 = arith.constant 20 : index
    %c144_84 = arith.constant 144 : index
    %66 = vector.load %arg20[%c20_83, %c144_84] : memref<40x720xf32, #tpu.memory_space<vmem>>, vector<20x144xf32>
    tpu.vector_store %arg20[%c20_83, %c144_84], %65 {strides = array<i32>} : memref<40x720xf32, #tpu.memory_space<vmem>>, vector<20x144xf32>,
    %c26 = arith.constant 26 : index
    %c0_85 = arith.constant 0 : index
    %67 = vector.load %arg19[%c26, %c0_85] : memref<48x144xf32, #tpu.memory_space<vmem>>, vector<20x144xf32>
    %c20_86 = arith.constant 20 : index
    %c288_87 = arith.constant 288 : index
    %68 = vector.load %arg20[%c20_86, %c288_87] : memref<40x720xf32, #tpu.memory_space<vmem>>, vector<20x144xf32>
    tpu.vector_store %arg20[%c20_86, %c288_87], %67 {strides = array<i32>} : memref<40x720xf32, #tpu.memory_space<vmem>>, vector<20x144xf32>,
    %c27 = arith.constant 27 : index
    %c0_88 = arith.constant 0 : index
    %69 = vector.load %arg19[%c27, %c0_88] : memref<48x144xf32, #tpu.memory_space<vmem>>, vector<20x144xf32>
    %c20_89 = arith.constant 20 : index
    %c432_90 = arith.constant 432 : index
    %70 = vector.load %arg20[%c20_89, %c432_90] : memref<40x720xf32, #tpu.memory_space<vmem>>, vector<20x144xf32>
    tpu.vector_store %arg20[%c20_89, %c432_90], %69 {strides = array<i32>} : memref<40x720xf32, #tpu.memory_space<vmem>>, vector<20x144xf32>,
    %c28 = arith.constant 28 : index
    %c0_91 = arith.constant 0 : index
    %71 = vector.load %arg19[%c28, %c0_91] : memref<48x144xf32, #tpu.memory_space<vmem>>, vector<20x144xf32>
    %c20_92 = arith.constant 20 : index
    %c576_93 = arith.constant 576 : index
    %72 = vector.load %arg20[%c20_92, %c576_93] : memref<40x720xf32, #tpu.memory_space<vmem>>, vector<20x144xf32>
    tpu.vector_store %arg20[%c20_92, %c576_93], %71 {strides = array<i32>} : memref<40x720xf32, #tpu.memory_space<vmem>>, vector<20x144xf32>,
    %c0_94 = arith.constant 0 : index
    %c0_95 = arith.constant 0 : index
    %73 = vector.load %arg20[%c0_94, %c0_95] : memref<40x720xf32, #tpu.memory_space<vmem>>, vector<40x720xf32>
    %c0_96 = arith.constant 0 : index
    %c0_97 = arith.constant 0 : index
    %74 = vector.load %arg6[%c0_96, %c0_97] : memref<720x320xbf16, #tpu.memory_space<vmem>>, vector<720x320xbf16>
    %75 = arith.extf %74 : vector<720x320xbf16> to vector<720x320xf32>
    %cst_98 = arith.constant dense<0.000000e+00> : vector<40x320xf32>
    %76 = tpu.matmul %73, %75, %cst_98 {dimension_numbers = #tpu.dot_dimension_numbers<[1], [0], [0], [1], [0, 0, 1, 1], [], []>} : vector<40x720xf32>, vector<720x320xf32>, vector<40x320xf32> -> vector<40x320xf32>
    %c0_99 = arith.constant 0 : index
    %c0_100 = arith.constant 0 : index
    %77 = vector.load %arg7[%c0_99, %c0_100] : memref<1x320xf32, #tpu.memory_space<vmem>>, vector<1x320xf32>
    %78 = vector.broadcast %77 : vector<1x320xf32> to vector<40x320xf32>
    %79 = arith.addf %76, %78 : vector<40x320xf32>
    %cst_101 = arith.constant 0.000000e+00 : f32
    %80 = vector.broadcast %cst_101 : f32 to vector<40x320xf32>
    %81 = arith.maximumf %79, %80 : vector<40x320xf32>
    %c0_102 = arith.constant 0 : index
    %c0_103 = arith.constant 0 : index
    %82 = vector.load %arg21[%c0_102, %c0_103] : memref<40x320xf32, #tpu.memory_space<vmem>>, vector<40x320xf32>
    tpu.vector_store %arg21[%c0_102, %c0_103], %81 {strides = array<i32>} : memref<40x320xf32, #tpu.memory_space<vmem>>, vector<40x320xf32>,
    %c0_104 = arith.constant 0 : index
    %c0_105 = arith.constant 0 : index
    %83 = vector.load %arg21[%c0_104, %c0_105] : memref<40x320xf32, #tpu.memory_space<vmem>>, vector<39x304xf32>
    %c1_106 = arith.constant 1 : index
    %c0_107 = arith.constant 0 : index
    %84 = vector.load %arg21[%c1_106, %c0_107] : memref<40x320xf32, #tpu.memory_space<vmem>>, vector<39x304xf32>
    %85 = arith.maximumf %83, %84 : vector<39x304xf32>
    %c0_108 = arith.constant 0 : index
    %c16 = arith.constant 16 : index
    %86 = vector.load %arg21[%c0_108, %c16] : memref<40x320xf32, #tpu.memory_space<vmem>>, vector<39x304xf32>
    %c1_109 = arith.constant 1 : index
    %c16_110 = arith.constant 16 : index
    %87 = vector.load %arg21[%c1_109, %c16_110] : memref<40x320xf32, #tpu.memory_space<vmem>>, vector<39x304xf32>
    %88 = arith.maximumf %86, %87 : vector<39x304xf32>
    %89 = arith.maximumf %85, %88 : vector<39x304xf32>
    %c0_111 = arith.constant 0 : index
    %c0_112 = arith.constant 0 : index
    %90 = vector.load %arg8[%c0_111, %c0_112] : memref<20x39xf32, #tpu.memory_space<vmem>>, vector<20x39xf32>
    %cst_113 = arith.constant dense<0.000000e+00> : vector<20x304xf32>
    %91 = tpu.matmul %90, %89, %cst_113 {dimension_numbers = #tpu.dot_dimension_numbers<[1], [0], [0], [1], [0, 0, 1, 1], [], []>} : vector<20x39xf32>, vector<39x304xf32>, vector<20x304xf32> -> vector<20x304xf32>
    %c0_114 = arith.constant 0 : index
    %c0_115 = arith.constant 0 : index
    %92 = vector.load %arg9[%c0_114, %c0_115] : memref<304x160xbf16, #tpu.memory_space<vmem>>, vector<304x160xbf16>
    %93 = arith.extf %92 : vector<304x160xbf16> to vector<304x160xf32>
    %cst_116 = arith.constant dense<0.000000e+00> : vector<20x160xf32>
    %94 = tpu.matmul %91, %93, %cst_116 {dimension_numbers = #tpu.dot_dimension_numbers<[1], [0], [0], [1], [0, 0, 1, 1], [], []>} : vector<20x304xf32>, vector<304x160xf32>, vector<20x160xf32> -> vector<20x160xf32>
    %c0_117 = arith.constant 0 : index
    %c0_118 = arith.constant 0 : index
    %95 = vector.load %arg22[%c0_117, %c0_118] : memref<20x160xf32, #tpu.memory_space<vmem>>, vector<20x160xf32>
    tpu.vector_store %arg22[%c0_117, %c0_118], %94 {strides = array<i32>} : memref<20x160xf32, #tpu.memory_space<vmem>>, vector<20x160xf32>,
    %c0_119 = arith.constant 0 : index
    %c0_120 = arith.constant 0 : index
    %96 = vector.load %arg22[%c0_119, %c0_120] : memref<20x160xf32, #tpu.memory_space<vmem>>, vector<2x160xf32>
    %c0_121 = arith.constant 0 : index
    %c0_122 = arith.constant 0 : index
    %97 = vector.load %arg23[%c0_121, %c0_122] : memref<2x1600xf32, #tpu.memory_space<vmem>>, vector<2x160xf32>
    tpu.vector_store %arg23[%c0_121, %c0_122], %96 {strides = array<i32>} : memref<2x1600xf32, #tpu.memory_space<vmem>>, vector<2x160xf32>,
    %c2_123 = arith.constant 2 : index
    %c0_124 = arith.constant 0 : index
    %98 = vector.load %arg22[%c2_123, %c0_124] : memref<20x160xf32, #tpu.memory_space<vmem>>, vector<2x160xf32>
    %c0_125 = arith.constant 0 : index
    %c160 = arith.constant 160 : index
    %99 = vector.load %arg23[%c0_125, %c160] : memref<2x1600xf32, #tpu.memory_space<vmem>>, vector<2x160xf32>
    tpu.vector_store %arg23[%c0_125, %c160], %98 {strides = array<i32>} : memref<2x1600xf32, #tpu.memory_space<vmem>>, vector<2x160xf32>,
    %c4_126 = arith.constant 4 : index
    %c0_127 = arith.constant 0 : index
    %100 = vector.load %arg22[%c4_126, %c0_127] : memref<20x160xf32, #tpu.memory_space<vmem>>, vector<2x160xf32>
    %c0_128 = arith.constant 0 : index
    %c320 = arith.constant 320 : index
    %101 = vector.load %arg23[%c0_128, %c320] : memref<2x1600xf32, #tpu.memory_space<vmem>>, vector<2x160xf32>
    tpu.vector_store %arg23[%c0_128, %c320], %100 {strides = array<i32>} : memref<2x1600xf32, #tpu.memory_space<vmem>>, vector<2x160xf32>,
    %c6_129 = arith.constant 6 : index
    %c0_130 = arith.constant 0 : index
    %102 = vector.load %arg22[%c6_129, %c0_130] : memref<20x160xf32, #tpu.memory_space<vmem>>, vector<2x160xf32>
    %c0_131 = arith.constant 0 : index
    %c480 = arith.constant 480 : index
    %103 = vector.load %arg23[%c0_131, %c480] : memref<2x1600xf32, #tpu.memory_space<vmem>>, vector<2x160xf32>
    tpu.vector_store %arg23[%c0_131, %c480], %102 {strides = array<i32>} : memref<2x1600xf32, #tpu.memory_space<vmem>>, vector<2x160xf32>,
    %c8 = arith.constant 8 : index
    %c0_132 = arith.constant 0 : index
    %104 = vector.load %arg22[%c8, %c0_132] : memref<20x160xf32, #tpu.memory_space<vmem>>, vector<2x160xf32>
    %c0_133 = arith.constant 0 : index
    %c640 = arith.constant 640 : index
    %105 = vector.load %arg23[%c0_133, %c640] : memref<2x1600xf32, #tpu.memory_space<vmem>>, vector<2x160xf32>
    tpu.vector_store %arg23[%c0_133, %c640], %104 {strides = array<i32>} : memref<2x1600xf32, #tpu.memory_space<vmem>>, vector<2x160xf32>,
    %c10 = arith.constant 10 : index
    %c0_134 = arith.constant 0 : index
    %106 = vector.load %arg22[%c10, %c0_134] : memref<20x160xf32, #tpu.memory_space<vmem>>, vector<2x160xf32>
    %c0_135 = arith.constant 0 : index
    %c800 = arith.constant 800 : index
    %107 = vector.load %arg23[%c0_135, %c800] : memref<2x1600xf32, #tpu.memory_space<vmem>>, vector<2x160xf32>
    tpu.vector_store %arg23[%c0_135, %c800], %106 {strides = array<i32>} : memref<2x1600xf32, #tpu.memory_space<vmem>>, vector<2x160xf32>,
    %c12 = arith.constant 12 : index
    %c0_136 = arith.constant 0 : index
    %108 = vector.load %arg22[%c12, %c0_136] : memref<20x160xf32, #tpu.memory_space<vmem>>, vector<2x160xf32>
    %c0_137 = arith.constant 0 : index
    %c960 = arith.constant 960 : index
    %109 = vector.load %arg23[%c0_137, %c960] : memref<2x1600xf32, #tpu.memory_space<vmem>>, vector<2x160xf32>
    tpu.vector_store %arg23[%c0_137, %c960], %108 {strides = array<i32>} : memref<2x1600xf32, #tpu.memory_space<vmem>>, vector<2x160xf32>,
    %c14 = arith.constant 14 : index
    %c0_138 = arith.constant 0 : index
    %110 = vector.load %arg22[%c14, %c0_138] : memref<20x160xf32, #tpu.memory_space<vmem>>, vector<2x160xf32>
    %c0_139 = arith.constant 0 : index
    %c1120 = arith.constant 1120 : index
    %111 = vector.load %arg23[%c0_139, %c1120] : memref<2x1600xf32, #tpu.memory_space<vmem>>, vector<2x160xf32>
    tpu.vector_store %arg23[%c0_139, %c1120], %110 {strides = array<i32>} : memref<2x1600xf32, #tpu.memory_space<vmem>>, vector<2x160xf32>,
    %c16_140 = arith.constant 16 : index
    %c0_141 = arith.constant 0 : index
    %112 = vector.load %arg22[%c16_140, %c0_141] : memref<20x160xf32, #tpu.memory_space<vmem>>, vector<2x160xf32>
    %c0_142 = arith.constant 0 : index
    %c1280 = arith.constant 1280 : index
    %113 = vector.load %arg23[%c0_142, %c1280] : memref<2x1600xf32, #tpu.memory_space<vmem>>, vector<2x160xf32>
    tpu.vector_store %arg23[%c0_142, %c1280], %112 {strides = array<i32>} : memref<2x1600xf32, #tpu.memory_space<vmem>>, vector<2x160xf32>,
    %c18 = arith.constant 18 : index
    %c0_143 = arith.constant 0 : index
    %114 = vector.load %arg22[%c18, %c0_143] : memref<20x160xf32, #tpu.memory_space<vmem>>, vector<2x160xf32>
    %c0_144 = arith.constant 0 : index
    %c1440 = arith.constant 1440 : index
    %115 = vector.load %arg23[%c0_144, %c1440] : memref<2x1600xf32, #tpu.memory_space<vmem>>, vector<2x160xf32>
    tpu.vector_store %arg23[%c0_144, %c1440], %114 {strides = array<i32>} : memref<2x1600xf32, #tpu.memory_space<vmem>>, vector<2x160xf32>,
    %c0_145 = arith.constant 0 : index
    %c0_146 = arith.constant 0 : index
    %116 = vector.load %arg23[%c0_145, %c0_146] : memref<2x1600xf32, #tpu.memory_space<vmem>>, vector<2x1600xf32>
    %c0_147 = arith.constant 0 : index
    %c0_148 = arith.constant 0 : index
    %117 = vector.load %arg10[%c0_147, %c0_148] : memref<1600x120xbf16, #tpu.memory_space<vmem>>, vector<1600x120xbf16>
    %118 = arith.extf %117 : vector<1600x120xbf16> to vector<1600x120xf32>
    %cst_149 = arith.constant dense<0.000000e+00> : vector<2x120xf32>
    %119 = tpu.matmul %116, %118, %cst_149 {dimension_numbers = #tpu.dot_dimension_numbers<[1], [0], [0], [1], [0, 0, 1, 1], [], []>} : vector<2x1600xf32>, vector<1600x120xf32>, vector<2x120xf32> -> vector<2x120xf32>
    %c0_150 = arith.constant 0 : index
    %c0_151 = arith.constant 0 : index
    %120 = vector.load %arg11[%c0_150, %c0_151] : memref<1x120xf32, #tpu.memory_space<vmem>>, vector<1x120xf32>
    %121 = vector.broadcast %120 : vector<1x120xf32> to vector<2x120xf32>
    %122 = arith.addf %119, %121 : vector<2x120xf32>
    %cst_152 = arith.constant 0.000000e+00 : f32
    %123 = vector.broadcast %cst_152 : f32 to vector<2x120xf32>
    %124 = arith.maximumf %122, %123 : vector<2x120xf32>
    %c0_153 = arith.constant 0 : index
    %c0_154 = arith.constant 0 : index
    %125 = vector.load %arg12[%c0_153, %c0_154] : memref<120x84xf32, #tpu.memory_space<vmem>>, vector<120x84xf32>
    %cst_155 = arith.constant dense<0.000000e+00> : vector<2x84xf32>
    %126 = tpu.matmul %124, %125, %cst_155 {dimension_numbers = #tpu.dot_dimension_numbers<[1], [0], [0], [1], [0, 0, 1, 1], [], []>} : vector<2x120xf32>, vector<120x84xf32>, vector<2x84xf32> -> vector<2x84xf32>
    %c0_156 = arith.constant 0 : index
    %c0_157 = arith.constant 0 : index
    %127 = vector.load %arg13[%c0_156, %c0_157] : memref<1x84xf32, #tpu.memory_space<vmem>>, vector<1x84xf32>
    %128 = vector.broadcast %127 : vector<1x84xf32> to vector<2x84xf32>
    %129 = arith.addf %126, %128 : vector<2x84xf32>
    %cst_158 = arith.constant 0.000000e+00 : f32
    %130 = vector.broadcast %cst_158 : f32 to vector<2x84xf32>
    %131 = arith.maximumf %129, %130 : vector<2x84xf32>
    %c0_159 = arith.constant 0 : index
    %c0_160 = arith.constant 0 : index
    %132 = vector.load %arg14[%c0_159, %c0_160] : memref<84x10xf32, #tpu.memory_space<vmem>>, vector<84x10xf32>
    %cst_161 = arith.constant dense<0.000000e+00> : vector<2x10xf32>
    %133 = tpu.matmul %131, %132, %cst_161 {dimension_numbers = #tpu.dot_dimension_numbers<[1], [0], [0], [1], [0, 0, 1, 1], [], []>} : vector<2x84xf32>, vector<84x10xf32>, vector<2x10xf32> -> vector<2x10xf32>
    %c0_162 = arith.constant 0 : index
    %c0_163 = arith.constant 0 : index
    %134 = vector.load %arg15[%c0_162, %c0_163] : memref<1x10xf32, #tpu.memory_space<vmem>>, vector<1x10xf32>
    %135 = vector.broadcast %134 : vector<1x10xf32> to vector<2x10xf32>
    %136 = arith.addf %133, %135 : vector<2x10xf32>
    %c0_164 = arith.constant 0 : index
    %c0_165 = arith.constant 0 : index
    %137 = vector.load %arg16[%c0_164, %c0_165] : memref<2x10xf32, #tpu.memory_space<vmem>>, vector<2x10xf32>
    tpu.vector_store %arg16[%c0_164, %c0_165], %136 {strides = array<i32>} : memref<2x10xf32, #tpu.memory_space<vmem>>, vector<2x10xf32>,
    return
  }
  func.func @transform_0(%arg0: i32) -> (i32, i32, i32) {
    %c0_i32 = arith.constant 0 : i32
    %c0_i32_0 = arith.constant 0 : i32
    %c0_i32_1 = arith.constant 0 : i32
    return %arg0, %c0_i32, %c0_i32_0 : i32, i32, i32
  }
  func.func @transform_1(%arg0: i32) -> (i32, i32) {
    %c0_i32 = arith.constant 0 : i32
    %c0_i32_0 = arith.constant 0 : i32
    %c0_i32_1 = arith.constant 0 : i32
    return %c0_i32, %c0_i32_0 : i32, i32
  }
  func.func @transform_2(%arg0: i32) -> (i32, i32) {
    %c0_i32 = arith.constant 0 : i32
    %c0_i32_0 = arith.constant 0 : i32
    %c0_i32_1 = arith.constant 0 : i32
    return %c0_i32, %c0_i32_0 : i32, i32
  }
  func.func @transform_3(%arg0: i32) -> (i32, i32) {
    %c0_i32 = arith.constant 0 : i32
    %c0_i32_0 = arith.constant 0 : i32
    %c0_i32_1 = arith.constant 0 : i32
    return %c0_i32, %c0_i32_0 : i32, i32
  }
  func.func @transform_4(%arg0: i32) -> (i32, i32) {
    %c0_i32 = arith.constant 0 : i32
    %c0_i32_0 = arith.constant 0 : i32
    %c0_i32_1 = arith.constant 0 : i32
    return %c0_i32, %c0_i32_0 : i32, i32
  }
  func.func @transform_5(%arg0: i32) -> (i32, i32) {
    %c0_i32 = arith.constant 0 : i32
    %c0_i32_0 = arith.constant 0 : i32
    %c0_i32_1 = arith.constant 0 : i32
    return %c0_i32, %c0_i32_0 : i32, i32
  }
  func.func @transform_6(%arg0: i32) -> (i32, i32) {
    %c0_i32 = arith.constant 0 : i32
    %c0_i32_0 = arith.constant 0 : i32
    %c0_i32_1 = arith.constant 0 : i32
    return %c0_i32, %c0_i32_0 : i32, i32
  }
  func.func @transform_7(%arg0: i32) -> (i32, i32) {
    %c0_i32 = arith.constant 0 : i32
    %c0_i32_0 = arith.constant 0 : i32
    %c0_i32_1 = arith.constant 0 : i32
    return %c0_i32, %c0_i32_0 : i32, i32
  }
  func.func @transform_8(%arg0: i32) -> (i32, i32) {
    %c0_i32 = arith.constant 0 : i32
    %c0_i32_0 = arith.constant 0 : i32
    %c0_i32_1 = arith.constant 0 : i32
    return %c0_i32, %c0_i32_0 : i32, i32
  }
  func.func @transform_9(%arg0: i32) -> (i32, i32) {
    %c0_i32 = arith.constant 0 : i32
    %c0_i32_0 = arith.constant 0 : i32
    %c0_i32_1 = arith.constant 0 : i32
    return %c0_i32, %c0_i32_0 : i32, i32
  }
  func.func @transform_10(%arg0: i32) -> (i32, i32) {
    %c0_i32 = arith.constant 0 : i32
    %c0_i32_0 = arith.constant 0 : i32
    %c0_i32_1 = arith.constant 0 : i32
    return %c0_i32, %c0_i32_0 : i32, i32
  }
  func.func @transform_11(%arg0: i32) -> (i32, i32) {
    %c0_i32 = arith.constant 0 : i32
    %c0_i32_0 = arith.constant 0 : i32
    %c0_i32_1 = arith.constant 0 : i32
    return %c0_i32, %c0_i32_0 : i32, i32
  }
  func.func @transform_12(%arg0: i32) -> (i32, i32) {
    %c0_i32 = arith.constant 0 : i32
    %c0_i32_0 = arith.constant 0 : i32
    %c0_i32_1 = arith.constant 0 : i32
    return %c0_i32, %c0_i32_0 : i32, i32
  }
  func.func @transform_13(%arg0: i32) -> (i32, i32) {
    %c0_i32 = arith.constant 0 : i32
    %c0_i32_0 = arith.constant 0 : i32
    %c0_i32_1 = arith.constant 0 : i32
    return %c0_i32, %c0_i32_0 : i32, i32
  }
  func.func @transform_14(%arg0: i32) -> (i32, i32) {
    %c0_i32 = arith.constant 0 : i32
    %c0_i32_0 = arith.constant 0 : i32
    %c0_i32_1 = arith.constant 0 : i32
    return %c0_i32, %c0_i32_0 : i32, i32
  }
  func.func @transform_15(%arg0: i32) -> (i32, i32) {
    %c0_i32 = arith.constant 0 : i32
    %c0_i32_0 = arith.constant 0 : i32
    return %arg0, %c0_i32 : i32, i32
  }
}

</mosaic_0001>

<bundles_post_ra>
// kernel: net8_forward.1
= control target key start
LH: loop header
LB: loop body
LE: loop exit
PB: predicated region body
PF: predicated region fallthrough
CT: control target
= control target key end

     0   :  { %s8767_s22 = smov 104   ;;  %s8768_s23 = smov 52   ;;  %vm57_vm0 = vcmask 424960   ;;  %vm649_vm1 = vcmask 1043456   ;;  %vm133_vm2 = vcmask 228352   ;;  %vm94_vm3 = vcmask 851360   ;;  %s11556_s0 = inlined_call_operand.vmem [shape: f32[2,52,52], index: 0, kind: input, shape index: {}]   ;;  %s11557_s1 = inlined_call_operand.vmem [shape: bf16[260,288], index: 1, kind: input, shape index: {}]   ;;  %s11558_s2 = inlined_call_operand.vmem [shape: f32[1,288], index: 2, kind: input, shape index: {}]   ;;  %s11559_s3 = inlined_call_operand.vmem [shape: f32[48,95], index: 3, kind: input, shape index: {}]   ;;  %s11560_s4 = inlined_call_operand.vmem [shape: bf16[282,144], index: 4, kind: input, shape index: {}]   ;;  %s11561_s5 = inlined_call_operand.vmem [shape: bf16[720,320], index: 5, kind: input, shape index: {}]   ;;  %s11562_s6 = inlined_call_operand.vmem [shape: f32[1,320], index: 6, kind: input, shape index: {}]   ;;  %s11563_s7 = inlined_call_operand.vmem [shape: f32[20,39], index: 7, kind: input, shape index: {}]   ;;  %s11564_s8 = inlined_call_operand.vmem [shape: bf16[304,160], index: 8, kind: input, shape index: {}]   ;;  %s11565_s9 = inlined_call_operand.vmem [shape: bf16[1600,120], index: 9, kind: input, shape index: {}]   ;;  %s11566_s10 = inlined_call_operand.vmem [shape: f32[1,120], index: 10, kind: input, shape index: {}]   ;;  %s11567_s11 = inlined_call_operand.vmem [shape: f32[120,84], index: 11, kind: input, shape index: {}]   ;;  %s11568_s12 = inlined_call_operand.vmem [shape: f32[1,84], index: 12, kind: input, shape index: {}]   ;;  %s11569_s13 = inlined_call_operand.vmem [shape: f32[84,10], index: 13, kind: input, shape index: {}]   ;;  %s11570_s14 = inlined_call_operand.vmem [shape: f32[1,10], index: 14, kind: input, shape index: {}]   ;;  %s11571_s15 = inlined_call_operand.hbm [shape: f32[2,10], index: 15, kind: output, shape index: {}]  }
   0x1   :  { %v101_v0 = vld [vmem:[%s11556_s0 + $0x2] sm:$0xff]  ;;  %s8769_s28 = smov 28   ;;  %s8770_s29 = smov 80   ;;  %v102_v4 = vld [vmem:[%s11556_s0 + $0xa] sm:$0xff]  ;;  %v103_v10 = vld [vmem:[%s11556_s0 + $0x12] sm:$0xff]  ;;  %vm131_vm4 = vcmask 1048384  }
   0x2   :  { %v64_v1 = vld [vmem:[%s11556_s0 + $0x1] sm:$0xff]  ;;  %113 = vrot.lane.b32.xlu0 %v101_v0, %s8767_s22  ;;  %v146_v5 = vld [vmem:[%s11556_s0 + $0xb] sm:$0xff]  ;;  %v147_v11 = vld [vmem:[%s11556_s0 + $0x13] sm:$0xff]  ;;  %vm175_vm5 = vcmask 654560   ;;  %vm214_vm6 = vcmask 31744   ;;  %vm212_vm7 = vcmask 1048192  }
   0x3   :  { %76 = vrot.lane.b32.xlu1 %v64_v1, %s8768_s23  ;;  %v145_v2 = vld [vmem:[%s11556_s0 + $0x3] sm:$0xff]  ;;  %v183_v7 = vld [vmem:[%s11556_s0 + $0xc] sm:$0xff]  ;;  %v184_v15 = vld [vmem:[%s11556_s0 + $0x14] sm:$0xff] }
   0x4   :  { %v182_v3 = vld [vmem:[%s11556_s0 + $0x4] sm:$0xff]  ;;  %v8377_v9 = vld [vmem:[%s11557_s1] ss:$12 sps:$4 sm:$0xff]   ;;  %v66_v14 = vld [vmem:[%s11556_s0 + $0x11] sm:$0xff] }
   0x5   :  { %v65_v6 = vld [vmem:[%s11556_s0 + $0x9] sm:$0xff]  ;;  %v8380_v13 = vld [vmem:[%s11557_s1 + $0x18] ss:$12 sps:$4 sm:$0xff]   ;;  %v8381_v16 = vld [vmem:[%s11557_s1 + $0x34] ss:$12 sps:$4 sm:$0xff]  }
   0x6   :  { %157 = vrot.lane.b32.xlu0 %v145_v2, %s8769_s28  ;;  %v8375_v8 = vld [vmem:[%s11557_s1 + $0x4] ss:$12 sps:$4 sm:$0xff]   ;;  %v8378_v12 = vld [vmem:[%s11557_s1 + $0x1c] ss:$12 sps:$4 sm:$0xff]   ;;  %v8384_v20 = vld [vmem:[%s11557_s1 + $0x4c] ss:$12 sps:$4 sm:$0xff]  }
   0x7   :  { %194 = vrot.lane.b32.xlu1 %v182_v3, %s8770_s29  ;;  %7051 = vmatprep.subr.bf16.mxu0 %v8375_v8  ;;  %v8383_v17 = vld [vmem:[%s11557_s1 + $0x30] ss:$12 sps:$4 sm:$0xff]   ;;  %v8386_v21 = vld [vmem:[%s11557_s1 + $0x48] ss:$12 sps:$4 sm:$0xff]   ;;  %v8389_v27 = vld [vmem:[%s11557_s1 + $0x60] ss:$12 sps:$4 sm:$0xff]  }
   0x8   :  { %7053 = vmatpush1.bf16.msra.mxu0 %v8377_v9  ;;  %v104_v18 = vld [vmem:[%s11556_s0 + $0x1a] sm:$0xff]  ;;  %v8387_v24 = vld [vmem:[%s11557_s1 + $0x64] ss:$12 sps:$4 sm:$0xff]   ;;  %v8401_v30 = vld [vmem:[%s11557_s1 + $0xc8] ss:$12 sps:$4 sm:$0xff]  }
   0x9   :  { %7055 = vmatprep.subr.bf16.mxu0 %v8378_v12  ;;  %v148_v19 = vld [vmem:[%s11556_s0 + $0x1b] sm:$0xff]  ;;  %v149_v26 = vld [vmem:[%s11556_s0 + $0x23] sm:$0xff]  ;;  %7115 = vmatprep.subr.bf16.mxu1 %v8401_v30  ;;  %v150_v39 = vld [vmem:[%s11556_s0 + $0x2b] sm:$0xff] }
   0xa   :  { %115 = vrot.lane.b32.xlu0 %v102_v4, %s8767_s22  ;;  %v67_v22 = vld [vmem:[%s11556_s0 + $0x19] sm:$0xff]  ;;  %v105_v25 = vld [vmem:[%s11556_s0 + $0x22] sm:$0xff]  ;;  %v106_v37 = vld [vmem:[%s11556_s0 + $0x2a] sm:$0xff] }
   0xb   :  { %159 = vrot.lane.b32.xlu1 %v146_v5, %s8769_s28  ;;  %v185_v23 = vld [vmem:[%s11556_s0 + $0x1c] sm:$0xff]  ;;  %v8392_v29 = vld [vmem:[%s11557_s1 + $0x78] ss:$12 sps:$4 sm:$0xff]   ;;  %v8403_v33 = vld [vmem:[%s11557_s1 + $0x8] ss:$12 sps:$4 sm:$0xff]  }
   0xc   :  { %7057 = vmatpush1.bf16.msra.mxu0 %v8380_v13  ;;  %v8390_v28 = vld [vmem:[%s11557_s1 + $0x7c] ss:$12 sps:$4 sm:$0xff]   ;;  %v8393_v34 = vld [vmem:[%s11557_s1 + $0x94] ss:$12 sps:$4 sm:$0xff]   ;;  %7117 = vmatpush3.bf16.msra.mxu1 %v8403_v33  ;;  %v8396_v40 = vld [vmem:[%s11557_s1 + $0xac] ss:$12 sps:$4 sm:$0xff]  }
   0xd   :  { %7059 = vmatprep.subr.bf16.mxu0 %v8381_v16  ;;  %v68_v31 = vld [vmem:[%s11556_s0 + $0x21] sm:$0xff]  ;;  %v8395_v36 = vld [vmem:[%s11557_s1 + $0x90] ss:$12 sps:$4 sm:$0xff]   ;;  %v8414_v1 = vld [vmem:[%s11557_s1 + $0x10c] ss:$12 sps:$4 sm:$0xff]  }
   0xe   :  { %78 = vrot.lane.b32.xlu0 %v65_v6, %s8768_s23  ;;  %v186_v32 = vld [vmem:[%s11556_s0 + $0x24] sm:$0xff]  ;;  %v8406_v35 = vld [vmem:[%s11557_s1 + $0xe0] ss:$12 sps:$4 sm:$0xff]   ;;  %v8416_v47 = vld [vmem:[%s11557_s1 + $0x110] ss:$12 sps:$4 sm:$0xff]  }
   0xf   :  { %196 = vrot.lane.b32.xlu1 %v183_v7, %s8770_s29  ;;  %7119 = vmatprep.subr.bf16.mxu1 %v8406_v35  ;;  %v8408_v38 = vld [vmem:[%s11557_s1 + $0x20] ss:$12 sps:$4 sm:$0xff]   ;;  %v8411_v41 = vld [vmem:[%s11557_s1 + $0xf8] ss:$12 sps:$4 sm:$0xff]   ;;  %v8398_v45 = vld [vmem:[%s11557_s1 + $0xa8] ss:$12 sps:$4 sm:$0xff]  }
  0x10   :  { %7061 = vmatpush1.bf16.msra.mxu0 %v8383_v17  ;;  %7121 = vmatpush3.bf16.msra.mxu1 %v8408_v38  ;;  %v8413_v42 = vld [vmem:[%s11557_s1 + $0x38] ss:$12 sps:$4 sm:$0xff]   ;;  %v69_v43 = vld [vmem:[%s11556_s0 + $0x29] sm:$0xff]  ;;  %v5868_v57 = vld [vmem:[%s11556_s0 + $0x3c] sm:$0xff] }
  0x11   :  { %7063 = vmatprep.subr.bf16.mxu0 %v8384_v20  ;;  %v187_v44 = vld [vmem:[%s11556_s0 + $0x2c] sm:$0xff]  ;;  %7123 = vmatprep.subr.bf16.mxu1 %v8411_v41  ;;  %v5856_v49 = vld [vmem:[%s11556_s0 + $0x3a] sm:$0xff]  ;;  %v8421_v52 = vld [vmem:[%s11557_s1 + $0x128] ss:$12 sps:$4 sm:$0xff]  }
  0x12   :  { %117 = vrot.lane.b32.xlu0 %v103_v10, %s8767_s22  ;;  %v8399_v46 = vld [vmem:[%s11557_s1 + $0xc4] ss:$12 sps:$4 sm:$0xff]   ;;  %v5862_v50 = vld [vmem:[%s11556_s0 + $0x3b] sm:$0xff]  ;;  %v8423_v54 = vld [vmem:[%s11557_s1 + $0x68] ss:$12 sps:$4 sm:$0xff]  }
  0x13   :  { %161 = vrot.lane.b32.xlu1 %v147_v11, %s8769_s28  ;;  %v8418_v48 = vld [vmem:[%s11557_s1 + $0x50] ss:$12 sps:$4 sm:$0xff]   ;;  %v8402_v51 = vld [vmem:[%s11557_s1 + $0xc0] ss:$12 sps:$4 sm:$0xff]   ;;  %v8407_v58 = vld [vmem:[%s11557_s1 + $0xd8] ss:$12 sps:$4 sm:$0xff]  }
  0x14   :  { %7065 = vmatpush1.bf16.msra.mxu0 %v8386_v21  ;;  %7125 = vmatpush3.bf16.msra.mxu1 %v8413_v42  ;;  %v8404_v53 = vld [vmem:[%s11557_s1 + $0xdc] ss:$12 sps:$4 sm:$0xff]   ;;  %v51_v55 = vld [vmem:[%s11556_s0] sm:$0xff]  ;;  %v53_v12 = vld [vmem:[%s11556_s0 + $0x10] sm:$0xff] }
  0x15   :  { %7067 = vmatprep.subr.bf16.mxu0 %v8387_v24  ;;  %7127 = vmatprep.subr.bf16.mxu1 %v8416_v47  ;;  %v5850_v56 = vld [vmem:[%s11556_s0 + $0x39] sm:$0xff]  ;;  %58 = vst.msk [vmem:[#allocation2] sm:$0xff] %vm57_vm0, %v51_v55  ;;  %v5857_v62 = vld [vmem:[%s11556_s0 + $0x42] sm:$0xff]  ;;  %v5864_v16 = vld [vmem:[%s11556_s0 + $0x4b] sm:$0xff] }
  0x16   :  { %80 = vrot.lane.b32.xlu0 %v66_v14, %s8768_s23  ;;  %v8426_v59 = vld [vmem:[%s11557_s1 + $0x140] ss:$12 sps:$4 sm:$0xff]   ;;  %v8412_v0 = vld [vmem:[%s11557_s1 + $0xf0] ss:$12 sps:$4 sm:$0xff]   ;;  %v8431_v2 = vld [vmem:[%s11557_s1 + $0x158] ss:$12 sps:$4 sm:$0xff]  }
  0x17   :  { %198 = vrot.lane.b32.xlu1 %v184_v15, %s8770_s29  ;;  %v8409_v60 = vld [vmem:[%s11557_s1 + $0xf4] ss:$12 sps:$4 sm:$0xff]   ;;  %v8433_v4 = vld [vmem:[%s11557_s1 + $0x98] ss:$12 sps:$4 sm:$0xff]   ;;  %v8436_v7 = vld [vmem:[%s11557_s1 + $0x170] ss:$12 sps:$4 sm:$0xff]  }
  0x18   :  { %7069 = vmatpush1.bf16.msra.mxu0 %v8389_v27  ;;  %7129 = vmatpush3.bf16.msra.mxu1 %v8418_v48  ;;  %v8428_v61 = vld [vmem:[%s11557_s1 + $0x80] ss:$12 sps:$4 sm:$0xff]   ;;  %v8417_v3 = vld [vmem:[%s11557_s1 + $0x108] ss:$12 sps:$4 sm:$0xff]   ;;  %v8419_v8 = vld [vmem:[%s11557_s1 + $0x124] ss:$12 sps:$4 sm:$0xff]  }
  0x19   :  { %7071 = vmatprep.subr.bf16.mxu0 %v8390_v28  ;;  %7131 = vmatprep.subr.bf16.mxu1 %v8421_v52  ;;  %v5863_v63 = vld [vmem:[%s11556_s0 + $0x43] sm:$0xff]  ;;  %v8438_v10 = vld [vmem:[%s11557_s1 + $0xb0] ss:$12 sps:$4 sm:$0xff]   ;;  %60 = vst.msk [vmem:[#allocation2 + $0x30] sm:$0xff] %vm57_vm0, %v53_v12 }
  0x1a   :  { %119 = vrot.lane.b32.xlu0 %v104_v18, %s8767_s22  ;;  %v5851_v5 = vld [vmem:[%s11556_s0 + $0x41] sm:$0xff]  ;;  %v54_v13 = vld [vmem:[%s11556_s0 + $0x18] sm:$0xff]  ;;  %v5858_v15 = vld [vmem:[%s11556_s0 + $0x4a] sm:$0xff] }
  0x1b   :  { %163 = vrot.lane.b32.xlu1 %v148_v19, %s8769_s28  ;;  %v5869_v6 = vld [vmem:[%s11556_s0 + $0x44] sm:$0xff]  ;;  %v8422_v9 = vld [vmem:[%s11557_s1 + $0x120] ss:$12 sps:$4 sm:$0xff]   ;;  %61 = vst.msk [vmem:[#allocation2 + $0x48] sm:$0xff] %vm57_vm0, %v54_v13  ;;  %v5844_v18 = vld [vmem:[%s11556_s0 + $0x38] sm:$0xff] }
  0x1c   :  { %7073 = vmatpush1.bf16.msra.mxu0 %v8392_v29  ;;  %7133 = vmatpush3.bf16.msra.mxu1 %v8423_v54  ;;  %v52_v11 = vld [vmem:[%s11556_s0 + $0x8] sm:$0xff]  ;;  %v55_v14 = vld [vmem:[%s11556_s0 + $0x20] sm:$0xff]  ;;  %233 = vst.msk [vmem:[#allocation2 + $0x90] sm:$0xff] %vm57_vm0, %v5844_v18  ;;  %v8432_v28 = vld [vmem:[%s11557_s1 + $0x150] ss:$12 sps:$4 sm:$0xff]  }
  0x1d   :  { %7075 = vmatprep.subr.bf16.mxu0 %v8393_v34  ;;  %7135 = vmatprep.subr.bf16.mxu1 %v8426_v59  ;;  %59 = vst.msk [vmem:[#allocation2 + $0x18] sm:$0xff] %vm57_vm0, %v52_v11  ;;  %62 = vst.msk [vmem:[#allocation2 + $0x60] sm:$0xff] %vm57_vm0, %v55_v14  ;;  %v56_v17 = vld [vmem:[%s11556_s0 + $0x28] sm:$0xff]  ;;  %v5845_v19 = vld [vmem:[%s11556_s0 + $0x40] sm:$0xff] }
  0x1e   :  { %82 = vrot.lane.b32.xlu0 %v67_v22, %s8768_s23  ;;  %v8424_v20 = vld [vmem:[%s11557_s1 + $0x13c] ss:$12 sps:$4 sm:$0xff]   ;;  %63 = vst.msk [vmem:[#allocation2 + $0x78] sm:$0xff] %vm57_vm0, %v56_v17  ;;  %234 = vst.msk [vmem:[#allocation2 + $0xa8] sm:$0xff] %vm57_vm0, %v5845_v19  ;;  %v8427_v22 = vld [vmem:[%s11557_s1 + $0x138] ss:$12 sps:$4 sm:$0xff]  }
  0x1f   :  { %200 = vrot.lane.b32.xlu1 %v185_v23, %s8770_s29  ;;  %v5846_v21 = vld [vmem:[%s11556_s0 + $0x48] sm:$0xff]  ;;  %v5847_v23 = vld [vmem:[%s11556_s0 + $0x50] sm:$0xff]  ;;  %v9207_v33 = vld [vmem:[%s11557_s1 + $0x180] sm:$0x33] }
  0x20   :  { %7077 = vmatpush1.bf16.msra.mxu0 %v8395_v36  ;;  %7137 = vmatpush3.bf16.msra.mxu1 %v8428_v61  ;;  %235 = vst.msk [vmem:[#allocation2 + $0xc0] sm:$0xff] %vm57_vm0, %v5846_v21  ;;  %236 = vst.msk [vmem:[#allocation2 + $0xd8] sm:$0xff] %vm57_vm0, %v5847_v23  ;;  %v5852_v24 = vld [vmem:[%s11556_s0 + $0x49] sm:$0xff]  ;;  %v5859_v30 = vld [vmem:[%s11556_s0 + $0x52] sm:$0xff]  ;;  %v594_v38 = vunpack.c.h.bf16 %v9207_v33 }
  0x21   :  { %7079 = vmatprep.subr.bf16.mxu0 %v8396_v40  ;;  %7139 = vmatprep.subr.bf16.mxu1 %v8431_v2  ;;  %v9184_v27 = vld [vmem:[%s11557_s1 + $0x188] sm:$0x3]  ;;  %v5848_v34 = vld [vmem:[%s11556_s0 + $0x58] sm:$0xff]  ;;  %v5849_v41 = vld [vmem:[%s11556_s0 + $0x60] sm:$0xff] }
  0x22   :  { %121 = vrot.lane.b32.xlu0 %v105_v25, %s8767_s22  ;;  %v5870_v25 = vld [vmem:[%s11556_s0 + $0x4c] sm:$0xff]  ;;  %v595_v29 = vunpack.c.l.bf16 %v9184_v27  ;;  %v8437_v35 = vld [vmem:[%s11557_s1 + $0x168] ss:$12 sps:$4 sm:$0xff]   ;;  %237 = vst.msk [vmem:[#allocation2 + $0xf0] sm:$0xff] %vm57_vm0, %v5848_v34  ;;  %v5866_v40 = vld [vmem:[%s11556_s0 + $0x5b] sm:$0xff] }
  0x23   :  { %165 = vrot.lane.b32.xlu1 %v149_v26, %s8769_s28  ;;  %v8429_v26 = vld [vmem:[%s11557_s1 + $0x154] ss:$12 sps:$4 sm:$0xff]   ;;  %238 = vst.msk [vmem:[#allocation2 + $0x108] sm:$0xff] %vm57_vm0, %v5849_v41  ;;  %v5873_v47 = vld [vmem:[%s11556_s0 + $0x64] sm:$0xff] }
  0x24   :  { %7081 = vmatpush1.bf16.msra.mxu0 %v8398_v45  ;;  %7141 = vmatpush3.bf16.msra.mxu1 %v8433_v4  ;;  %v5853_v36 = vld [vmem:[%s11556_s0 + $0x51] sm:$0xff]  ;;  %v5854_v42 = vld [vmem:[%s11556_s0 + $0x59] sm:$0xff]  ;;  %v5867_v45 = vld [vmem:[%s11556_s0 + $0x63] sm:$0xff] }
  0x25   :  { %7083 = vmatprep.subr.bf16.mxu0 %v8399_v46  ;;  %7143 = vmatprep.subr.bf16.mxu1 %v8436_v7  ;;  %v5855_v46 = vld [vmem:[%s11556_s0 + $0x61] sm:$0xff] }
  0x26   :  { %84 = vrot.lane.b32.xlu0 %v68_v31, %s8768_s23  ;;  %v5865_v31 = vld [vmem:[%s11556_s0 + $0x53] sm:$0xff] }
  0x27   :  { %202 = vrot.lane.b32.xlu1 %v186_v32, %s8770_s29  ;;  %v8434_v32 = vld [vmem:[%s11557_s1 + $0x16c] ss:$12 sps:$4 sm:$0xff]  }
  0x28   :  { %7085 = vmatpush1.bf16.msra.mxu0 %v8402_v51  ;;  %7145 = vmatpush3.bf16.msra.mxu1 %v8438_v10 }
  0x29   :  { %7087 = vmatprep.subr.bf16.mxu0 %v8404_v53  ;;  %6901 = vmatprep.subr.msk.mxu1 %vm649_vm1, %v595_v29 }
  0x2a   :  { %123 = vrot.lane.b32.xlu0 %v106_v37, %s8767_s22  ;;  %v5871_v37 = vld [vmem:[%s11556_s0 + $0x54] sm:$0xff] }
  0x2b   :  { %167 = vrot.lane.b32.xlu1 %v150_v39, %s8769_s28  ;;  %v5860_v39 = vld [vmem:[%s11556_s0 + $0x5a] sm:$0xff] }
  0x2c   :  { %7089 = vmatpush1.bf16.msra.mxu0 %v8407_v58 }
  0x2d   :  { %7091 = vmatprep.subr.bf16.mxu0 %v8409_v60 }
  0x2e   :  { %86 = vrot.lane.b32.xlu0 %v69_v43, %s8768_s23  ;;  %v5872_v43 = vld [vmem:[%s11556_s0 + $0x5c] sm:$0xff] }
  0x2f   :  { %204 = vrot.lane.b32.xlu1 %v187_v44, %s8770_s29  ;;  %v5861_v44 = vld [vmem:[%s11556_s0 + $0x62] sm:$0xff] }
  0x30   :  { %7093 = vmatpush1.bf16.msra.mxu0 %v8412_v0 }
  0x31   :  { %7095 = vmatprep.subr.bf16.mxu0 %v8414_v1 }
  0x32   :  { %287 = vrot.lane.b32.xlu0 %v5856_v49, %s8767_s22 }
  0x33   :  { %329 = vrot.lane.b32.xlu1 %v5862_v50, %s8769_s28 }
  0x34   :  { %7097 = vmatpush1.bf16.msra.mxu0 %v8417_v3 }
  0x35   :  { %7099 = vmatprep.subr.bf16.mxu0 %v8419_v8 }
  0x36   :  { %251 = vrot.lane.b32.xlu0 %v5850_v56, %s8768_s23 }
  0x37   :  { %365 = vrot.lane.b32.xlu1 %v5868_v57, %s8770_s29  ;;  %v593_v57 = vunpack.c.l.bf16 %v9207_v33 }
  0x38   :  { %7101 = vmatpush1.bf16.msra.mxu0 %v8422_v9 }
  0x39   :  { %7103 = vmatprep.subr.bf16.mxu0 %v8424_v20 }
  0x3a   :  { %289 = vrot.lane.b32.xlu0 %v5857_v62, %s8767_s22 }
  0x3b   :  { %331 = vrot.lane.b32.xlu1 %v5863_v63, %s8769_s28 }
  0x3c   :  { %7105 = vmatpush1.bf16.msra.mxu0 %v8427_v22 }
  0x3d   :  { %7107 = vmatprep.subr.bf16.mxu0 %v8429_v26 }
  0x3e   :  { %253 = vrot.lane.b32.xlu0 %v5851_v5, %s8768_s23 }
  0x3f   :  { %367 = vrot.lane.b32.xlu1 %v5869_v6, %s8770_s29 }
  0x40   :  { %7109 = vmatpush1.bf16.msra.mxu0 %v8432_v28 }
  0x41   :  { %7111 = vmatprep.subr.bf16.mxu0 %v8434_v32 }
  0x42   :  { %291 = vrot.lane.b32.xlu0 %v5858_v15, %s8767_s22 }
  0x43   :  { %333 = vrot.lane.b32.xlu1 %v5864_v16, %s8769_s28 }
  0x44   :  { %7113 = vmatpush1.bf16.msra.mxu0 %v8437_v35 }
  0x45   :  { %5874 = vmatprep.subr.msk.mxu0 %vm649_vm1, %v594_v38 }
  0x46   :  { %255 = vrot.lane.b32.xlu0 %v5852_v24, %s8768_s23 }
  0x47   :  { %369 = vrot.lane.b32.xlu1 %v5870_v25, %s8770_s29 }
  0x4a   :  { %293 = vrot.lane.b32.xlu0 %v5859_v30, %s8767_s22 }
  0x4b   :  { %335 = vrot.lane.b32.xlu1 %v5865_v31, %s8769_s28 }
  0x4e   :  { %257 = vrot.lane.b32.xlu0 %v5853_v36, %s8768_s23 }
  0x4f   :  { %371 = vrot.lane.b32.xlu1 %v5871_v37, %s8770_s29 }
  0x52   :  { %295 = vrot.lane.b32.xlu0 %v5860_v39, %s8767_s22 }
  0x53   :  { %337 = vrot.lane.b32.xlu1 %v5866_v40, %s8769_s28 }
  0x56   :  { %259 = vrot.lane.b32.xlu0 %v5854_v42, %s8768_s23 }
  0x57   :  { %373 = vrot.lane.b32.xlu1 %v5872_v43, %s8770_s29 }
  0x5a   :  { %297 = vrot.lane.b32.xlu0 %v5861_v44, %s8767_s22 }
  0x5b   :  { %339 = vrot.lane.b32.xlu1 %v5867_v45, %s8769_s28 }
  0x5e   :  { %261 = vrot.lane.b32.xlu0 %v5855_v46, %s8768_s23 }
  0x5f   :  { %375 = vrot.lane.b32.xlu1 %v5873_v47, %s8770_s29 }
  0x74   :  { %v114_v48 = vpop.permute.xlu0 %113 }
  0x75   :  { %v77_v49 = vpop.permute.xlu1 %76  ;;  %134 = vst.msk [vmem:[#allocation2 + $0x8] sm:$0xff] %vm133_vm2, %v114_v48 }
  0x76   :  { %95 = vst.msk [vmem:[#allocation2] sm:$0xff] %vm94_vm3, %v77_v49 }
  0x77   :  { %132 = vst.msk [vmem:[#allocation2] sm:$0xff] %vm131_vm4, %v114_v48 }
  0x78   :  { %v158_v50 = vpop.permute.xlu0 %157 }
  0x79   :  { %v195_v51 = vpop.permute.xlu1 %194  ;;  %176 = vst.msk [vmem:[#allocation2 + $0x8] sm:$0xff] %vm175_vm5, %v158_v50 }
  0x7a   :  { %215 = vst.msk [vmem:[#allocation2 + $0x10] sm:$0xff] %vm214_vm6, %v195_v51 }
  0x7b   :  { %213 = vst.msk [vmem:[#allocation2 + $0x8] sm:$0xff] %vm212_vm7, %v195_v51 }
  0x7c   :  { %v116_v52 = vpop.permute.xlu0 %115 }
  0x7d   :  { %v160_v53 = vpop.permute.xlu1 %159  ;;  %136 = vst.msk [vmem:[#allocation2 + $0x20] sm:$0xff] %vm133_vm2, %v116_v52 }
  0x7e   :  { %177 = vst.msk [vmem:[#allocation2 + $0x20] sm:$0xff] %vm175_vm5, %v160_v53  ;;  %v395_v56 = vld [vmem:[#allocation2] sm:$0xff] }
  0x80   :  { %v79_v54 = vpop.permute.xlu0 %78 }
  0x81   :  { %v197_v55 = vpop.permute.xlu1 %196  ;;  %96 = vst.msk [vmem:[#allocation2 + $0x18] sm:$0xff] %vm94_vm3, %v79_v54 }
  0x82   :  { %216 = vst.msk [vmem:[#allocation2 + $0x20] sm:$0xff] %vm212_vm7, %v197_v55  ;;  %v396_v58 = vld [vmem:[#allocation2 + $0x8] sm:$0xff] }
  0x83   :  { %217 = vst.msk [vmem:[#allocation2 + $0x28] sm:$0xff] %vm214_vm6, %v197_v55  ;;  %723 = vmatprep.mubr.f32.mxu0 %v396_v58  ;;  %997 = vmatprep.mubr.f32.mxu1 %v396_v58 }
  0x84   :  { %135 = vst.msk [vmem:[#allocation2 + $0x18] sm:$0xff] %vm131_vm4, %v116_v52  ;;  %724 = vmatmul.mubr.f32.vlgmr.msra.gmra.mrb[0].mxu0 %v395_v56  ;;  %998 = vmatmul.mubr.f32.vlgmr.msra.gmra.mrb[0].mxu1 %v395_v56  ;;  %v118_v59 = vpop.permute.xlu0 %117 }
  0x85   :  { %v162_v60 = vpop.permute.xlu1 %161  ;;  %5875 = vmatpush1.msk.msra.mxu0 %vm649_vm1, %v593_v57  ;;  %6902 = vmatpush3.msk.msra.mxu1 %vm649_vm1, %v595_v29  ;;  %138 = vst.msk [vmem:[#allocation2 + $0x38] sm:$0xff] %vm133_vm2, %v118_v59 }
  0x86   :  { %178 = vst.msk [vmem:[#allocation2 + $0x38] sm:$0xff] %vm175_vm5, %v162_v60 }
  0x88   :  { %v81_v61 = vpop.permute.xlu0 %80 }
  0x89   :  { %v199_v62 = vpop.permute.xlu1 %198  ;;  %v399_v63 = vld [vmem:[#allocation2 + $0x20] sm:$0xff]  ;;  %97 = vst.msk [vmem:[#allocation2 + $0x30] sm:$0xff] %vm94_vm3, %v81_v61 }
  0x8a   :  { %218 = vst.msk [vmem:[#allocation2 + $0x38] sm:$0xff] %vm212_vm7, %v199_v62  ;;  %729 = vmatprep.mubr.f32.mxu0 %v399_v63  ;;  %1002 = vmatprep.mubr.f32.mxu1 %v399_v63 }
  0x8b   :  { %219 = vst.msk [vmem:[#allocation2 + $0x40] sm:$0xff] %vm214_vm6, %v199_v62  ;;  %v398_v0 = vld [vmem:[#allocation2 + $0x18] sm:$0xff] }
  0x8c   :  { %137 = vst.msk [vmem:[#allocation2 + $0x30] sm:$0xff] %vm131_vm4, %v118_v59  ;;  %730 = vmatmul.mubr.f32.gmra.mrb[2].mxu0 %v398_v0  ;;  %1003 = vmatmul.mubr.f32.gmra.mrb[2].mxu1 %v398_v0  ;;  %v120_v1 = vpop.permute.xlu0 %119 }
  0x8d   :  { %v164_v2 = vpop.permute.xlu1 %163  ;;  %140 = vst.msk [vmem:[#allocation2 + $0x50] sm:$0xff] %vm133_vm2, %v120_v1 }
  0x8e   :  { %179 = vst.msk [vmem:[#allocation2 + $0x50] sm:$0xff] %vm175_vm5, %v164_v2 }
  0x90   :  { %v83_v3 = vpop.permute.xlu0 %82 }
  0x91   :  { %v201_v4 = vpop.permute.xlu1 %200  ;;  %v402_v5 = vld [vmem:[#allocation2 + $0x38] sm:$0xff]  ;;  %98 = vst.msk [vmem:[#allocation2 + $0x48] sm:$0xff] %vm94_vm3, %v83_v3 }
  0x92   :  { %220 = vst.msk [vmem:[#allocation2 + $0x50] sm:$0xff] %vm212_vm7, %v201_v4  ;;  %735 = vmatprep.mubr.f32.mxu0 %v402_v5  ;;  %1007 = vmatprep.mubr.f32.mxu1 %v402_v5 }
  0x93   :  { %221 = vst.msk [vmem:[#allocation2 + $0x58] sm:$0xff] %vm214_vm6, %v201_v4  ;;  %v401_v6 = vld [vmem:[#allocation2 + $0x30] sm:$0xff] }
  0x94   :  { %139 = vst.msk [vmem:[#allocation2 + $0x48] sm:$0xff] %vm131_vm4, %v120_v1  ;;  %736 = vmatmul.mubr.f32.gmra.mrb[4].mxu0 %v401_v6  ;;  %1008 = vmatmul.mubr.f32.gmra.mrb[4].mxu1 %v401_v6  ;;  %v122_v7 = vpop.permute.xlu0 %121 }
  0x95   :  { %v166_v8 = vpop.permute.xlu1 %165  ;;  %142 = vst.msk [vmem:[#allocation2 + $0x68] sm:$0xff] %vm133_vm2, %v122_v7 }
  0x96   :  { %180 = vst.msk [vmem:[#allocation2 + $0x68] sm:$0xff] %vm175_vm5, %v166_v8 }
  0x98   :  { %v85_v9 = vpop.permute.xlu0 %84 }
  0x99   :  { %v203_v10 = vpop.permute.xlu1 %202  ;;  %v405_v11 = vld [vmem:[#allocation2 + $0x50] sm:$0xff]  ;;  %99 = vst.msk [vmem:[#allocation2 + $0x60] sm:$0xff] %vm94_vm3, %v85_v9 }
  0x9a   :  { %222 = vst.msk [vmem:[#allocation2 + $0x68] sm:$0xff] %vm212_vm7, %v203_v10  ;;  %741 = vmatprep.mubr.f32.mxu0 %v405_v11  ;;  %1012 = vmatprep.mubr.f32.mxu1 %v405_v11 }
  0x9b   :  { %223 = vst.msk [vmem:[#allocation2 + $0x70] sm:$0xff] %vm214_vm6, %v203_v10  ;;  %v404_v12 = vld [vmem:[#allocation2 + $0x48] sm:$0xff] }
  0x9c   :  { %141 = vst.msk [vmem:[#allocation2 + $0x60] sm:$0xff] %vm131_vm4, %v122_v7  ;;  %742 = vmatmul.mubr.f32.gmra.mrb[6].mxu0 %v404_v12  ;;  %1013 = vmatmul.mubr.f32.gmra.mrb[6].mxu1 %v404_v12 }
  0x9d   :  { %20 = vsyncpa [#allocation10], 0  ;;  %v124_v13 = vpop.permute.xlu0 %123  ;;  %v168_v14 = vpop.permute.xlu1 %167  ;;  %v397_v57 = vld [vmem:[#allocation2 + $0x10] sm:$0xff]  ;;  %v8771_v58 = vmov 0.0   ;;  %v400_v59 = vld [vmem:[#allocation2 + $0x28] sm:$0xff]  ;;  %vm1221_vm8 = vcmask 261120  }
  0x9e   :  { %144 = vst.msk [vmem:[#allocation2 + $0x80] sm:$0xff] %vm133_vm2, %v124_v13  ;;  %v403_v60 = vld [vmem:[#allocation2 + $0x40] sm:$0xff]  ;;  %v406_v61 = vld [vmem:[#allocation2 + $0x58] sm:$0xff]  ;;  %vm1334_vm9 = vcmask 1046528   ;;  %vm1584_vm10 = vcmask 998400   ;;  %vm8773_vm11 = vmmov 1  }
  0x9f   :  { %181 = vst.msk [vmem:[#allocation2 + $0x80] sm:$0xff] %vm175_vm5, %v168_v14  ;;  %vm9966_vm12 = vmpackc.low %vm1334_vm9, %vm8773_vm11  ;;  %vm1687_vm13 = vcmask 777216   ;;  %vm2038_vm14 = vcmask 1041408   ;;  %vm2019_vm0 = vcmask 211968   ;;  %s8774_s20 = smov 48   ;;  %s8775_s21 = smov 16  }
  0xa0   :  { %vm7267_vm15 = vmpackc.low %vm2038_vm14, %vm8773_vm11  ;;  %s8776_s26 = smov 32   ;;  %s8777_s27 = smov 64   ;;  %vm2316_vm11 = vcmask 1047680  }
  0xa1   :  { %v87_v15 = vpop.permute.xlu0 %86  ;;  %v205_v16 = vpop.permute.xlu1 %204  ;;  %v408_v17 = vld [vmem:[#allocation2 + $0x68] sm:$0xff] }
  0xa2   :  { %100 = vst.msk [vmem:[#allocation2 + $0x78] sm:$0xff] %vm94_vm3, %v87_v15  ;;  %747 = vmatprep.mubr.f32.mxu0 %v408_v17  ;;  %1017 = vmatprep.mubr.f32.mxu1 %v408_v17  ;;  %v409_v62 = vld [vmem:[#allocation2 + $0x70] sm:$0xff] }
  0xa3   :  { %224 = vst.msk [vmem:[#allocation2 + $0x80] sm:$0xff] %vm212_vm7, %v205_v16  ;;  %v407_v18 = vld [vmem:[#allocation2 + $0x60] sm:$0xff] }
  0xa4   :  { %225 = vst.msk [vmem:[#allocation2 + $0x88] sm:$0xff] %vm214_vm6, %v205_v16  ;;  %748 = vmatmul.mubr.f32.gmra.mrb[8].mxu0 %v407_v18  ;;  %1018 = vmatmul.mubr.f32.gmra.mrb[8].mxu1 %v407_v18 }
  0xa5   :  { %143 = vst.msk [vmem:[#allocation2 + $0x78] sm:$0xff] %vm131_vm4, %v124_v13  ;;  %v288_v19 = vpop.permute.xlu0 %287  ;;  %v330_v20 = vpop.permute.xlu1 %329 }
  0xa6   :  { %306 = vst.msk [vmem:[#allocation2 + $0x98] sm:$0xff] %vm133_vm2, %v288_v19 }
  0xa7   :  { %347 = vst.msk [vmem:[#allocation2 + $0x98] sm:$0xff] %vm175_vm5, %v330_v20 }
  0xa9   :  { %v252_v21 = vpop.permute.xlu0 %251  ;;  %v366_v22 = vpop.permute.xlu1 %365 }
  0xaa   :  { %v411_v23 = vld [vmem:[#allocation2 + $0x80] sm:$0xff]  ;;  %269 = vst.msk [vmem:[#allocation2 + $0x90] sm:$0xff] %vm94_vm3, %v252_v21 }
  0xab   :  { %383 = vst.msk [vmem:[#allocation2 + $0x98] sm:$0xff] %vm212_vm7, %v366_v22  ;;  %753 = vmatprep.mubr.f32.mxu0 %v411_v23  ;;  %1022 = vmatprep.mubr.f32.mxu1 %v411_v23  ;;  %v412_v63 = vld [vmem:[#allocation2 + $0x88] sm:$0xff] }
  0xac   :  { %384 = vst.msk [vmem:[#allocation2 + $0xa0] sm:$0xff] %vm214_vm6, %v366_v22  ;;  %v410_v24 = vld [vmem:[#allocation2 + $0x78] sm:$0xff] }
  0xad   :  { %305 = vst.msk [vmem:[#allocation2 + $0x90] sm:$0xff] %vm131_vm4, %v288_v19  ;;  %754 = vmatmul.mubr.f32.gmra.mrb[10].mxu0 %v410_v24  ;;  %1023 = vmatmul.mubr.f32.gmra.mrb[10].mxu1 %v410_v24  ;;  %v290_v25 = vpop.permute.xlu0 %289  ;;  %v332_v26 = vpop.permute.xlu1 %331 }
  0xae   :  { %308 = vst.msk [vmem:[#allocation2 + $0xb0] sm:$0xff] %vm133_vm2, %v290_v25 }
  0xaf   :  { %348 = vst.msk [vmem:[#allocation2 + $0xb0] sm:$0xff] %vm175_vm5, %v332_v26 }
  0xb1   :  { %v254_v27 = vpop.permute.xlu0 %253  ;;  %v368_v28 = vpop.permute.xlu1 %367 }
  0xb2   :  { %v414_v29 = vld [vmem:[#allocation2 + $0x98] sm:$0xff]  ;;  %270 = vst.msk [vmem:[#allocation2 + $0xa8] sm:$0xff] %vm94_vm3, %v254_v27 }
  0xb3   :  { %385 = vst.msk [vmem:[#allocation2 + $0xb0] sm:$0xff] %vm212_vm7, %v368_v28  ;;  %759 = vmatprep.mubr.f32.mxu0 %v414_v29  ;;  %1027 = vmatprep.mubr.f32.mxu1 %v414_v29  ;;  %v415_v0 = vld [vmem:[#allocation2 + $0xa0] sm:$0xff] }
  0xb4   :  { %386 = vst.msk [vmem:[#allocation2 + $0xb8] sm:$0xff] %vm214_vm6, %v368_v28  ;;  %v413_v30 = vld [vmem:[#allocation2 + $0x90] sm:$0xff] }
  0xb5   :  { %307 = vst.msk [vmem:[#allocation2 + $0xa8] sm:$0xff] %vm131_vm4, %v290_v25  ;;  %760 = vmatmul.mubr.f32.gmra.mrb[12].mxu0 %v413_v30  ;;  %1028 = vmatmul.mubr.f32.gmra.mrb[12].mxu1 %v413_v30  ;;  %v292_v31 = vpop.permute.xlu0 %291  ;;  %v334_v32 = vpop.permute.xlu1 %333 }
  0xb6   :  { %310 = vst.msk [vmem:[#allocation2 + $0xc8] sm:$0xff] %vm133_vm2, %v292_v31 }
  0xb7   :  { %349 = vst.msk [vmem:[#allocation2 + $0xc8] sm:$0xff] %vm175_vm5, %v334_v32 }
  0xb9   :  { %v256_v33 = vpop.permute.xlu0 %255  ;;  %v370_v34 = vpop.permute.xlu1 %369 }
  0xba   :  { %v417_v35 = vld [vmem:[#allocation2 + $0xb0] sm:$0xff]  ;;  %271 = vst.msk [vmem:[#allocation2 + $0xc0] sm:$0xff] %vm94_vm3, %v256_v33 }
  0xbb   :  { %387 = vst.msk [vmem:[#allocation2 + $0xc8] sm:$0xff] %vm212_vm7, %v370_v34  ;;  %765 = vmatprep.mubr.f32.mxu0 %v417_v35  ;;  %1032 = vmatprep.mubr.f32.mxu1 %v417_v35  ;;  %v418_v1 = vld [vmem:[#allocation2 + $0xb8] sm:$0xff] }
  0xbc   :  { %388 = vst.msk [vmem:[#allocation2 + $0xd0] sm:$0xff] %vm214_vm6, %v370_v34  ;;  %v416_v36 = vld [vmem:[#allocation2 + $0xa8] sm:$0xff] }
  0xbd   :  { %309 = vst.msk [vmem:[#allocation2 + $0xc0] sm:$0xff] %vm131_vm4, %v292_v31  ;;  %766 = vmatmul.mubr.f32.gmra.mrb[14].mxu0 %v416_v36  ;;  %1033 = vmatmul.mubr.f32.gmra.mrb[14].mxu1 %v416_v36  ;;  %v294_v37 = vpop.permute.xlu0 %293  ;;  %v336_v38 = vpop.permute.xlu1 %335  ;;  %v598_v36 = vlaneseq }
  0xbe   :  { %312 = vst.msk [vmem:[#allocation2 + $0xe0] sm:$0xff] %vm133_vm2, %v294_v37 }
  0xbf   :  { %350 = vst.msk [vmem:[#allocation2 + $0xe0] sm:$0xff] %vm175_vm5, %v336_v38  ;;  %v9388_v38 = vshrl.u32 %v598_v36, 7 }
  0xc1   :  { %v258_v39 = vpop.permute.xlu0 %257  ;;  %v372_v40 = vpop.permute.xlu1 %371 }
  0xc2   :  { %v420_v41 = vld [vmem:[#allocation2 + $0xc8] sm:$0xff]  ;;  %272 = vst.msk [vmem:[#allocation2 + $0xd8] sm:$0xff] %vm94_vm3, %v258_v39 }
  0xc3   :  { %389 = vst.msk [vmem:[#allocation2 + $0xe0] sm:$0xff] %vm212_vm7, %v372_v40  ;;  %771 = vmatprep.mubr.f32.mxu0 %v420_v41  ;;  %1037 = vmatprep.mubr.f32.mxu1 %v420_v41  ;;  %v421_v2 = vld [vmem:[#allocation2 + $0xd0] sm:$0xff]  ;;  %v608_v41 = vsub.s32 2, %v9388_v38 }
  0xc4   :  { %390 = vst.msk [vmem:[#allocation2 + $0xe8] sm:$0xff] %vm214_vm6, %v372_v40  ;;  %v419_v42 = vld [vmem:[#allocation2 + $0xc0] sm:$0xff] }
  0xc5   :  { %311 = vst.msk [vmem:[#allocation2 + $0xd8] sm:$0xff] %vm131_vm4, %v294_v37  ;;  %772 = vmatmul.mubr.f32.gmra.mrb[16].mxu0 %v419_v42  ;;  %1038 = vmatmul.mubr.f32.gmra.mrb[16].mxu1 %v419_v42  ;;  %v296_v43 = vpop.permute.xlu0 %295  ;;  %v338_v44 = vpop.permute.xlu1 %337  ;;  %v596_v42 = vld [vmem:[%s11558_s2] sm:$0x7]  ;;  %s8772_s2 = smov 122  }
  0xc6   :  { %314 = vst.msk [vmem:[#allocation2 + $0xf8] sm:$0xff] %vm133_vm2, %v296_v43 }
  0xc7   :  { %351 = vst.msk [vmem:[#allocation2 + $0xf8] sm:$0xff] %vm175_vm5, %v338_v44  ;;  %v604_v44 = vsub.s32 1, %v9388_v38 }
  0xc9   :  { %v260_v45 = vpop.permute.xlu0 %259  ;;  %v374_v46 = vpop.permute.xlu1 %373 }
  0xca   :  { %v423_v47 = vld [vmem:[#allocation2 + $0xe0] sm:$0xff]  ;;  %273 = vst.msk [vmem:[#allocation2 + $0xf0] sm:$0xff] %vm94_vm3, %v260_v45 }
  0xcb   :  { %391 = vst.msk [vmem:[#allocation2 + $0xf8] sm:$0xff] %vm212_vm7, %v374_v46  ;;  %777 = vmatprep.mubr.f32.mxu0 %v423_v47  ;;  %1042 = vmatprep.mubr.f32.mxu1 %v423_v47  ;;  %v424_v3 = vld [vmem:[#allocation2 + $0xe8] sm:$0xff] }
  0xcc   :  { %392 = vst.msk [vmem:[#allocation2 + $0x100] sm:$0xff] %vm214_vm6, %v374_v46  ;;  %v422_v48 = vld [vmem:[#allocation2 + $0xd8] sm:$0xff]  ;;  %v609_v46 = vrot.slane %v596_v42, %v608_v41 }
  0xcd   :  { %313 = vst.msk [vmem:[#allocation2 + $0xf0] sm:$0xff] %vm131_vm4, %v296_v43  ;;  %778 = vmatmul.mubr.f32.gmra.mrb[18].mxu0 %v422_v48  ;;  %1043 = vmatmul.mubr.f32.gmra.mrb[18].mxu1 %v422_v48  ;;  %v298_v49 = vpop.permute.xlu0 %297  ;;  %v340_v50 = vpop.permute.xlu1 %339  ;;  %v600_v43 = vsub.s32 0, %v9388_v38 }
  0xce   :  { %316 = vst.msk [vmem:[#allocation2 + $0x110] sm:$0xff] %vm133_vm2, %v298_v49  ;;  %vm2248_vm2 = vcmask 130048  }
  0xcf   :  { %352 = vst.msk [vmem:[#allocation2 + $0x110] sm:$0xff] %vm175_vm5, %v340_v50  ;;  %v9402_v48 = vrot.slane %v596_v42, %v600_v43  ;;  %v9406_v50 = vrot.slane %v596_v42, %v604_v44  ;;  %vm2271_vm5 = vcmask 125952  }
  0xd1   :  { %v262_v51 = vpop.permute.xlu0 %261  ;;  %v376_v52 = vpop.permute.xlu1 %375 }
  0xd2   :  { %v426_v53 = vld [vmem:[#allocation2 + $0xf8] sm:$0xff]  ;;  %274 = vst.msk [vmem:[#allocation2 + $0x108] sm:$0xff] %vm94_vm3, %v262_v51  ;;  %vm2391_vm3 = vcmask 1044480  }
  0xd3   :  { %393 = vst.msk [vmem:[#allocation2 + $0x110] sm:$0xff] %vm212_vm7, %v376_v52  ;;  %783 = vmatprep.mubr.f32.mxu0 %v426_v53  ;;  %1047 = vmatprep.mubr.f32.mxu1 %v426_v53  ;;  %v427_v4 = vld [vmem:[#allocation2 + $0x100] sm:$0xff]  ;;  %vm2515_vm7 = vcmask 130052  }
  0xd4   :  { %394 = vst.msk [vmem:[#allocation2 + $0x118] sm:$0xff] %vm214_vm6, %v376_v52  ;;  %v425_v54 = vld [vmem:[#allocation2 + $0xf0] sm:$0xff] }
  0xd5   :  { %315 = vst.msk [vmem:[#allocation2 + $0x108] sm:$0xff] %vm131_vm4, %v298_v49  ;;  %784 = vmatmul.mubr.f32.gmra.mrb[20].mxu0 %v425_v54  ;;  %1048 = vmatmul.mubr.f32.gmra.mrb[20].mxu1 %v425_v54  ;;  %vm2337_vm4 = vcmask 1045504  }
  0xda   :  { %v429_v55 = vld [vmem:[#allocation2 + $0x110] sm:$0xff] }
  0xdb   :  { %789 = vmatprep.mubr.f32.mxu0 %v429_v55  ;;  %1052 = vmatprep.mubr.f32.mxu1 %v429_v55  ;;  %v430_v5 = vld [vmem:[#allocation2 + $0x118] sm:$0xff] }
  0xdc   :  { %v428_v56 = vld [vmem:[#allocation2 + $0x108] sm:$0xff] }
  0xdd   :  { %790 = vmatmul.mubr.f32.gmra.mrb[22].mxu0 %v428_v56  ;;  %1053 = vmatmul.mubr.f32.gmra.mrb[22].mxu1 %v428_v56 }
  0xde   :  { %6903 = vmatprep.mubr.msk.f32.mxu1 %vm214_vm6, %v397_v57  ;;  %860 = vmatprep.mubr.f32.mxu0 %v8771_v58 }
  0xe1   :  { %5876 = vmatmul.mubr.msk.f32.vlgmr.msra.gmra.mrb[0].mxu0 %vm214_vm6, %v397_v57  ;;  %6904 = vmatmul.mubr.msk.f32.vlgmr.msra.gmra.mrb[24].mxu1 %vm214_vm6, %v400_v59 }
  0xe2   :  { %6906 = vmatprep.mubr.msk.f32.mxu1 %vm214_vm6, %v403_v60  ;;  %866 = vmatprep.mubr.f32.mxu0 %v8771_v58 }
  0xe5   :  { %5877 = vmatmul.mubr.msk.f32.gmra.mrb[2].mxu0 %vm214_vm6, %v400_v59  ;;  %6907 = vmatmul.mubr.msk.f32.gmra.mrb[26].mxu1 %vm214_vm6, %v406_v61 }
  0xe6   :  { %6909 = vmatprep.mubr.msk.f32.mxu1 %vm214_vm6, %v409_v62  ;;  %872 = vmatprep.mubr.f32.mxu0 %v8771_v58 }
  0xe9   :  { %5878 = vmatmul.mubr.msk.f32.gmra.mrb[4].mxu0 %vm214_vm6, %v403_v60  ;;  %6910 = vmatmul.mubr.msk.f32.gmra.mrb[28].mxu1 %vm214_vm6, %v412_v63 }
  0xea   :  { %6912 = vmatprep.mubr.msk.f32.mxu1 %vm214_vm6, %v415_v0  ;;  %878 = vmatprep.mubr.f32.mxu0 %v8771_v58 }
  0xed   :  { %5879 = vmatmul.mubr.msk.f32.gmra.mrb[6].mxu0 %vm214_vm6, %v406_v61  ;;  %6913 = vmatmul.mubr.msk.f32.gmra.mrb[30].mxu1 %vm214_vm6, %v418_v1 }
  0xee   :  { %6915 = vmatprep.mubr.msk.f32.mxu1 %vm214_vm6, %v421_v2  ;;  %884 = vmatprep.mubr.f32.mxu0 %v8771_v58 }
  0xf1   :  { %5880 = vmatmul.mubr.msk.f32.gmra.mrb[8].mxu0 %vm214_vm6, %v409_v62  ;;  %6916 = vmatmul.mubr.msk.f32.gmra.mrb[32].mxu1 %vm214_vm6, %v424_v3 }
  0xf2   :  { %6918 = vmatprep.mubr.msk.f32.mxu1 %vm214_vm6, %v427_v4  ;;  %890 = vmatprep.mubr.f32.mxu0 %v8771_v58 }
  0xf5   :  { %5881 = vmatmul.mubr.msk.f32.gmra.mrb[10].mxu0 %vm214_vm6, %v412_v63  ;;  %6919 = vmatmul.mubr.msk.f32.gmra.mrb[34].mxu1 %vm214_vm6, %v430_v5 }
  0xf6   :  { %896 = vmatprep.mubr.f32.mxu0 %v8771_v58  ;;  %1779 = vmatprep.mubr.f32.mxu1 %v8771_v58 }
  0xf9   :  { %5882 = vmatmul.mubr.msk.f32.gmra.mrb[12].mxu0 %vm214_vm6, %v415_v0 }
  0xfa   :  { %902 = vmatprep.mubr.f32.mxu0 %v8771_v58 }
  0xfd   :  { %5883 = vmatmul.mubr.msk.f32.gmra.mrb[14].mxu0 %vm214_vm6, %v418_v1 }
  0xfe   :  { %908 = vmatprep.mubr.f32.mxu0 %v8771_v58 }
 0x101   :  { %5884 = vmatmul.mubr.msk.f32.gmra.mrb[16].mxu0 %vm214_vm6, %v421_v2 }
 0x102   :  { %914 = vmatprep.mubr.f32.mxu0 %v8771_v58 }
 0x105   :  { %5885 = vmatmul.mubr.msk.f32.gmra.mrb[18].mxu0 %vm214_vm6, %v424_v3 }
 0x106   :  { %920 = vmatprep.mubr.f32.mxu0 %v8771_v58 }
 0x109   :  { %5886 = vmatmul.mubr.msk.f32.gmra.mrb[20].mxu0 %vm214_vm6, %v427_v4 }
 0x10a   :  { %926 = vmatprep.mubr.f32.mxu0 %v8771_v58 }
 0x10d   :  { %5887 = vmatmul.mubr.msk.f32.gmra.mrb[22].mxu0 %vm214_vm6, %v430_v5  ;;  %vm2533_vm6 = vcmask 1042432  }
 0x157   :  { %v6485_v6 = vpop.f32.mrb[0].mxu1 }
 0x158   :  { %v6486_v7 = vpop.f32.mrb[1].mxu1 }
 0x159   :  { %v6487_v8 = vadd.f32 %v6486_v7, %v6485_v6 }
 0x15b   :  { %v1000_v54 = vadd.f32 %v6487_v8, %v609_v46 }
 0x15f   :  { %v6488_v9 = vpop.f32.mrb[2].mxu1 }
 0x160   :  { %v6489_v10 = vpop.f32.mrb[3].mxu1 }
 0x161   :  { %v6490_v11 = vadd.f32 %v6489_v10, %v6488_v9 }
 0x163   :  { %v1005_v51 = vadd.f32 %v6490_v11, %v609_v46 }
 0x167   :  { %v6491_v12 = vpop.f32.mrb[4].mxu1 }
 0x168   :  { %v6492_v13 = vpop.f32.mrb[5].mxu1 }
 0x169   :  { %v6493_v14 = vadd.f32 %v6492_v13, %v6491_v12 }
 0x16b   :  { %v1010_v5 = vadd.f32 %v6493_v14, %v609_v46 }
 0x16f   :  { %v6494_v15 = vpop.f32.mrb[6].mxu1 }
 0x170   :  { %v6495_v16 = vpop.f32.mrb[7].mxu1 }
 0x171   :  { %v6496_v17 = vadd.f32 %v6495_v16, %v6494_v15 }
 0x173   :  { %v1015_v0 = vadd.f32 %v6496_v17, %v609_v46 }
 0x177   :  { %v6497_v18 = vpop.f32.mrb[8].mxu1 }
 0x178   :  { %v6498_v19 = vpop.f32.mrb[9].mxu1 }
 0x179   :  { %v9378_v20 = vadd.f32 %v6498_v19, %v6497_v18 }
 0x17b   :  { %v1020_v19 = vadd.f32 %v9378_v20, %v609_v46 }
 0x180   :  { %v6500_v21 = vpop.f32.mrb[10].mxu1 }
 0x181   :  { %v6501_v22 = vpop.f32.mrb[11].mxu1 }
 0x182   :  { %v6502_v23 = vadd.f32 %v6501_v22, %v6500_v21 }
 0x184   :  { %v1025_v14 = vadd.f32 %v6502_v23, %v609_v46 }
 0x188   :  { %v6503_v24 = vpop.f32.mrb[12].mxu1 }
 0x189   :  { %v6504_v25 = vpop.f32.mrb[13].mxu1 }
 0x18a   :  { %v9380_v26 = vadd.f32 %v6504_v25, %v6503_v24 }
 0x190   :  { %v6506_v27 = vpop.f32.mrb[14].mxu1 }
 0x191   :  { %v6507_v28 = vpop.f32.mrb[15].mxu1 }
 0x192   :  { %v9382_v29 = vadd.f32 %v6507_v28, %v6506_v27  ;;  %v1030_v27 = vadd.f32 %v9380_v26, %v609_v46 }
 0x198   :  { %v6509_v30 = vpop.f32.mrb[16].mxu1 }
 0x199   :  { %v6510_v31 = vpop.f32.mrb[17].mxu1 }
 0x19a   :  { %v9384_v32 = vadd.f32 %v6510_v31, %v6509_v30  ;;  %v1035_v30 = vadd.f32 %v9382_v29, %v609_v46 }
 0x19c   :  { %v1040_v20 = vadd.f32 %v9384_v32, %v609_v46 }
 0x1a0   :  { %v6512_v33 = vpop.f32.mrb[18].mxu1 }
 0x1a1   :  { %v6513_v34 = vpop.f32.mrb[19].mxu1 }
 0x1a2   :  { %v9386_v35 = vadd.f32 %v6513_v34, %v6512_v33 }
 0x1a4   :  { %v1045_v34 = vadd.f32 %v9386_v35, %v609_v46 }
 0x1a8   :  { %v6515_v37 = vpop.f32.mrb[20].mxu1 }
 0x1a9   :  { %v6516_v39 = vpop.f32.mrb[21].mxu1 }
 0x1aa   :  { %v9390_v40 = vadd.f32 %v6516_v39, %v6515_v37 }
 0x1ac   :  { %v9445_v36 = vadd.f32 %v9390_v40, %v609_v46 }
 0x1b0   :  { %v6518_v45 = vpop.f32.mrb[22].mxu1 }
 0x1b1   :  { %v6519_v47 = vpop.f32.mrb[23].mxu1 }
 0x1b2   :  { %v6520_v49 = vadd.f32 %v6519_v47, %v6518_v45 }
 0x1b4   :  { %v862_v52 = vpop.f32.mrb[0].mxu0  ;;  %v6905_v53 = vpop.f32.mrb[24].mxu1  ;;  %v1055_v45 = vadd.f32 %v6520_v49, %v609_v46 }
 0x1b5   :  { %v9409_v55 = vadd.f32 %v862_v52, %v9402_v48  ;;  %v1130_v56 = vadd.f32 %v6905_v53, %v1005_v51  ;;  %v864_v57 = vpop.f32.mrb[1].mxu0  ;;  %v1124_v59 = vpop.f32.mrb[25].mxu1 }
 0x1b6   :  { %v9412_v60 = vadd.f32 %v864_v57, %v9406_v50  ;;  %v1125_v61 = vadd.f32 %v1124_v59, %v1000_v54 }
 0x1b7   :  { %v1183_v62 = vmax.f32 %v9409_v55, 0.0  ;;  %v1188_v63 = vmax.f32 %v1130_v56, 0.0 }
 0x1b8   :  { %v1184_v1 = vmax.f32 %v9412_v60, 0.0  ;;  %v1185_v2 = vmax.f32 %v1125_v61, 0.0  ;;  %v868_v3 = vpop.f32.mrb[2].mxu0  ;;  %v6908_v4 = vpop.f32.mrb[26].mxu1 }
 0x1b9   :  { %1219 = vst [vmem:[#allocation3] sm:$0xff] %v1183_v62  ;;  %1225 = vst.msk [vmem:[#allocation3 + $0x28] sm:$0xff] %vm1221_vm8, %v1188_v63  ;;  %v9420_v6 = vadd.f32 %v868_v3, %v9402_v48  ;;  %v1140_v7 = vadd.f32 %v6908_v4, %v1015_v0  ;;  %v870_v8 = vpop.f32.mrb[3].mxu0  ;;  %v1134_v9 = vpop.f32.mrb[27].mxu1 }
 0x1ba   :  { %1220 = vst [vmem:[#allocation3 + $0x8] sm:$0xff] %v1184_v1  ;;  %1222 = vst.msk [vmem:[#allocation3 + $0x10] sm:$0xff] %vm1221_vm8, %v1185_v2  ;;  %v9426_v10 = vadd.f32 %v870_v8, %v9406_v50  ;;  %v1135_v11 = vadd.f32 %v1134_v9, %v1010_v5 }
 0x1bb   :  { %v1186_v12 = vmax.f32 %v9420_v6, 0.0  ;;  %v1194_v13 = vmax.f32 %v1140_v7, 0.0 }
 0x1bc   :  { %v1187_v15 = vmax.f32 %v9426_v10, 0.0  ;;  %v1191_v16 = vmax.f32 %v1135_v11, 0.0  ;;  %v874_v17 = vpop.f32.mrb[4].mxu0  ;;  %v6911_v18 = vpop.f32.mrb[28].mxu1 }
 0x1bd   :  { %1231 = vst.msk [vmem:[#allocation3 + $0x58] sm:$0xff] %vm1221_vm8, %v1194_v13  ;;  %v9433_v21 = vadd.f32 %v874_v17, %v9402_v48  ;;  %v1150_v22 = vadd.f32 %v6911_v18, %v1025_v14  ;;  %v876_v24 = vpop.f32.mrb[5].mxu0  ;;  %v1144_v25 = vpop.f32.mrb[29].mxu1  ;;  %v9450_v29 = vrot.slane %v1186_v12, 1 }
 0x1be   :  { %1228 = vst.msk [vmem:[#allocation3 + $0x40] sm:$0xff] %vm1221_vm8, %v1191_v16  ;;  %v9438_v23 = vadd.f32 %v876_v24, %v9406_v50  ;;  %v1145_v28 = vadd.f32 %v1144_v25, %v1020_v19  ;;  %v1339_v53 = vrot.slane %v1187_v15, 1 }
 0x1bf   :  { %v1189_v31 = vmax.f32 %v9433_v21, 0.0  ;;  %v1200_v33 = vmax.f32 %v1150_v22, 0.0 }
 0x1c0   :  { %v1190_v26 = vmax.f32 %v9438_v23, 0.0  ;;  %v1197_v37 = vmax.f32 %v1145_v28, 0.0  ;;  %v880_v39 = vpop.f32.mrb[6].mxu0  ;;  %v6914_v42 = vpop.f32.mrb[30].mxu1  ;;  %v1261_v47 = vld [vmem:[#allocation3 + $0x28] sm:$0xff] }
 0x1c1   :  { %1237 = vst.msk [vmem:[#allocation3 + $0x88] sm:$0xff] %vm1221_vm8, %v1200_v33  ;;  %v9454_v32 = vadd.f32 %v880_v39, %v9402_v48  ;;  %v1160_v35 = vadd.f32 %v6914_v42, %v1035_v30  ;;  %v882_v51 = vpop.f32.mrb[7].mxu0  ;;  %v1154_v40 = vpop.f32.mrb[31].mxu1  ;;  %v1293_v52 = vld [vmem:[#allocation3 + $0x8] sm:$0xfe]  ;;  %v1342_v54 = vrot.slane %v1261_v47, 1 }
 0x1c2   :  { %1234 = vst.msk [vmem:[#allocation3 + $0x70] sm:$0xff] %vm1221_vm8, %v1197_v37  ;;  %v9460_v46 = vadd.f32 %v882_v51, %v9406_v50  ;;  %v1155_v49 = vadd.f32 %v1154_v40, %v1030_v27  ;;  %v1294_v56 = vld [vmem:[#allocation3 + $0x10] sm:$0xfe]  ;;  %v1338_v57 = vrot.slane %v1293_v52, 1  ;;  %v1346_v59 = vrot.slane %v1190_v26, 1 }
 0x1c3   :  { %v1292_v61 = vld [vmem:[#allocation3] sm:$0xfe]  ;;  %v1192_v63 = vmax.f32 %v9454_v32, 0.0  ;;  %v1206_v0 = vmax.f32 %v1160_v35, 0.0  ;;  %v1341_v2 = vrot.slane %v1294_v56, 1  ;;  %v1258_v18 = vld [vmem:[#allocation3 + $0x10] sm:$0xff] }
 0x1c4   :  { %v1335_v3 = vrot.slane %v1292_v61, 1  ;;  %v1193_v4 = vmax.f32 %v9460_v46, 0.0  ;;  %v1203_v5 = vmax.f32 %v1155_v49, 0.0  ;;  %v886_v7 = vpop.f32.mrb[8].mxu0  ;;  %v6917_v8 = vpop.f32.mrb[32].mxu1  ;;  %v1340_v9 = vsel %vm1334_vm9, %v1338_v57, %v1339_v53  ;;  %v1267_v57 = vld [vmem:[#allocation3 + $0x58] sm:$0xff] }
 0x1c5   :  { %v1347_v11 = vsel %vm1334_vm9, %v1339_v53, %v1346_v59  ;;  %1243 = vst.msk [vmem:[#allocation3 + $0xb8] sm:$0xff] %vm1221_vm8, %v1206_v0  ;;  %v9470_v13 = vadd.f32 %v886_v7, %v9402_v48  ;;  %v1170_v14 = vadd.f32 %v6917_v8, %v1045_v34  ;;  %v888_v16 = vpop.f32.mrb[9].mxu0  ;;  %v1164_v17 = vpop.f32.mrb[33].mxu1  ;;  %v1343_v19 = vsel %vm1334_vm9, %v1341_v2, %v1342_v54  ;;  %v1264_v24 = vld [vmem:[#allocation3 + $0x40] sm:$0xff] }
 0x1c6   :  { %v9475_v22 = vmax.f32 %v1184_v1, %v1340_v9  ;;  %1240 = vst.msk [vmem:[#allocation3 + $0xa0] sm:$0xff] %vm1221_vm8, %v1203_v5  ;;  %v9479_v25 = vadd.f32 %v888_v16, %v9406_v50  ;;  %v1165_v27 = vadd.f32 %v1164_v17, %v1040_v20  ;;  %v9481_v28 = vmax.f32 %v1258_v18, %v1343_v19 }
 0x1c7   :  { %v1348_v30 = vrot.slane %v1264_v24, 1  ;;  %v1195_v33 = vmax.f32 %v9470_v13, 0.0  ;;  %v1212_v34 = vmax.f32 %v1170_v14, 0.0  ;;  %v9486_v37 = vmax.f32 %v1187_v15, %v1347_v11 }
 0x1c8   :  { %v1337_v60 = vsel %vm1334_vm9, %v1335_v3, %v9450_v29  ;;  %v1196_v1 = vmax.f32 %v9479_v25, 0.0  ;;  %v1209_v39 = vmax.f32 %v1165_v27, 0.0  ;;  %v892_v42 = vpop.f32.mrb[10].mxu0  ;;  %v6920_v35 = vpop.f32.mrb[34].mxu1  ;;  %v8255_v20 = vpack.i.bf16 %v9481_v28, %v9475_v22 }
 0x1c9   :  { %v1349_v51 = vsel %vm1334_vm9, %v1342_v54, %v1348_v30  ;;  %1249 = vst.msk [vmem:[#allocation3 + $0xe8] sm:$0xff] %vm1221_vm8, %v1212_v34  ;;  %v9496_v40 = vadd.f32 %v892_v42, %v9402_v48  ;;  %v1180_v10 = vadd.f32 %v6920_v35, %v1055_v45  ;;  %v894_v15 = vpop.f32.mrb[11].mxu0  ;;  %v1174_v52 = vpop.f32.mrb[35].mxu1  ;;  %v1344_v49 = vrot.slane %v1189_v31, 1  ;;  %v1270_v8 = vld [vmem:[#allocation3 + $0x70] sm:$0xff]  ;;  %v1273_v35 = vld [vmem:[#allocation3 + $0x88] sm:$0xff] }
 0x1ca   :  { %v9498_v53 = vmax.f32 %v1261_v47, %v1349_v51  ;;  %1246 = vst.msk [vmem:[#allocation3 + $0xd0] sm:$0xff] %vm1221_vm8, %v1209_v39  ;;  %v9504_v56 = vadd.f32 %v894_v15, %v9406_v50  ;;  %v1175_v54 = vadd.f32 %v1174_v52, %v9445_v36  ;;  %8256 = vrot.lane.b32.xlu0 %v8255_v20, %s8772_s2  ;;  %v1352_v47 = vrot.slane %v1193_v4, 1 }
 0x1cb   :  { %v9510_v45 = vmax.f32 %v1183_v62, %v1337_v60  ;;  %v1198_v61 = vmax.f32 %v9496_v40, 0.0  ;;  %v1218_v0 = vmax.f32 %v1180_v10, 0.0  ;;  %v1345_v36 = vsel %vm1334_vm9, %v9450_v29, %v1344_v49 }
 0x1cc   :  { %v8265_v2 = vpack.i.bf16 %v9498_v53, %v9486_v37  ;;  %v1199_v3 = vmax.f32 %v9504_v56, 0.0  ;;  %v1215_v5 = vmax.f32 %v1175_v54, 0.0  ;;  %v898_v7 = vpop.f32.mrb[12].mxu0  ;;  %v9522_v55 = vmax.f32 %v1186_v12, %v1345_v36 }
 0x1cd   :  { %v1353_v62 = vsel %vm1334_vm9, %v1346_v59, %v1352_v47  ;;  %1255 = vst.msk [vmem:[#allocation3 + $0x118] sm:$0xff] %vm1221_vm8, %v1218_v0  ;;  %v9527_v9 = vadd.f32 %v898_v7, %v9402_v48  ;;  %v900_v11 = vpop.f32.mrb[13].mxu0  ;;  %v1354_v29 = vrot.slane %v1267_v57, 1  ;;  %v1350_v6 = vrot.slane %v1192_v63, 1  ;;  %v1276_v15 = vld [vmem:[#allocation3 + $0xa0] sm:$0xff] }
 0x1ce   :  { %8266 = vrot.lane.b32.xlu1 %v8265_v2, %s8772_s2  ;;  %v9532_v14 = vmax.f32 %v1190_v26, %v1353_v62  ;;  %1252 = vst.msk [vmem:[#allocation3 + $0x100] sm:$0xff] %vm1221_vm8, %v1215_v5  ;;  %v9538_v12 = vadd.f32 %v900_v11, %v9406_v50  ;;  %v8260_v59 = vpack.i.bf16 %v9522_v55, %v9510_v45  ;;  %v1356_v16 = vrot.slane %v1195_v33, 1 }
 0x1cf   :  { %v1358_v17 = vrot.slane %v1196_v1, 1  ;;  %v1201_v23 = vmax.f32 %v9527_v9, 0.0  ;;  %v1355_v26 = vsel %vm1334_vm9, %v1348_v30, %v1354_v29  ;;  %v1351_v18 = vsel %vm1334_vm9, %v1344_v49, %v1350_v6 }
 0x1d0   :  { %v1360_v19 = vrot.slane %v1270_v8, 1  ;;  %v1202_v27 = vmax.f32 %v9538_v12, 0.0  ;;  %v904_v34 = vpop.f32.mrb[14].mxu0  ;;  %8261 = vrot.lane.b32.xlu0 %v8260_v59, %s8772_s2  ;;  %v9551_v60 = vmax.f32 %v1264_v24, %v1355_v26  ;;  %v1357_v39 = vsel %vm1334_vm9, %v1350_v6, %v1356_v16 }
 0x1d1   :  { %v9556_v42 = vmax.f32 %v1189_v31, %v1351_v18  ;;  %v9559_v20 = vadd.f32 %v904_v34, %v9402_v48  ;;  %v906_v30 = vpop.f32.mrb[15].mxu0  ;;  %v9563_v51 = vmax.f32 %v1192_v63, %v1357_v39  ;;  %v1359_v10 = vsel %vm1334_vm9, %v1352_v47, %v1358_v17  ;;  %v1279_v18 = vld [vmem:[#allocation3 + $0xb8] sm:$0xff] }
 0x1d2   :  { %v1361_v24 = vsel %vm1334_vm9, %v1354_v29, %v1360_v19  ;;  %v9568_v52 = vadd.f32 %v906_v30, %v9406_v50  ;;  %v8270_v21 = vpack.i.bf16 %v9551_v60, %v9532_v14  ;;  %v9574_v31 = vmax.f32 %v1193_v4, %v1359_v10 }
 0x1d3   :  { %v9576_v49 = vmax.f32 %v1267_v57, %v1361_v24  ;;  %v1204_v32 = vmax.f32 %v9559_v20, 0.0  ;;  %v8275_v63 = vpack.i.bf16 %v9563_v51, %v9556_v42  ;;  %v1364_v54 = vrot.slane %v1199_v3, 1 }
 0x1d4   :  { %v1366_v47 = vrot.slane %v1273_v35, 1  ;;  %v1205_v0 = vmax.f32 %v9568_v52, 0.0  ;;  %v910_v2 = vpop.f32.mrb[16].mxu0  ;;  %8271 = vrot.lane.b32.xlu1 %v8270_v21, %s8772_s2  ;;  %v1370_v4 = vrot.slane %v1202_v27, 1  ;;  %v1372_v57 = vrot.slane %v1276_v15, 1 }
 0x1d5   :  { %v8280_v46 = vpack.i.bf16 %v9576_v49, %v9574_v31  ;;  %v9590_v36 = vadd.f32 %v910_v2, %v9402_v48  ;;  %v912_v5 = vpop.f32.mrb[17].mxu0  ;;  %v1365_v7 = vsel %vm1334_vm9, %v1358_v17, %v1364_v54  ;;  %v1362_v11 = vrot.slane %v1198_v61, 1 }
 0x1d6   :  { %v1367_v62 = vsel %vm1334_vm9, %v1360_v19, %v1366_v47  ;;  %v9597_v29 = vadd.f32 %v912_v5, %v9406_v50  ;;  %v9602_v6 = vmax.f32 %v1196_v1, %v1365_v7  ;;  %v1371_v26 = vsel %vm1334_vm9, %v1364_v54, %v1370_v4  ;;  %v1282_v5 = vld [vmem:[#allocation3 + $0xd0] sm:$0xff] }
 0x1d7   :  { %8281 = vrot.lane.b32.xlu0 %v8280_v46, %s8772_s2  ;;  %v9604_v59 = vmax.f32 %v1270_v8, %v1367_v62  ;;  %v1207_v17 = vmax.f32 %v9590_v36, 0.0  ;;  %v1373_v19 = vsel %vm1334_vm9, %v1366_v47, %v1372_v57  ;;  %v9611_v34 = vmax.f32 %v1199_v3, %v1371_v26 }
 0x1d8   :  { %v1363_v39 = vsel %vm1334_vm9, %v1356_v16, %v1362_v11  ;;  %v1208_v30 = vmax.f32 %v9597_v29, 0.0  ;;  %v916_v25 = vpop.f32.mrb[18].mxu0  ;;  %8276 = vrot.lane.b32.xlu1 %v8275_v63, %s8772_s2  ;;  %v9618_v8 = vmax.f32 %v1273_v35, %v1373_v19  ;;  %v1368_v10 = vrot.slane %v1201_v23, 1 }
 0x1d9   :  { %v8285_v1 = vpack.i.bf16 %v9604_v59, %v9602_v6  ;;  %v9623_v24 = vadd.f32 %v916_v25, %v9402_v48  ;;  %v918_v56 = vpop.f32.mrb[19].mxu0  ;;  %v9627_v3 = vmax.f32 %v1195_v33, %v1363_v39  ;;  %v1376_v16 = vrot.slane %v1205_v0, 1 }
 0x1da   :  { %v1378_v21 = vrot.slane %v1279_v18, 1  ;;  %v9632_v63 = vadd.f32 %v918_v56, %v9406_v50  ;;  %v8295_v35 = vpack.i.bf16 %v9618_v8, %v9611_v34  ;;  %v1369_v54 = vsel %vm1334_vm9, %v1362_v11, %v1368_v10 }
 0x1db   :  { %8286 = vrot.lane.b32.xlu0 %v8285_v1, %s8772_s2  ;;  %v1374_v47 = vrot.slane %v1204_v32, 1  ;;  %v1210_v13 = vmax.f32 %v9623_v24, 0.0  ;;  %v9643_v33 = vmax.f32 %v1198_v61, %v1369_v54  ;;  %v1377_v2 = vsel %vm1334_vm9, %v1370_v4, %v1376_v16  ;;  %v1285_v61 = vld [vmem:[#allocation3 + $0xe8] sm:$0xff] }
 0x1dc   :  { %v1379_v46 = vsel %vm1334_vm9, %v1372_v57, %v1378_v21  ;;  %v1211_v7 = vmax.f32 %v9632_v63, 0.0  ;;  %v922_v62 = vpop.f32.mrb[20].mxu0  ;;  %8296 = vrot.lane.b32.xlu1 %v8295_v35, %s8772_s2  ;;  %v9651_v11 = vmax.f32 %v1202_v27, %v1377_v2  ;;  %v1380_v19 = vrot.slane %v1207_v17, 1 }
 0x1dd   :  { %v9653_v29 = vmax.f32 %v1276_v15, %v1379_v46  ;;  %v1375_v40 = vsel %vm1334_vm9, %v1368_v10, %v1374_v47  ;;  %v9657_v26 = vadd.f32 %v922_v62, %v9402_v48  ;;  %v924_v4 = vpop.f32.mrb[21].mxu0  ;;  %v8290_v57 = vpack.i.bf16 %v9643_v33, %v9627_v3 }
 0x1de   :  { %v9665_v12 = vmax.f32 %v1201_v23, %v1375_v40  ;;  %v7906_v27 = vadd.f32 %v924_v4, %v9406_v50  ;;  %v1382_v39 = vrot.slane %v1208_v30, 1  ;;  %v1384_v25 = vrot.slane %v1282_v5, 1  ;;  %v1288_v4 = vld [vmem:[#allocation3 + $0x100] sm:$0xff] }
 0x1df   :  { %v8300_v15 = vpack.i.bf16 %v9653_v29, %v9651_v11  ;;  %v1213_v1 = vmax.f32 %v9657_v26, 0.0  ;;  %8291 = vrot.lane.b32.xlu0 %v8290_v57, %s8772_s2  ;;  %v1381_v10 = vsel %vm1334_vm9, %v1374_v47, %v1380_v19  ;;  %v1388_v56 = vrot.slane %v1211_v7, 1 }
 0x1e0   :  { %v1390_v63 = vrot.slane %v1285_v61, 1  ;;  %v1214_v35 = vmax.f32 %v7906_v27, 0.0  ;;  %v928_v54 = vpop.f32.mrb[22].mxu0  ;;  %v9676_v9 = vmax.f32 %v1204_v32, %v1381_v10  ;;  %v1383_v23 = vsel %vm1334_vm9, %v1376_v16, %v1382_v39 }
 0x1e1   :  { %8301 = vrot.lane.b32.xlu1 %v8300_v15, %s8772_s2  ;;  %v1385_v2 = vsel %vm1334_vm9, %v1378_v21, %v1384_v25  ;;  %v7907_v46 = vadd.f32 %v928_v54, %v9402_v48  ;;  %v930_v62 = vpop.f32.mrb[23].mxu0  ;;  %v9683_v47 = vmax.f32 %v1205_v0, %v1383_v23  ;;  %v1389_v26 = vsel %vm1334_vm9, %v1382_v39, %v1388_v56  ;;  %v1297_v48 = vld [vmem:[#allocation3 + $0x118] sm:$0xff] }
 0x1e2   :  { %v9685_v40 = vmax.f32 %v1279_v18, %v1385_v2  ;;  %v7908_v20 = vadd.f32 %v930_v62, %v9406_v50  ;;  %v8305_v32 = vpack.i.bf16 %v9676_v9, %v9665_v12  ;;  %v1391_v16 = vsel %vm1334_vm9, %v1384_v25, %v1390_v63 }
 0x1e3   :  { %v9692_v21 = vmax.f32 %v1208_v30, %v1389_v26  ;;  %v1216_v57 = vmax.f32 %v7907_v46, 0.0  ;;  %v9696_v0 = vmax.f32 %v1282_v5, %v1391_v16  ;;  %v1394_v18 = vrot.slane %v1214_v35, 1 }
 0x1e4   :  { %v8310_v52 = vpack.i.bf16 %v9685_v40, %v9683_v47  ;;  %v1217_v27 = vmax.f32 %v7908_v20, 0.0  ;;  %v1396_v15 = vrot.slane %v1288_v4, 1  ;;  %v1386_v50 = vrot.slane %v1210_v13, 1 }
 0x1e5   :  { %8306 = vrot.lane.b32.xlu1 %v8305_v32, %s8772_s2  ;;  %v1392_v39 = vrot.slane %v1213_v1, 1  ;;  %1253 = vst [vmem:[#allocation3 + $0x108] sm:$0xff] %v1216_v57  ;;  %v8315_v30 = vpack.i.bf16 %v9696_v0, %v9692_v21  ;;  %v1395_v25 = vsel %vm1334_vm9, %v1388_v56, %v1394_v18  ;;  %v1402_v10 = vrot.slane %v1297_v48, 1 }
 0x1e6   :  { %8311 = vrot.lane.b32.xlu0 %v8310_v52, %s8772_s2  ;;  %v1398_v5 = vrot.slane %v1216_v57, 1  ;;  %1254 = vst [vmem:[#allocation3 + $0x110] sm:$0xff] %v1217_v27  ;;  %v1397_v54 = vsel %vm1334_vm9, %v1390_v63, %v1396_v15  ;;  %v9706_v23 = vmax.f32 %v1211_v7, %v1395_v25  ;;  %v1387_v2 = vsel %vm1334_vm9, %v1380_v19, %v1386_v50  ;;  %v1291_v57 = vld [vmem:[#allocation3 + $0x118] sm:$0x7f]  ;;  %v8447_v25 = vld [vmem:[%s11560_s4 + $0x20] ss:$8 sps:$4 sm:$0xff]  }
 0x1e7   :  { %v1393_v46 = vsel %vm1334_vm9, %v1386_v50, %v1392_v39  ;;  %v9710_v62 = vmax.f32 %v1285_v61, %v1397_v54  ;;  %v9714_v26 = vmax.f32 %v1207_v17, %v1387_v2  ;;  %v1400_v20 = vrot.slane %v1217_v27, 1  ;;  %v8442_v50 = vld [vmem:[%s11560_s4 + $0x14] ss:$8 sps:$4 sm:$0xff]   ;;  %v8451_v54 = vld [vmem:[%s11560_s4 + $0x44] ss:$8 sps:$4 sm:$0xff]  }
 0x1e8   :  { %v9718_v56 = vmax.f32 %v1210_v13, %v1393_v46  ;;  %v1403_v32 = vsel %vm1334_vm9, %v1396_v15, %v1402_v10  ;;  %v1399_v7 = vsel %vm1334_vm9, %v1392_v39, %v1398_v5  ;;  %v8441_v15 = vld [vmem:[%s11560_s4] ss:$8 sps:$4 sm:$0xff]   ;;  %v8444_v39 = vld [vmem:[%s11560_s4 + $0x10] ss:$8 sps:$4 sm:$0xff]   ;;  %v8454_v46 = vld [vmem:[%s11560_s4 + $0x54] ss:$8 sps:$4 sm:$0xff]  }
 0x1e9   :  { %v8325_v19 = vpack.i.bf16 %v9710_v62, %v9706_v23  ;;  %v1401_v36 = vsel %vm1334_vm9, %v1394_v18, %v1400_v20  ;;  %v9730_v24 = vmax.f32 %v1288_v4, %v1403_v32  ;;  %v9732_v13 = vmax.f32 %v1213_v1, %v1399_v7  ;;  %v8439_v18 = vld [vmem:[%s11560_s4 + $0x4] ss:$8 sps:$4 sm:$0xff]   ;;  %v8453_v2 = vld [vmem:[%s11560_s4 + $0x40] ss:$8 sps:$4 sm:$0xff]  }
 0x1ea   :  { %8316 = vrot.lane.b32.xlu0 %v8315_v30, %s8772_s2  ;;  %v8320_v61 = vpack.i.bf16 %v9718_v56, %v9714_v26  ;;  %v9728_v17 = vmax.f32 %v1214_v35, %v1401_v36  ;;  %v9742_v35 = vmax.f32 %v1291_v57, %v1402_v10  ;;  %7199 = vmatprep.subr.bf16.mxu0 %v8439_v18  ;;  %v8445_v30 = vld [vmem:[%s11560_s4 + $0x24] ss:$8 sps:$4 sm:$0xff]   ;;  %v8448_v10 = vld [vmem:[%s11560_s4 + $0x34] ss:$8 sps:$4 sm:$0xff]   ;;  %v8459_v7 = vld [vmem:[%s11560_s4 + $0x60] ss:$8 sps:$4 sm:$0xff]  }
 0x1eb   :  { %8326 = vrot.lane.b32.xlu1 %v8325_v19, %s8772_s2  ;;  %7201 = vmatpush1.bf16.msra.mxu0 %v8441_v15  ;;  %v8457_v32 = vld [vmem:[%s11560_s4 + $0x64] ss:$8 sps:$4 sm:$0xff]   ;;  %v8460_v19 = vld [vmem:[%s11560_s4 + $0x74] ss:$8 sps:$4 sm:$0xff]   ;;  %v8474_v18 = vld [vmem:[%s11560_s4 + $0xb0] ss:$8 sps:$4 sm:$0xff]  }
 0x1ec   :  { %v8335_v63 = vpack.i.bf16 %v9730_v24, %v9728_v17  ;;  %v1289_v16 = vld [vmem:[#allocation3 + $0x108] sm:$0x7f]  ;;  %7203 = vmatprep.subr.bf16.mxu0 %v8442_v50 }
 0x1ed   :  { %v1290_v48 = vld [vmem:[#allocation3 + $0x110] sm:$0x7f]  ;;  %v9738_v52 = vmax.f32 %v1289_v16, %v1398_v5  ;;  %v8463_v36 = vld [vmem:[%s11560_s4 + $0x84] ss:$8 sps:$4 sm:$0xff]  }
 0x1ee   :  { %8321 = vrot.lane.b32.xlu0 %v8320_v61, %s8772_s2  ;;  %v9740_v27 = vmax.f32 %v1290_v48, %v1400_v20  ;;  %v8450_v5 = vld [vmem:[%s11560_s4 + $0x30] ss:$8 sps:$4 sm:$0xff]   ;;  %v8466_v16 = vld [vmem:[%s11560_s4 + $0x94] ss:$8 sps:$4 sm:$0xff]   ;;  %v8469_v57 = vld [vmem:[%s11560_s4 + $0xa4] ss:$8 sps:$4 sm:$0xff]  }
 0x1ef   :  { %8336 = vrot.lane.b32.xlu1 %v8335_v63, %s8772_s2  ;;  %v8340_v1 = vpack.i.bf16 %v9738_v52, %v9732_v13  ;;  %7205 = vmatpush1.bf16.msra.mxu0 %v8444_v39  ;;  %v8456_v20 = vld [vmem:[%s11560_s4 + $0x50] ss:$8 sps:$4 sm:$0xff]   ;;  %v8465_v63 = vld [vmem:[%s11560_s4 + $0x80] ss:$8 sps:$4 sm:$0xff]   ;;  %v8475_v50 = vld [vmem:[%s11560_s4 + $0xc4] ss:$8 sps:$4 sm:$0xff]  }
 0x1f0   :  { %v8330_v4 = vpack.i.bf16 %v9742_v35, %v9740_v27  ;;  %7207 = vmatprep.subr.bf16.mxu0 %v8445_v30  ;;  %v8462_v61 = vld [vmem:[%s11560_s4 + $0x70] ss:$8 sps:$4 sm:$0xff]  }
 0x1f1   :  { %v8468_v48 = vld [vmem:[%s11560_s4 + $0x90] ss:$8 sps:$4 sm:$0xff]  }
 0x1f2   :  { %8331 = vrot.lane.b32.xlu0 %v8330_v4, %s8772_s2  ;;  %v8472_v4 = vld [vmem:[%s11560_s4 + $0xb4] ss:$8 sps:$4 sm:$0xff]  }
 0x1f3   :  { %8341 = vrot.lane.b32.xlu1 %v8340_v1, %s8772_s2  ;;  %7209 = vmatpush1.bf16.msra.mxu0 %v8447_v25  ;;  %v8471_v1 = vld [vmem:[%s11560_s4 + $0xa0] ss:$8 sps:$4 sm:$0xff]  }
 0x1f4   :  { %7211 = vmatprep.subr.bf16.mxu0 %v8448_v10  ;;  %v8477_v10 = vld [vmem:[%s11560_s4 + $0xc0] ss:$8 sps:$4 sm:$0xff]  }
 0x1f7   :  { %7213 = vmatpush1.bf16.msra.mxu0 %v8450_v5 }
 0x1f8   :  { %7215 = vmatprep.subr.bf16.mxu0 %v8451_v54 }
 0x1fb   :  { %7217 = vmatpush1.bf16.msra.mxu0 %v8453_v2 }
 0x1fc   :  { %7219 = vmatprep.subr.bf16.mxu0 %v8454_v46  ;;  %v8478_v46 = vld [vmem:[%s11560_s4 + $0xd4] ss:$8 sps:$4 sm:$0xff]  }
 0x1ff   :  { %7221 = vmatpush1.bf16.msra.mxu0 %v8456_v20 }
 0x200   :  { %7223 = vmatprep.subr.bf16.mxu0 %v8457_v32 }
 0x203   :  { %7225 = vmatpush1.bf16.msra.mxu0 %v8459_v7 }
 0x204   :  { %7227 = vmatprep.subr.bf16.mxu0 %v8460_v19 }
 0x207   :  { %7229 = vmatpush1.bf16.msra.mxu0 %v8462_v61 }
 0x208   :  { %7231 = vmatprep.subr.bf16.mxu0 %v8463_v36 }
 0x20b   :  { %7233 = vmatpush1.bf16.msra.mxu0 %v8465_v63  ;;  %v8480_v63 = vld [vmem:[%s11560_s4 + $0xd0] ss:$8 sps:$4 sm:$0xff]  }
 0x20c   :  { %7235 = vmatprep.subr.bf16.mxu0 %v8466_v16  ;;  %v8481_v16 = vld [vmem:[%s11560_s4 + $0xe4] ss:$8 sps:$4 sm:$0xff]  }
 0x20f   :  { %7237 = vmatpush1.bf16.msra.mxu0 %v8468_v48 }
 0x210   :  { %7239 = vmatprep.subr.bf16.mxu0 %v8469_v57 }
 0x213   :  { %7241 = vmatpush1.bf16.msra.mxu0 %v8471_v1 }
 0x214   :  { %7243 = vmatprep.subr.bf16.mxu0 %v8472_v4 }
 0x217   :  { %7245 = vmatpush1.bf16.msra.mxu0 %v8474_v18 }
 0x218   :  { %7247 = vmatprep.subr.bf16.mxu0 %v8475_v50 }
 0x21b   :  { %7249 = vmatpush1.bf16.msra.mxu0 %v8477_v10  ;;  %v8483_v10 = vld [vmem:[%s11560_s4 + $0xe0] ss:$8 sps:$4 sm:$0xff]  }
 0x21c   :  { %7251 = vmatprep.subr.bf16.mxu0 %v8478_v46 }
 0x21f   :  { %7253 = vmatpush1.bf16.msra.mxu0 %v8480_v63 }
 0x220   :  { %7255 = vmatprep.subr.bf16.mxu0 %v8481_v16 }
 0x223   :  { %7257 = vmatpush1.bf16.msra.mxu0 %v8483_v10 }
 0x23c   :  { %v9823_v15 = vpop.permute.xlu0 %8256 }
 0x23d   :  { %v8259_v39 = vunpack.i.h.bf16 %v9823_v15  ;;  %v8258_v30 = vunpack.i.l.bf16 %v9823_v15  ;;  %v1682_v15 = vld [vmem:[%s11559_s3 + $0x8] sm:$0xff] }
 0x23f   :  { %v1586_v5 = vsel %vm1584_vm10, %v8258_v30, %v8259_v39 }
 0x240   :  { %v9830_v25 = vpop.permute.xlu1 %8266  ;;  %v1646_v61 = vmax.f32 %v9475_v22, %v1586_v5 }
 0x241   :  { %v8269_v54 = vunpack.i.h.bf16 %v9830_v25  ;;  %v8268_v2 = vunpack.i.l.bf16 %v9830_v25 }
 0x242   :  { %v8262_v32 = vpop.permute.xlu0 %8261 }
 0x243   :  { %v1588_v20 = vsel %vm1584_vm10, %v8268_v2, %v8269_v54  ;;  %v8264_v7 = vunpack.i.h.bf16 %v8262_v32  ;;  %v8263_v19 = vunpack.i.l.bf16 %v8262_v32 }
 0x244   :  { %v1649_v36 = vmax.f32 %v9486_v37, %v1588_v20 }
 0x245   :  { %v1587_v48 = vsel %vm1584_vm10, %v8264_v7, %v8268_v2  ;;  %v1585_v57 = vsel %vm1584_vm10, %v8263_v19, %v8258_v30 }
 0x246   :  { %v7146_v1 = vpack.c.bf16 %v1649_v36, %v1646_v61  ;;  %v1648_v4 = vmax.f32 %v9522_v55, %v1587_v48  ;;  %v1645_v22 = vmax.f32 %v9510_v45, %v1585_v57  ;;  %v9858_v37 = vpop.permute.xlu1 %8271  ;;  %v8484_v45 = vld [vmem:[%s11560_s4 + $0xf4] ss:$8 sps:$4 sm:$0xff]   ;;  %v8486_v36 = vld [vmem:[%s11560_s4 + $0xf0] ss:$8 sps:$4 sm:$0xff]  }
 0x247   :  { %v8274_v18 = vunpack.i.h.bf16 %v9858_v37  ;;  %v8273_v50 = vunpack.i.l.bf16 %v9858_v37  ;;  %7259 = vmatprep.subr.bf16.mxu0 %v8484_v45 }
 0x248   :  { %7147 = vmatprep.subr.bf16.mxu1 %v7146_v1  ;;  %v7148_v30 = vpack.c.bf16 %v1648_v4, %v1645_v22  ;;  %7261 = vmatpush1.bf16.msra.mxu0 %v8486_v36 }
 0x249   :  { %v9865_v5 = vpop.permute.xlu0 %8281  ;;  %v1590_v55 = vsel %vm1584_vm10, %v8273_v50, %v8274_v18 }
 0x24a   :  { %v8284_v2 = vunpack.i.h.bf16 %v9865_v5  ;;  %v8283_v46 = vunpack.i.l.bf16 %v9865_v5  ;;  %v8277_v20 = vpop.permute.xlu1 %8276  ;;  %7149 = vmatpush1.bf16.msra.mxu1 %v7148_v30  ;;  %v1652_v32 = vmax.f32 %v9532_v14, %v1590_v55 }
 0x24b   :  { %v8279_v7 = vunpack.i.h.bf16 %v8277_v20  ;;  %v8278_v19 = vunpack.i.l.bf16 %v8277_v20 }
 0x24c   :  { %v1592_v61 = vsel %vm1584_vm10, %v8283_v46, %v8284_v2 }
 0x24d   :  { %v9882_v63 = vpop.permute.xlu0 %8286  ;;  %v1655_v16 = vmax.f32 %v9574_v31, %v1592_v61  ;;  %v1589_v48 = vsel %vm1584_vm10, %v8278_v19, %v8273_v50  ;;  %v1591_v14 = vsel %vm1584_vm10, %v8279_v7, %v8283_v46 }
 0x24e   :  { %v8289_v57 = vunpack.i.h.bf16 %v9882_v63  ;;  %v8288_v1 = vunpack.i.l.bf16 %v9882_v63  ;;  %v1651_v4 = vmax.f32 %v9556_v42, %v1589_v48  ;;  %v1654_v22 = vmax.f32 %v9563_v51, %v1591_v14  ;;  %v9891_v10 = vpop.permute.xlu1 %8296 }
 0x24f   :  { %v7150_v30 = vpack.c.bf16 %v1655_v16, %v1652_v32  ;;  %v8299_v45 = vunpack.i.h.bf16 %v9891_v10  ;;  %v8298_v50 = vunpack.i.l.bf16 %v9891_v10 }
 0x250   :  { %v1594_v31 = vsel %vm1584_vm10, %v8288_v1, %v8289_v57  ;;  %v7152_v55 = vpack.c.bf16 %v1654_v22, %v1651_v4 }
 0x251   :  { %7151 = vmatprep.subr.bf16.mxu1 %v7150_v30  ;;  %v1596_v42 = vsel %vm1584_vm10, %v8298_v50, %v8299_v45  ;;  %v8292_v46 = vpop.permute.xlu0 %8291  ;;  %v1658_v7 = vmax.f32 %v9602_v6, %v1594_v31 }
 0x252   :  { %v8294_v51 = vunpack.i.h.bf16 %v8292_v46  ;;  %v8293_v20 = vunpack.i.l.bf16 %v8292_v46  ;;  %7153 = vmatpush1.bf16.msra.mxu1 %v7152_v55  ;;  %v1661_v19 = vmax.f32 %v9611_v34, %v1596_v42 }
 0x253   :  { %v9901_v32 = vpop.permute.xlu1 %8301 }
 0x254   :  { %v8304_v61 = vunpack.i.h.bf16 %v9901_v32  ;;  %v1595_v36 = vsel %vm1584_vm10, %v8294_v51, %v8298_v50  ;;  %v1593_v16 = vsel %vm1584_vm10, %v8293_v20, %v8288_v1  ;;  %v8303_v48 = vunpack.i.l.bf16 %v9901_v32  ;;  %v8489_v32 = vld [vmem:[%s11560_s4 + $0x100] ss:$8 sps:$4 sm:$0xff]  }
 0x255   :  { %v7154_v14 = vpack.c.bf16 %v1661_v19, %v1658_v7  ;;  %v1660_v4 = vmax.f32 %v9643_v33, %v1595_v36  ;;  %v1657_v22 = vmax.f32 %v9627_v3, %v1593_v16 }
 0x256   :  { %v1598_v31 = vsel %vm1584_vm10, %v8303_v48, %v8304_v61  ;;  %v1665_v5 = vmax.f32 %v9653_v29, %v8304_v61 }
 0x257   :  { %v8307_v30 = vpop.permute.xlu1 %8306  ;;  %7155 = vmatprep.subr.bf16.mxu1 %v7154_v14  ;;  %v7156_v34 = vpack.c.bf16 %v1660_v4, %v1657_v22  ;;  %v1664_v19 = vmax.f32 %v9651_v11, %v1598_v31 }
 0x258   :  { %v8309_v55 = vunpack.i.h.bf16 %v8307_v30  ;;  %v8308_v46 = vunpack.i.l.bf16 %v8307_v30  ;;  %v9911_v6 = vpop.permute.xlu0 %8311 }
 0x259   :  { %v8314_v1 = vunpack.i.h.bf16 %v9911_v6  ;;  %v8313_v50 = vunpack.i.l.bf16 %v9911_v6  ;;  %7157 = vmatpush1.bf16.msra.mxu1 %v7156_v34  ;;  %v8490_v6 = vld [vmem:[%s11560_s4 + $0x114] ss:$8 sps:$4 sm:$0x1f]  }
 0x25a   :  { %v1597_v42 = vsel %vm1584_vm10, %v8308_v46, %v8303_v48 }
 0x25b   :  { %v1663_v3 = vmax.f32 %v9665_v12, %v1597_v42  ;;  %v1599_v33 = vsel %vm1584_vm10, %v8309_v55, %v8313_v50  ;;  %v1600_v51 = vsel %vm1584_vm10, %v8313_v50, %v8314_v1  ;;  %v1668_v37 = vmax.f32 %v9685_v40, %v8314_v1 }
 0x25c   :  { %v1666_v20 = vmax.f32 %v9676_v9, %v1599_v33  ;;  %v9925_v7 = vpop.permute.xlu0 %8316  ;;  %v1667_v36 = vmax.f32 %v9683_v47, %v1600_v51 }
 0x25d   :  { %v8319_v16 = vunpack.i.h.bf16 %v9925_v7  ;;  %v8318_v48 = vunpack.i.l.bf16 %v9925_v7  ;;  %v9931_v14 = vpop.permute.xlu1 %8326  ;;  %v7184_v40 = vpack.c.bf16 %v1668_v37, %v1665_v5  ;;  %v8492_v7 = vld [vmem:[%s11560_s4 + $0x110] ss:$8 sps:$4 sm:$0x1f]   ;;  %v8526_v37 = vld [vmem:[%s11561_s5 + $0x20] ss:$12 sps:$4 sm:$0xff]  }
 0x25e   :  { %v7158_v12 = vpack.c.bf16 %v1667_v36, %v1664_v19  ;;  %v7160_v4 = vpack.c.bf16 %v1666_v20, %v1663_v3  ;;  %v8329_v9 = vunpack.i.h.bf16 %v9931_v14  ;;  %v8328_v30 = vunpack.i.l.bf16 %v9931_v14  ;;  %v8529_v5 = vld [vmem:[%s11561_s5 + $0xf0] ss:$12 sps:$4 sm:$0xff]  }
 0x25f   :  { %v1602_v22 = vsel %vm1584_vm10, %v8318_v48, %v8319_v16  ;;  %v1671_v63 = vmax.f32 %v9696_v0, %v8319_v16  ;;  %v1686_v0 = vld [vmem:[%s11559_s3 + $0x28] sm:$0xff] }
 0x260   :  { %v8322_v55 = vpop.permute.xlu0 %8321  ;;  %7159 = vmatprep.subr.bf16.mxu1 %v7158_v12  ;;  %v1604_v11 = vsel %vm1584_vm10, %v8328_v30, %v8329_v9  ;;  %v1670_v31 = vmax.f32 %v9692_v21, %v1602_v22 }
 0x261   :  { %v8324_v47 = vunpack.i.h.bf16 %v8322_v55  ;;  %v8323_v46 = vunpack.i.l.bf16 %v8322_v55  ;;  %7161 = vmatpush1.bf16.msra.mxu1 %v7160_v4  ;;  %v9941_v34 = vpop.permute.xlu1 %8336  ;;  %v1673_v50 = vmax.f32 %v9706_v23, %v1604_v11  ;;  %v1650_v11 = vmax.f32 %v9498_v53, %v8269_v54  ;;  %v8510_v53 = vld [vmem:[%s11561_s5 + $0x78] ss:$12 sps:$4 sm:$0xff]  }
 0x262   :  { %v8339_v33 = vunpack.i.h.bf16 %v9941_v34  ;;  %v8338_v51 = vunpack.i.l.bf16 %v9941_v34  ;;  %v1653_v54 = vmax.f32 %v9551_v60, %v8274_v18  ;;  %v1662_v60 = vmax.f32 %v9618_v8, %v8299_v45  ;;  %v1683_v18 = vld [vmem:[%s11559_s3 + $0x10] sm:$0xff] }
 0x263   :  { %v1603_v42 = vsel %vm1584_vm10, %v8324_v47, %v8328_v30  ;;  %v1601_v3 = vsel %vm1584_vm10, %v8323_v46, %v8318_v48  ;;  %v7162_v36 = vpack.c.bf16 %v1673_v50, %v1670_v31 }
 0x264   :  { %v1672_v20 = vmax.f32 %v9718_v56, %v1603_v42  ;;  %v1669_v19 = vmax.f32 %v9714_v26, %v1601_v3  ;;  %v8332_v12 = vpop.permute.xlu0 %8331  ;;  %v1606_v21 = vsel %vm1584_vm10, %v8338_v51, %v8339_v33  ;;  %v1677_v10 = vmax.f32 %v9730_v24, %v8339_v33  ;;  %v8487_v24 = vld [vmem:[%s11560_s4 + $0x104] ss:$8 sps:$4 sm:$0xff]  }
 0x265   :  { %v8334_v4 = vunpack.i.h.bf16 %v8332_v12  ;;  %v8333_v23 = vunpack.i.l.bf16 %v8332_v12  ;;  %v8342_v22 = vpop.permute.xlu1 %8341  ;;  %7163 = vmatprep.subr.bf16.mxu1 %v7162_v36  ;;  %v1676_v26 = vmax.f32 %v9728_v17, %v1606_v21  ;;  %v1647_v17 = vmax.f32 %v9481_v28, %v8259_v39  ;;  %v1681_v28 = vld [vmem:[%s11559_s3] sm:$0xff]  ;;  %7263 = vmatprep.subr.bf16.mxu0 %v8487_v24 }
 0x266   :  { %v7164_v30 = vpack.c.bf16 %v1672_v20, %v1669_v19  ;;  %v8344_v48 = vunpack.i.h.bf16 %v8342_v22  ;;  %v8343_v55 = vunpack.i.l.bf16 %v8342_v22  ;;  %v1659_v39 = vmax.f32 %v9604_v59, %v8289_v57  ;;  %v1685_v57 = vld [vmem:[%s11559_s3 + $0x20] sm:$0xff] }
 0x267   :  { %v1608_v56 = vsel %vm1584_vm10, %v8333_v23, %v8334_v4  ;;  %v1674_v59 = vmax.f32 %v9710_v62, %v8329_v9  ;;  %v1680_v29 = vmax.f32 %v9742_v35, %v8334_v4  ;;  %v8545_v24 = vld [vmem:[%s11561_s5 + $0x140] ss:$12 sps:$4 sm:$0xff]  }
 0x268   :  { %7165 = vmatpush1.bf16.msra.mxu1 %v7164_v30  ;;  %v1679_v47 = vmax.f32 %v9740_v27, %v1608_v56  ;;  %v1605_v46 = vsel %vm1584_vm10, %v8343_v55, %v8338_v51  ;;  %v1607_v31 = vsel %vm1584_vm10, %v8344_v48, %v8333_v23  ;;  %v7180_v8 = vpack.c.bf16 %v1662_v60, %v1659_v39  ;;  %v8493_v30 = vld [vmem:[%s11561_s5 + $0x4] ss:$12 sps:$4 sm:$0xff]   ;;  %v8495_v48 = vld [vmem:[%s11561_s5] ss:$12 sps:$4 sm:$0xff]   ;;  %v8496_v55 = vld [vmem:[%s11561_s5 + $0x1c] ss:$12 sps:$4 sm:$0xff]  }
 0x269   :  { %v1675_v50 = vmax.f32 %v9732_v13, %v1605_v46  ;;  %v1678_v42 = vmax.f32 %v9738_v52, %v1607_v31  ;;  %v1656_v13 = vmax.f32 %v9576_v49, %v8284_v2  ;;  %v7172_v52 = vpack.c.bf16 %v1650_v11, %v1647_v17  ;;  %v1684_v2 = vld [vmem:[%s11559_s3 + $0x18] sm:$0xff]  ;;  %v8499_v56 = vld [vmem:[%s11561_s5 + $0x34] ss:$12 sps:$4 sm:$0xff]   ;;  %v8505_v31 = vld [vmem:[%s11561_s5 + $0x64] ss:$12 sps:$4 sm:$0xff]  }
 0x26a   :  { %v7166_v27 = vpack.c.bf16 %v1679_v47, %v1676_v26  ;;  %v7188_v62 = vpack.c.bf16 %v1674_v59, %v1671_v63  ;;  %v7192_v45 = vpack.c.bf16 %v1680_v29, %v1677_v10  ;;  %v8498_v11 = vld [vmem:[%s11561_s5 + $0x18] ss:$12 sps:$4 sm:$0xff]   ;;  %v8501_v26 = vld [vmem:[%s11561_s5 + $0x30] ss:$12 sps:$4 sm:$0xff]   ;;  %v8504_v46 = vld [vmem:[%s11561_s5 + $0x48] ss:$12 sps:$4 sm:$0xff]  }
 0x26b   :  { %v7169_v25 = vpack.c.bf16 %v1678_v42, %v1675_v50  ;;  %v7176_v49 = vpack.c.bf16 %v1656_v13, %v1653_v54  ;;  %v8502_v47 = vld [vmem:[%s11561_s5 + $0x4c] ss:$12 sps:$4 sm:$0xff]   ;;  %v8508_v42 = vld [vmem:[%s11561_s5 + $0x7c] ss:$12 sps:$4 sm:$0xff]   ;;  %v8511_v17 = vld [vmem:[%s11561_s5 + $0x94] ss:$12 sps:$4 sm:$0xff]  }
 0x26c   :  { %7168 = vmatprep.subr.msk.bf16.mxu1 %vm9966_vm12, %v7166_v27  ;;  %v8507_v50 = vld [vmem:[%s11561_s5 + $0x60] ss:$12 sps:$4 sm:$0xff]   ;;  %v8513_v27 = vld [vmem:[%s11561_s5 + $0x90] ss:$12 sps:$4 sm:$0xff]   ;;  %v8516_v54 = vld [vmem:[%s11561_s5 + $0xa8] ss:$12 sps:$4 sm:$0xff]  }
 0x26d   :  { %7171 = vmatpush1.bf16.msk.msra.mxu1 %vm9966_vm12, %v7169_v25  ;;  %v8514_v25 = vld [vmem:[%s11561_s5 + $0xac] ss:$12 sps:$4 sm:$0xff]   ;;  %v8517_v13 = vld [vmem:[%s11561_s5 + $0xc4] ss:$12 sps:$4 sm:$0xff]   ;;  %v8521_v60 = vld [vmem:[%s11561_s5 + $0x8] ss:$12 sps:$4 sm:$0xff]  }
 0x26e   :  { %7173 = vmatprep.subr.bf16.mxu1 %v7172_v52  ;;  %v8525_v39 = vld [vmem:[%s11561_s5 + $0xe0] ss:$12 sps:$4 sm:$0xff]   ;;  %v8531_v59 = vld [vmem:[%s11561_s5 + $0x38] ss:$12 sps:$4 sm:$0xff]   ;;  %v8534_v63 = vld [vmem:[%s11561_s5 + $0x108] ss:$12 sps:$4 sm:$0xff]  }
 0x26f   :  { %v8536_v29 = vld [vmem:[%s11561_s5 + $0x50] ss:$12 sps:$4 sm:$0xff]   ;;  %v8539_v10 = vld [vmem:[%s11561_s5 + $0x120] ss:$12 sps:$4 sm:$0xff]   ;;  %vm2636_vm10 = vcmask 1040384  }
 0x270   :  { %5903 = vmatmul.mubr.msk.f32.vlgmr.msra.gmra.mrb[36].mxu1 %vm1687_vm13, %v1681_v28 }
 0x271   :  { %7175 = vmatpush3.bf16.msra.mxu1 %v7172_v52  ;;  %1785 = vmatprep.mubr.f32.mxu1 %v8771_v58  ;;  %v8519_v52 = vld [vmem:[%s11561_s5 + $0xc0] ss:$12 sps:$4 sm:$0xff]  }
 0x272   :  { %7177 = vmatprep.subr.bf16.mxu1 %v7176_v49 }
 0x274   :  { %5904 = vmatmul.mubr.msk.f32.gmra.mrb[38].mxu1 %vm1687_vm13, %v1682_v15 }
 0x275   :  { %7179 = vmatpush3.bf16.msra.mxu1 %v7176_v49  ;;  %1791 = vmatprep.mubr.f32.mxu1 %v8771_v58  ;;  %v8522_v49 = vld [vmem:[%s11561_s5 + $0xdc] ss:$12 sps:$4 sm:$0xff]  }
 0x276   :  { %7181 = vmatprep.subr.bf16.mxu1 %v7180_v8 }
 0x278   :  { %5905 = vmatmul.mubr.msk.f32.gmra.mrb[40].mxu1 %vm1687_vm13, %v1683_v18 }
 0x279   :  { %7183 = vmatpush3.bf16.msra.mxu1 %v7180_v8  ;;  %1797 = vmatprep.mubr.f32.mxu1 %v8771_v58  ;;  %v8527_v8 = vld [vmem:[%s11561_s5 + $0xf4] ss:$12 sps:$4 sm:$0xff]  }
 0x27a   :  { %7185 = vmatprep.subr.bf16.mxu1 %v7184_v40 }
 0x27c   :  { %5906 = vmatmul.mubr.msk.f32.gmra.mrb[42].mxu1 %vm1687_vm13, %v1684_v2 }
 0x27d   :  { %7187 = vmatpush3.bf16.msra.mxu1 %v7184_v40  ;;  %1803 = vmatprep.mubr.f32.mxu1 %v8771_v58  ;;  %v8532_v40 = vld [vmem:[%s11561_s5 + $0x10c] ss:$12 sps:$4 sm:$0xff]  }
 0x27e   :  { %7189 = vmatprep.subr.bf16.mxu1 %v7188_v62 }
 0x280   :  { %5907 = vmatmul.mubr.msk.f32.gmra.mrb[44].mxu1 %vm1687_vm13, %v1685_v57 }
 0x281   :  { %7191 = vmatpush3.bf16.msra.mxu1 %v7188_v62  ;;  %1809 = vmatprep.mubr.f32.mxu1 %v8771_v58  ;;  %v8537_v62 = vld [vmem:[%s11561_s5 + $0x124] ss:$12 sps:$4 sm:$0xff]  }
 0x282   :  { %7194 = vmatprep.subr.msk.bf16.mxu1 %vm9966_vm12, %v7192_v45 }
 0x284   :  { %5908 = vmatmul.mubr.msk.f32.gmra.mrb[46].mxu1 %vm1687_vm13, %v1686_v0 }
 0x285   :  { %7197 = vmatpush3.bf16.msk.msra.mxu1 %vm9966_vm12, %v7192_v45  ;;  %6945 = vmatprep.mubr.msk.f32.mxu1 %vm1687_vm13, %v1681_v28  ;;  %v8520_v28 = vld [vmem:[%s11561_s5 + $0xc8] ss:$12 sps:$4 sm:$0xff]   ;;  %vm2371_vm12 = vcmask 392192  }
 0x286   :  { %7273 = vmatprep.subr.bf16.mxu1 %v8493_v30  ;;  %v8541_v45 = vld [vmem:[%s11561_s5 + $0x68] ss:$12 sps:$4 sm:$0xff]  }
 0x288   :  { %6946 = vmatmul.mubr.msk.f32.vlgmr.msra.gmra.mrb[48].mxu1 %vm1687_vm13, %v1682_v15  ;;  %v8524_v15 = vld [vmem:[%s11561_s5 + $0xd8] ss:$12 sps:$4 sm:$0xff]  }
 0x289   :  { %6948 = vmatprep.mubr.msk.f32.mxu1 %vm1687_vm13, %v1683_v18  ;;  %7275 = vmatpush1.bf16.msra.mxu1 %v8495_v48  ;;  %v8530_v18 = vld [vmem:[%s11561_s5 + $0xf8] ss:$12 sps:$4 sm:$0xff]  }
 0x28a   :  { %7277 = vmatprep.subr.bf16.mxu1 %v8496_v55 }
 0x28c   :  { %6949 = vmatmul.mubr.msk.f32.gmra.mrb[50].mxu1 %vm1687_vm13, %v1684_v2  ;;  %v8535_v2 = vld [vmem:[%s11561_s5 + $0x110] ss:$12 sps:$4 sm:$0xff]  }
 0x28d   :  { %6951 = vmatprep.mubr.msk.f32.mxu1 %vm1687_vm13, %v1685_v57  ;;  %7279 = vmatpush1.bf16.msra.mxu1 %v8498_v11  ;;  %v8540_v57 = vld [vmem:[%s11561_s5 + $0x128] ss:$12 sps:$4 sm:$0xff]  }
 0x28e   :  { %7281 = vmatprep.subr.bf16.mxu1 %v8499_v56 }
 0x290   :  { %6952 = vmatmul.mubr.msk.f32.gmra.mrb[52].mxu1 %vm1687_vm13, %v1686_v0  ;;  %v8542_v0 = vld [vmem:[%s11561_s5 + $0x13c] ss:$12 sps:$4 sm:$0xff]   ;;  %vm2423_vm13 = vcmask 1047936  }
 0x291   :  { %7283 = vmatpush1.bf16.msra.mxu1 %v8501_v26 }
 0x292   :  { %7285 = vmatprep.subr.bf16.mxu1 %v8502_v47 }
 0x295   :  { %7287 = vmatpush1.bf16.msra.mxu1 %v8504_v46 }
 0x296   :  { %7289 = vmatprep.subr.bf16.mxu1 %v8505_v31 }
 0x299   :  { %7291 = vmatpush1.bf16.msra.mxu1 %v8507_v50 }
 0x29a   :  { %7293 = vmatprep.subr.bf16.mxu1 %v8508_v42 }
 0x29d   :  { %7295 = vmatpush1.bf16.msra.mxu1 %v8510_v53 }
 0x29e   :  { %7297 = vmatprep.subr.bf16.mxu1 %v8511_v17 }
 0x2a1   :  { %7299 = vmatpush1.bf16.msra.mxu1 %v8513_v27 }
 0x2a2   :  { %7301 = vmatprep.subr.bf16.mxu1 %v8514_v25 }
 0x2a5   :  { %7303 = vmatpush1.bf16.msra.mxu1 %v8516_v54  ;;  %v8557_v54 = vld [vmem:[%s11561_s5 + $0x184] ss:$12 sps:$4 sm:$0xff]  }
 0x2a6   :  { %7305 = vmatprep.subr.bf16.mxu1 %v8517_v13 }
 0x2a9   :  { %7307 = vmatpush1.bf16.msra.mxu1 %v8519_v52 }
 0x2aa   :  { %7309 = vmatprep.subr.bf16.mxu1 %v8522_v49 }
 0x2ad   :  { %7311 = vmatpush1.bf16.msra.mxu1 %v8524_v15  ;;  %v8560_v15 = vld [vmem:[%s11561_s5 + $0x248] ss:$12 sps:$4 sm:$0xff]  }
 0x2ae   :  { %7313 = vmatprep.subr.bf16.mxu1 %v8527_v8 }
 0x2b1   :  { %7315 = vmatpush1.bf16.msra.mxu1 %v8529_v5 }
 0x2b2   :  { %7317 = vmatprep.subr.bf16.mxu1 %v8532_v40 }
 0x2b5   :  { %7319 = vmatpush1.bf16.msra.mxu1 %v8534_v63 }
 0x2b6   :  { %7321 = vmatprep.subr.bf16.mxu1 %v8537_v62 }
 0x2b9   :  { %7323 = vmatpush1.bf16.msra.mxu1 %v8539_v10 }
 0x2ba   :  { %7325 = vmatprep.subr.bf16.mxu1 %v8542_v0 }
 0x343   :  { %v1781_v35 = vpop.f32.mrb[36].mxu1 }
 0x344   :  { %v1783_v61 = vpop.f32.mrb[37].mxu1 }
 0x345   :  { %2109 = vmatprep.mubr.f32.mxu0 %v1783_v61  ;;  %v8547_v61 = vld [vmem:[%s11561_s5 + $0x154] ss:$12 sps:$4 sm:$0xff]  }
 0x346   :  { %2110 = vmatmul.mubr.f32.vlgmr.msra.gmra.mrb[24].mxu0 %v1781_v35  ;;  %v8544_v35 = vld [vmem:[%s11561_s5 + $0x138] ss:$12 sps:$4 sm:$0xff]  }
 0x347   :  { %v1787_v1 = vpop.f32.mrb[38].mxu1  ;;  %7265 = vmatpush1.bf16.msra.mxu0 %v8489_v32  ;;  %v8546_v32 = vld [vmem:[%s11561_s5 + $0x80] ss:$12 sps:$4 sm:$0xff]   ;;  %7327 = vmatpush1.bf16.msra.mxu1 %v8544_v35 }
 0x348   :  { %v1789_v16 = vpop.f32.mrb[39].mxu1  ;;  %7268 = vmatprep.subr.msk.bf16.mxu0 %vm7267_vm15, %v8490_v6  ;;  %v8549_v6 = vld [vmem:[%s11561_s5 + $0x150] ss:$12 sps:$4 sm:$0xff]   ;;  %7329 = vmatprep.subr.bf16.mxu1 %v8547_v61 }
 0x349   :  { %2115 = vmatprep.mubr.f32.mxu0 %v1789_v16  ;;  %v8551_v16 = vld [vmem:[%s11561_s5 + $0x98] ss:$12 sps:$4 sm:$0xff]  }
 0x34a   :  { %2116 = vmatmul.mubr.f32.gmra.mrb[26].mxu0 %v1787_v1  ;;  %v8550_v1 = vld [vmem:[%s11561_s5 + $0x158] ss:$12 sps:$4 sm:$0xff]  }
 0x34b   :  { %v1793_v14 = vpop.f32.mrb[40].mxu1  ;;  %7271 = vmatpush1.bf16.msk.msra.mxu0 %vm7267_vm15, %v8492_v7  ;;  %7331 = vmatpush1.bf16.msra.mxu1 %v8549_v6  ;;  %vm2369_vm15 = vcmask 1047808  }
 0x34c   :  { %v1795_v9 = vpop.f32.mrb[41].mxu1  ;;  %7453 = vmatprep.subr.bf16.mxu0 %v8520_v28 }
 0x34d   :  { %2121 = vmatprep.mubr.f32.mxu0 %v1795_v9 }
 0x34e   :  { %2122 = vmatmul.mubr.f32.gmra.mrb[28].mxu0 %v1793_v14 }
 0x34f   :  { %v1799_v34 = vpop.f32.mrb[42].mxu1 }
 0x350   :  { %v1801_v3 = vpop.f32.mrb[43].mxu1 }
 0x351   :  { %2127 = vmatprep.mubr.f32.mxu0 %v1801_v3  ;;  %v8552_v3 = vld [vmem:[%s11561_s5 + $0x16c] ss:$12 sps:$4 sm:$0xff]  }
 0x352   :  { %2128 = vmatmul.mubr.f32.gmra.mrb[30].mxu0 %v1799_v34  ;;  %7333 = vmatprep.subr.bf16.mxu1 %v8552_v3 }
 0x353   :  { %v1805_v33 = vpop.f32.mrb[44].mxu1 }
 0x354   :  { %v1807_v51 = vpop.f32.mrb[45].mxu1 }
 0x355   :  { %2133 = vmatprep.mubr.f32.mxu0 %v1807_v51  ;;  %v8555_v51 = vld [vmem:[%s11561_s5 + $0x170] ss:$12 sps:$4 sm:$0xff]  }
 0x356   :  { %2134 = vmatmul.mubr.f32.gmra.mrb[32].mxu0 %v1805_v33  ;;  %v8554_v33 = vld [vmem:[%s11561_s5 + $0x168] ss:$12 sps:$4 sm:$0xff]  }
 0x357   :  { %v1811_v20 = vpop.f32.mrb[46].mxu1  ;;  %7335 = vmatpush1.bf16.msra.mxu1 %v8554_v33 }
 0x358   :  { %v1813_v19 = vpop.f32.mrb[47].mxu1  ;;  %7337 = vmatprep.subr.bf16.mxu1 %v8557_v54 }
 0x359   :  { %2139 = vmatprep.mubr.f32.mxu0 %v1813_v19  ;;  %v8556_v19 = vld [vmem:[%s11561_s5 + $0xb0] ss:$12 sps:$4 sm:$0xff]  }
 0x35a   :  { %2140 = vmatmul.mubr.f32.gmra.mrb[34].mxu0 %v1811_v20 }
 0x35b   :  { %v6947_v36 = vpop.f32.mrb[48].mxu1  ;;  %2210 = vmatprep.mubr.f32.mxu0 %v8771_v58 }
 0x35c   :  { %v1882_v12 = vpop.f32.mrb[49].mxu1 }
 0x35e   :  { %5918 = vmatmul.mubr.msk.f32.vlgmr.msra.gmra.mrb[24].mxu0 %vm2019_vm0, %v1882_v12 }
 0x35f   :  { %2216 = vmatprep.mubr.f32.mxu0 %v8771_v58  ;;  %v6950_v21 = vpop.f32.mrb[50].mxu1  ;;  %7455 = vmatpush3.bf16.msra.mxu0 %v8521_v60 }
 0x360   :  { %v1892_v4 = vpop.f32.mrb[51].mxu1  ;;  %7457 = vmatprep.subr.bf16.mxu0 %v8525_v39 }
 0x362   :  { %5919 = vmatmul.mubr.msk.f32.gmra.mrb[26].mxu0 %vm2019_vm0, %v6947_v36 }
 0x363   :  { %2222 = vmatprep.mubr.f32.mxu0 %v8771_v58  ;;  %v6953_v23 = vpop.f32.mrb[52].mxu1  ;;  %7459 = vmatpush3.bf16.msra.mxu0 %v8526_v37 }
 0x364   :  { %v1902_v22 = vpop.f32.mrb[53].mxu1  ;;  %7461 = vmatprep.subr.bf16.mxu0 %v8530_v18 }
 0x366   :  { %5920 = vmatmul.mubr.msk.f32.gmra.mrb[28].mxu0 %vm2019_vm0, %v1892_v4 }
 0x367   :  { %2228 = vmatprep.mubr.f32.mxu0 %v8771_v58  ;;  %7463 = vmatpush3.bf16.msra.mxu0 %v8531_v59 }
 0x368   :  { %7465 = vmatprep.subr.bf16.mxu0 %v8535_v2 }
 0x36a   :  { %5921 = vmatmul.mubr.msk.f32.gmra.mrb[30].mxu0 %vm2019_vm0, %v6950_v21 }
 0x36b   :  { %2234 = vmatprep.mubr.f32.mxu0 %v8771_v58  ;;  %7467 = vmatpush3.bf16.msra.mxu0 %v8536_v29 }
 0x36c   :  { %7469 = vmatprep.subr.bf16.mxu0 %v8540_v57 }
 0x36e   :  { %5922 = vmatmul.mubr.msk.f32.gmra.mrb[32].mxu0 %vm2019_vm0, %v1902_v22 }
 0x36f   :  { %2240 = vmatprep.mubr.f32.mxu0 %v8771_v58  ;;  %7471 = vmatpush3.bf16.msra.mxu0 %v8541_v45 }
 0x370   :  { %7473 = vmatprep.subr.bf16.mxu0 %v8545_v24 }
 0x372   :  { %5923 = vmatmul.mubr.msk.f32.gmra.mrb[34].mxu0 %vm2019_vm0, %v6953_v23  ;;  %vm2321_vm0 = vcmask 1043584  }
 0x373   :  { %7475 = vmatpush3.bf16.msra.mxu0 %v8546_v32 }
 0x374   :  { %7477 = vmatprep.subr.bf16.mxu0 %v8550_v1 }
 0x377   :  { %7479 = vmatpush3.bf16.msra.mxu0 %v8551_v16 }
 0x378   :  { %7481 = vmatprep.subr.bf16.mxu0 %v8555_v51 }
 0x37b   :  { %7483 = vmatpush3.bf16.msra.mxu0 %v8556_v19 }
 0x37c   :  { %7485 = vmatprep.subr.bf16.mxu0 %v8560_v15 }
 0x431   :  { %v10199_v7 = vpop.f32.mrb[24].mxu0 }
 0x432   :  { %2247 = vst [vmem:[#allocation4] sm:$0xff] %v10199_v7  ;;  %v2214_v14 = vpop.f32.mrb[25].mxu0 }
 0x433   :  { %2249 = vst.msk [vmem:[#allocation4 + $0x8] sm:$0xff] %vm2248_vm2, %v2214_v14 }
 0x435   :  { %v10206_v9 = vpop.f32.mrb[26].mxu0 }
 0x436   :  { %v2220_v34 = vpop.f32.mrb[27].mxu0  ;;  %v2393_v20 = vrot.slane %v10206_v9, 3  ;;  %v2286_v4 = vrot.slane %v10206_v9, 1  ;;  %v2446_v11 = vrot.slane %v10206_v9, 4  ;;  %v2339_v27 = vrot.slane %v10206_v9, 2 }
 0x437   :  { %2251 = vst.msk [vmem:[#allocation4 + $0x18] sm:$0xff] %vm2248_vm2, %v2220_v34 }
 0x439   :  { %v10222_v36 = vpop.f32.mrb[28].mxu0  ;;  %v2379_v12 = vld [vmem:[#allocation4] sm:$0xf8] }
 0x43a   :  { %v2273_v21 = vld [vmem:[#allocation4] sm:$0xfe]  ;;  %2252 = vst [vmem:[#allocation4 + $0x20] sm:$0xff] %v10222_v36  ;;  %v2226_v23 = vpop.f32.mrb[29].mxu0  ;;  %v2392_v22 = vrot.slane %v2379_v12, 3  ;;  %v2451_v55 = vrot.slane %v10222_v36, 4 }
 0x43b   :  { %v2285_v30 = vrot.slane %v2273_v21, 1  ;;  %v2325_v48 = vld [vmem:[#allocation4] sm:$0xfc]  ;;  %2253 = vst.msk [vmem:[#allocation4 + $0x28] sm:$0xff] %vm2248_vm2, %v2226_v23  ;;  %v2261_v56 = vld [vmem:[#allocation4 + $0x8] sm:$0xff] }
 0x43c   :  { %v2394_v26 = vsel %vm2391_vm3, %v2392_v22, %v2393_v20  ;;  %v2338_v46 = vrot.slane %v2325_v48, 2  ;;  %v2326_v31 = vld [vmem:[#allocation4 + $0x8] sm:$0xfc]  ;;  %2267 = vst.msk [vmem:[#allocation5 + $0x8] sm:$0xff] %vm2248_vm2, %v2261_v56  ;;  %v10241_v42 = vsel %vm649_vm1, %v2446_v11, %v2451_v55 }
 0x43d   :  { %v2287_v47 = vsel %vm1334_vm9, %v2285_v30, %v2286_v4  ;;  %v2230_v50 = vpop.f32.mrb[30].mxu0  ;;  %2402 = vrot.lane.b32.xlu1 %v2394_v26, %s8774_s20  ;;  %v2341_v13 = vrot.slane %v2326_v31, 2  ;;  %v2274_v28 = vld [vmem:[#allocation4 + $0x8] sm:$0xfe] }
 0x43e   :  { %2295 = vrot.lane.b32.xlu0 %v2287_v47, %s8775_s21  ;;  %2254 = vst [vmem:[#allocation4 + $0x30] sm:$0xff] %v2230_v50  ;;  %v2498_v53 = vrot.slane %v2230_v50, 4  ;;  %v2232_v17 = vpop.f32.mrb[31].mxu0  ;;  %v10244_v25 = vld [vmem:[#allocation4 + $0x18] sm:$0xff]  ;;  %v2340_v60 = vsel %vm2337_vm4, %v2338_v46, %v2339_v27  ;;  %v2288_v40 = vrot.slane %v2274_v28, 1 }
 0x43f   :  { %2255 = vst.msk [vmem:[#allocation4 + $0x38] sm:$0xff] %vm2248_vm2, %v2232_v17  ;;  %v2342_v52 = vrot.slane %v10244_v25, 2  ;;  %2269 = vst.msk [vmem:[#allocation5 + $0x38] sm:$0xff] %vm2248_vm2, %v10244_v25  ;;  %v2289_v49 = vrot.slane %v10244_v25, 1 }
 0x440   :  { %2514 = vst [vmem:[#allocation5 + $0x60] sm:$0xf0] %v2498_v53 }
 0x441   :  { %v2264_v39 = vld [vmem:[#allocation4 + $0x20] sm:$0xf]  ;;  %v10260_v37 = vpop.f32.mrb[32].mxu0  ;;  %v2343_v8 = vsel %vm2337_vm4, %v2341_v13, %v2342_v52  ;;  %v2290_v63 = vsel %vm1334_vm9, %v2288_v40, %v2289_v49  ;;  %v2433_v40 = vld [vmem:[#allocation4] sm:$0xf0] }
 0x442   :  { %2348 = vrot.lane.b32.xlu0 %v2340_v60, %s8776_s26  ;;  %v2277_v18 = vld [vmem:[#allocation4 + $0x20] sm:$0x1f]  ;;  %2270 = vst [vmem:[#allocation5 + $0x60] sm:$0xf] %v2264_v39  ;;  %v2500_v5 = vrot.slane %v10260_v37, 4  ;;  %v2238_v59 = vpop.f32.mrb[33].mxu0  ;;  %2350 = vrot.lane.b32.xlu1 %v2343_v8, %s8776_s26 }
 0x443   :  { %v2291_v2 = vrot.slane %v2277_v18, 1  ;;  %2257 = vst.msk [vmem:[#allocation4 + $0x48] sm:$0xff] %vm2248_vm2, %v2238_v59  ;;  %v2330_v0 = vld [vmem:[#allocation4 + $0x28] sm:$0x3f]  ;;  %v2329_v61 = vld [vmem:[#allocation4 + $0x20] sm:$0x3f] }
 0x444   :  { %v10275_v10 = vsel %vm649_vm1, %v2498_v53, %v2500_v5  ;;  %v2346_v32 = vrot.slane %v2330_v0, 2  ;;  %v2536_v6 = vrot.slane %v10260_v37, 5  ;;  %v2265_v16 = vld [vmem:[#allocation4 + $0x28] sm:$0xf]  ;;  %v2344_v3 = vrot.slane %v2329_v61, 2 }
 0x445   :  { %v2292_v29 = vsel %vm1334_vm9, %v2286_v4, %v2291_v2  ;;  %v10271_v62 = vpop.f32.mrb[34].mxu0  ;;  %v2521_v57 = vld [vmem:[#allocation4 + $0x30] sm:$0xfe]  ;;  %2272 = vst.msk [vmem:[#allocation5 + $0x68] sm:$0xf] %vm2271_vm5, %v2265_v16  ;;  %v2587_v8 = vrot.slane %v10260_v37, 6 }
 0x446   :  { %2297 = vrot.lane.b32.xlu0 %v2290_v63, %s8775_s21  ;;  %2258 = vst [vmem:[#allocation4 + $0x50] sm:$0xff] %v10271_v62  ;;  %v2244_v45 = vpop.f32.mrb[35].mxu0  ;;  %2299 = vrot.lane.b32.xlu1 %v2292_v29, %s8775_s21  ;;  %v2487_v24 = vld [vmem:[#allocation4 + $0x38] sm:$0xff]  ;;  %v2534_v35 = vrot.slane %v2521_v57, 5  ;;  %v2347_v19 = vsel %vm2337_vm4, %v2342_v52, %v2346_v32  ;;  %v2278_v21 = vld [vmem:[#allocation4 + $0x28] sm:$0x1f]  ;;  %v2345_v48 = vsel %vm2337_vm4, %v2339_v27, %v2344_v3 }
 0x447   :  { %2259 = vst.msk [vmem:[#allocation4 + $0x58] sm:$0xff] %vm2248_vm2, %v2244_v45  ;;  %v2499_v14 = vrot.slane %v2487_v24, 4  ;;  %v2383_v22 = vld [vmem:[#allocation4 + $0x20] sm:$0x7f]  ;;  %v2293_v26 = vrot.slane %v2278_v21, 1  ;;  %v2396_v57 = vrot.slane %v10244_v25, 3 }
 0x448   :  { %v2537_v34 = vsel %vm2533_vm6, %v2534_v35, %v2536_v6  ;;  %v2398_v47 = vrot.slane %v2383_v22, 3  ;;  %v2573_v54 = vld [vmem:[#allocation4 + $0x30] sm:$0xfc]  ;;  %v2574_v13 = vld [vmem:[#allocation4 + $0x38] sm:$0xfc]  ;;  %v2445_v0 = vrot.slane %v2433_v40, 4 }
 0x449   :  { %2516 = vst.msk [vmem:[#allocation5 + $0x68] sm:$0xf0] %vm2515_vm7, %v2499_v14  ;;  %v2294_v53 = vsel %vm1334_vm9, %v2289_v49, %v2293_v26  ;;  %v2585_v52 = vrot.slane %v2573_v54, 6  ;;  %v2586_v28 = vrot.slane %v2574_v13, 6  ;;  %v2522_v60 = vld [vmem:[#allocation4 + $0x38] sm:$0xfe] }
 0x44a   :  { %2303 = vrot.lane.b32.xlu0 %v2291_v2, %s8775_s21  ;;  %2544 = vrot.lane.b32.xlu1 %v2534_v35, %s8775_s21  ;;  %v10283_v1 = vld [vmem:[#allocation4 + $0x48] sm:$0xff]  ;;  %v2399_v17 = vsel %vm2391_vm3, %v2393_v20, %v2398_v47  ;;  %v2535_v20 = vrot.slane %v2522_v60, 5  ;;  %v2624_v49 = vld [vmem:[#allocation4 + $0x30] sm:$0xf8]  ;;  %v2639_v2 = vrot.slane %v10260_v37, 7  ;;  %v2447_v16 = vsel %vm649_vm1, %v2445_v0, %v2446_v11 }
 0x44b   :  { %v2502_v33 = vrot.slane %v10283_v1, 4  ;;  %v2637_v15 = vrot.slane %v2624_v49, 7  ;;  %v2589_v39 = vrot.slane %v10283_v1, 6  ;;  %v2588_v18 = vsel %vm2038_vm14, %v2585_v52, %v2587_v8  ;;  %v2380_v63 = vld [vmem:[#allocation4 + $0x8] sm:$0xf8] }
 0x44c   :  { %v2395_v24 = vrot.slane %v2380_v63, 3  ;;  %v2384_v35 = vld [vmem:[#allocation4 + $0x28] sm:$0x7f]  ;;  %v8564_v40 = vld [vmem:[%s11561_s5 + $0x198] ss:$12 sps:$4 sm:$0xff]   ;;  %vm2377_vm4 = vcmask 388096  }
 0x44d   :  { %v2490_v51 = vld [vmem:[#allocation4 + $0x50] sm:$0xf]  ;;  %v2503_v30 = vsel %vm649_vm1, %v2499_v14, %v2502_v33  ;;  %v2590_v59 = vsel %vm2038_vm14, %v2586_v28, %v2589_v39  ;;  %v2640_v45 = vsel %vm2636_vm10, %v2637_v15, %v2639_v2  ;;  %v2400_v14 = vrot.slane %v2384_v35, 3  ;;  %v8561_v49 = vld [vmem:[%s11561_s5 + $0x188] ss:$12 sps:$4 sm:$0xff]  }
 0x44e   :  { %2548 = vrot.lane.b32.xlu0 %v2537_v34, %s8775_s21  ;;  %v2525_v12 = vld [vmem:[#allocation4 + $0x50] sm:$0x1f]  ;;  %v2504_v4 = vrot.slane %v2490_v51, 4  ;;  %2354 = vrot.lane.b32.xlu1 %v2347_v19, %s8776_s26  ;;  %2518 = vst.msk [vmem:[#allocation5 + $0x98] sm:$0xff] %vm2248_vm2, %v2503_v30  ;;  %v2491_v31 = vld [vmem:[#allocation4 + $0x58] sm:$0xf]  ;;  %v2397_v61 = vsel %vm2391_vm3, %v2395_v24, %v2396_v57 }
 0x44f   :  { %v2540_v23 = vrot.slane %v2525_v12, 5  ;;  %v2506_v50 = vrot.slane %v2491_v31, 4  ;;  %v2401_v51 = vsel %vm2391_vm3, %v2396_v57, %v2400_v14  ;;  %v2577_v21 = vld [vmem:[#allocation4 + $0x50] sm:$0x3f]  ;;  %v2625_v31 = vld [vmem:[#allocation4 + $0x38] sm:$0xf8] }
 0x450   :  { %v10298_v46 = vsel %vm649_vm1, %v2500_v5, %v2504_v4  ;;  %v2538_v5 = vrot.slane %v10283_v1, 5  ;;  %v2578_v4 = vld [vmem:[#allocation4 + $0x58] sm:$0x3f]  ;;  %vm2565_vm3 = vcmask 1047684   ;;  %vm2618_vm5 = vcmask 392196  }
 0x451   :  { %v2541_v56 = vsel %vm2533_vm6, %v2536_v6, %v2540_v23  ;;  %v2507_v27 = vsel %vm649_vm1, %v2502_v33, %v2506_v50  ;;  %v2449_v6 = vrot.slane %v10244_v25, 4  ;;  %v2628_v25 = vld [vmem:[#allocation4 + $0x50] sm:$0x7f]  ;;  %v2591_v23 = vrot.slane %v2577_v21, 6  ;;  %v2629_v54 = vld [vmem:[#allocation4 + $0x58] sm:$0x7f] }
 0x452   :  { %2352 = vrot.lane.b32.xlu0 %v2345_v48, %s8776_s26  ;;  %2552 = vrot.lane.b32.xlu1 %v2541_v56, %s8775_s21  ;;  %2520 = vst.msk [vmem:[#allocation5 + $0xc8] sm:$0xff] %vm2248_vm2, %v2507_v27  ;;  %v2539_v29 = vsel %vm2533_vm6, %v2535_v20, %v2538_v5  ;;  %v2643_v12 = vrot.slane %v2628_v25, 7  ;;  %v2593_v30 = vrot.slane %v2578_v4, 6  ;;  %v2526_v48 = vld [vmem:[#allocation4 + $0x58] sm:$0x1f]  ;;  %v2638_v50 = vrot.slane %v2625_v31, 7 }
 0x453   :  { %v2592_v56 = vsel %vm2038_vm14, %v2587_v8, %v2591_v23  ;;  %v2677_v27 = vld [vmem:[#allocation4 + $0x38] sm:$0xf0]  ;;  %v2645_v36 = vrot.slane %v2629_v54, 7  ;;  %v8571_v24 = vld [vmem:[%s11561_s5 + $0x1b8] ss:$12 sps:$4 sm:$0xff]   ;;  %vm2375_vm7 = vcmask 1043712  }
 0x454   :  { %v2644_v22 = vsel %vm2636_vm10, %v2639_v2, %v2643_v12  ;;  %v8562_v8 = vld [vmem:[%s11561_s5 + $0x19c] ss:$12 sps:$4 sm:$0xff]   ;;  %v8566_v2 = vld [vmem:[%s11561_s5 + $0x1a0] ss:$12 sps:$4 sm:$0xff]  }
 0x455   :  { %v8569_v0 = vld [vmem:[%s11561_s5 + $0x1b0] ss:$12 sps:$4 sm:$0xff]   ;;  %v8580_v25 = vld [vmem:[%s11561_s5 + $0x2a8] ss:$12 sps:$4 sm:$0xff]   ;;  %v8579_v21 = vld [vmem:[%s11561_s5 + $0x1e0] ss:$12 sps:$4 sm:$0xff]  }
 0x456   :  { %2301 = vrot.lane.b32.xlu0 %v2294_v53, %s8775_s21  ;;  %2406 = vrot.lane.b32.xlu1 %v2399_v17, %s8774_s20  ;;  %v2676_v53 = vld [vmem:[#allocation4 + $0x30] sm:$0xf0]  ;;  %v2641_v17 = vrot.slane %v10283_v1, 7  ;;  %v8589_v54 = vld [vmem:[%s11561_s5 + $0x210] ss:$12 sps:$4 sm:$0xff]  }
 0x457   :  { %v8581_v4 = vld [vmem:[%s11561_s5 + $0x1e8] ss:$12 sps:$4 sm:$0xff]  }
 0x458   :  { %v2642_v13 = vsel %vm2636_vm10, %v2638_v50, %v2641_v17 }
 0x45a   :  { %2356 = vrot.lane.b32.xlu0 %v2344_v3, %s8776_s26  ;;  %2358 = vrot.lane.b32.xlu1 %v2346_v32, %s8776_s26  ;;  %v2434_v32 = vld [vmem:[#allocation4 + $0x8] sm:$0xf0] }
 0x45b   :  { %v2448_v34 = vrot.slane %v2434_v32, 4  ;;  %v2438_v3 = vld [vmem:[#allocation4 + $0x28] sm:$0xff] }
 0x45c   :  { %v2453_v19 = vrot.slane %v2438_v3, 4 }
 0x45d   :  { %v2450_v33 = vsel %vm649_vm1, %v2448_v34, %v2449_v6  ;;  %v8576_v34 = vld [vmem:[%s11561_s5 + $0x1d0] ss:$12 sps:$4 sm:$0xff]  }
 0x45e   :  { %2595 = vrot.lane.b32.xlu0 %v2585_v52, %s8776_s26  ;;  %2597 = vrot.lane.b32.xlu1 %v2586_v28, %s8776_s26  ;;  %v2454_v11 = vsel %vm649_vm1, %v2449_v6, %v2453_v19  ;;  %v2681_v52 = vld [vmem:[#allocation4 + $0x58] sm:$0xff] }
 0x45f   :  { %v8575_v6 = vld [vmem:[%s11561_s5 + $0x290] ss:$12 sps:$4 sm:$0xff]  }
 0x462   :  { %2305 = vrot.lane.b32.xlu0 %v2293_v26, %s8775_s21  ;;  %2546 = vrot.lane.b32.xlu1 %v2535_v20, %s8775_s21  ;;  %v2542_v26 = vrot.slane %v2526_v48, 5  ;;  %v8585_v48 = vld [vmem:[%s11561_s5 + $0x2c0] ss:$12 sps:$4 sm:$0xff]  }
 0x466   :  { %2410 = vrot.lane.b32.xlu0 %v2398_v47, %s8774_s20  ;;  %2647 = vrot.lane.b32.xlu1 %v2637_v15, %s8774_s20  ;;  %v2543_v47 = vsel %vm2533_vm6, %v2538_v5, %v2542_v26  ;;  %v8584_v26 = vld [vmem:[%s11561_s5 + $0x1f8] ss:$12 sps:$4 sm:$0xff]   ;;  %vm2323_vm6 = vcmask 257024  }
 0x46a   :  { %2599 = vrot.lane.b32.xlu0 %v2588_v18, %s8776_s26  ;;  %2601 = vrot.lane.b32.xlu1 %v2590_v59, %s8776_s26  ;;  %v8565_v18 = vld [vmem:[%s11561_s5 + $0x260] ss:$12 sps:$4 sm:$0xff]  }
 0x46e   :  { %2550 = vrot.lane.b32.xlu0 %v2539_v29, %s8775_s21  ;;  %2651 = vrot.lane.b32.xlu1 %v2640_v45, %s8774_s20  ;;  %v8570_v29 = vld [vmem:[%s11561_s5 + $0x278] ss:$12 sps:$4 sm:$0xff]  }
 0x472   :  { %2404 = vrot.lane.b32.xlu0 %v2397_v61, %s8774_s20  ;;  %2455 = vrot.lane.b32.xlu1 %v2447_v16, %s8777_s27  ;;  %v8572_v61 = vld [vmem:[%s11561_s5 + $0x1cc] ss:$12 sps:$4 sm:$0xff]  }
 0x476   :  { %2457 = vrot.lane.b32.xlu0 %v2450_v33, %s8777_s27  ;;  %2408 = vrot.lane.b32.xlu1 %v2401_v51, %s8774_s20 }
 0x47a   :  { %2459 = vrot.lane.b32.xlu0 %v10241_v42, %s8777_s27  ;;  %2461 = vrot.lane.b32.xlu1 %v2454_v11, %s8777_s27  ;;  %v2594_v42 = vsel %vm2038_vm14, %v2589_v39, %v2593_v30  ;;  %v8582_v30 = vld [vmem:[%s11561_s5 + $0x1fc] ss:$12 sps:$4 sm:$0xff]  }
 0x47e   :  { %2412 = vrot.lane.b32.xlu0 %v2400_v14, %s8774_s20  ;;  %2655 = vrot.lane.b32.xlu1 %v2644_v22, %s8774_s20  ;;  %v8574_v14 = vld [vmem:[%s11561_s5 + $0x1c8] ss:$12 sps:$4 sm:$0xff]  }
 0x482   :  { %2603 = vrot.lane.b32.xlu0 %v2592_v56, %s8776_s26  ;;  %2605 = vrot.lane.b32.xlu1 %v2594_v42, %s8776_s26  ;;  %v8586_v42 = vld [vmem:[%s11561_s5 + $0x200] ss:$12 sps:$4 sm:$0xff]  }
 0x486   :  { %2554 = vrot.lane.b32.xlu0 %v2543_v47, %s8775_s21  ;;  %2463 = vrot.lane.b32.xlu1 %v2451_v55, %s8777_s27  ;;  %v2646_v55 = vsel %vm2636_vm10, %v2641_v17, %v2645_v36  ;;  %vm2567_vm10 = vcmask 261124  }
 0x48a   :  { %2465 = vrot.lane.b32.xlu0 %v2453_v19, %s8777_s27  ;;  %2649 = vrot.lane.b32.xlu1 %v2638_v50, %s8774_s20  ;;  %v2729_v19 = vld [vmem:[#allocation5 + $0x60] sm:$0xff] }
 0x48e   :  { %2688 = vrot.lane.b32.xlu0 %v2676_v53, %s8777_s27  ;;  %2690 = vrot.lane.b32.xlu1 %v2677_v27, %s8777_s27  ;;  %v8590_v53 = vld [vmem:[%s11561_s5 + $0x2d8] ss:$12 sps:$4 sm:$0xff]  }
 0x492   :  { %2653 = vrot.lane.b32.xlu0 %v2642_v13, %s8774_s20  ;;  %2692 = vrot.lane.b32.xlu1 %v10260_v37, %s8777_s27  ;;  %v8591_v13 = vld [vmem:[%s11561_s5 + $0x218] ss:$12 sps:$4 sm:$0xff]  }
 0x496   :  { %2694 = vrot.lane.b32.xlu0 %v10283_v1, %s8777_s27  ;;  %2657 = vrot.lane.b32.xlu1 %v2646_v55, %s8774_s20  ;;  %v8595_v55 = vld [vmem:[%s11561_s5 + $0x2f0] ss:$12 sps:$4 sm:$0xff]  }
 0x49a   :  { %2696 = vrot.lane.b32.xlu0 %v10271_v62, %s8777_s27  ;;  %2698 = vrot.lane.b32.xlu1 %v2681_v52, %s8777_s27  ;;  %v8559_v62 = vld [vmem:[%s11561_s5 + $0x180] ss:$12 sps:$4 sm:$0xff]  }
 0x4af   :  { %v10375_v28 = vpop.permute.xlu1 %2402 }
 0x4b0   :  { %v2296_v60 = vpop.permute.xlu0 %2295 }
 0x4b1   :  { %2317 = vst.msk [vmem:[#allocation5 + $0x8] sm:$0xff] %vm2316_vm11, %v2296_v60 }
 0x4b4   :  { %v2349_v37 = vpop.permute.xlu0 %2348  ;;  %v2351_v20 = vpop.permute.xlu1 %2350 }
 0x4b5   :  { %v2360_v1 = vsel %vm1221_vm8, %v2349_v37, %v2351_v20  ;;  %v8596_v20 = vld [vmem:[%s11561_s5 + $0x230] ss:$12 sps:$4 sm:$0xff]  }
 0x4b6   :  { %2372 = vst.msk [vmem:[#allocation5 + $0x18] sm:$0xff] %vm2371_vm12, %v2360_v1 }
 0x4b7   :  { %2424 = vst.msk [vmem:[#allocation5 + $0x18] sm:$0xff] %vm2423_vm13, %v10375_v28 }
 0x4b8   :  { %v2298_v15 = vpop.permute.xlu0 %2297  ;;  %v2718_v39 = vld [vmem:[#allocation5 + $0x8] sm:$0xff]  ;;  %v10395_v59 = vpop.permute.xlu1 %2299 }
 0x4b9   :  { %v2307_v5 = vsel %vm2248_vm2, %v2296_v60, %v2298_v15  ;;  %3293 = vmatprep.mubr.f32.mxu1 %v2718_v39  ;;  %3578 = vmatprep.mubr.f32.mxu0 %v2718_v39  ;;  %2319 = vst.msk [vmem:[#allocation5 + $0x38] sm:$0xff] %vm2316_vm11, %v10395_v59 }
 0x4ba   :  { %2318 = vst.msk [vmem:[#allocation5 + $0x10] sm:$0xff] %vm1221_vm8, %v2307_v5  ;;  %3294 = vmatmul.mubr.f32.vlgmr.msra.gmra.mrb[54].mxu1 %v10199_v7  ;;  %3579 = vmatmul.mubr.f32.vlgmr.msra.gmra.mrb[36].mxu0 %v10199_v7  ;;  %v8567_v7 = vld [vmem:[%s11561_s5 + $0x1b4] ss:$12 sps:$4 sm:$0xff]   ;;  %v8778_v5 = vmov 0.0|0.0  }
 0x4bb   :  { %2370 = vst.msk [vmem:[#allocation5 + $0x10] sm:$0xff] %vm2369_vm15, %v2349_v37  ;;  %7339 = vmatpush1.bf16.msra.mxu1 %v8559_v62  ;;  %7487 = vmatpush3.bf16.msra.mxu0 %v8561_v49  ;;  %v8594_v37 = vld [vmem:[%s11561_s5 + $0x228] ss:$12 sps:$4 sm:$0xff]   ;;  %v8597_v49 = vld [vmem:[%s11561_s5 + $0x244] ss:$12 sps:$4 sm:$0xff]  }
 0x4bc   :  { %v10409_v63 = vpop.permute.xlu0 %2303  ;;  %7341 = vmatprep.subr.bf16.mxu1 %v8562_v8  ;;  %7489 = vmatprep.subr.bf16.mxu0 %v8565_v18  ;;  %v10418_v57 = vpop.permute.xlu1 %2544  ;;  %v8599_v8 = vld [vmem:[%s11561_s5 + $0x240] ss:$12 sps:$4 sm:$0xff]  }
 0x4bd   :  { %2322 = vst.msk [vmem:[#allocation5 + $0x68] sm:$0xf] %vm2321_vm0, %v10409_v63  ;;  %vm2429_vm0 = vcmask 1043840  }
 0x4be   :  { %2566 = vst.msk [vmem:[#allocation5 + $0x68] sm:$0xf0] %vm2565_vm3, %v10418_v57  ;;  %v2720_v17 = vld [vmem:[#allocation5 + $0x18] sm:$0xff]  ;;  %vm2668_vm3 = vcmask 1047940  }
 0x4bf   :  { %7343 = vmatpush1.bf16.msra.mxu1 %v8564_v40  ;;  %7491 = vmatpush3.bf16.msra.mxu0 %v8566_v2  ;;  %v8601_v40 = vld [vmem:[%s11561_s5 + $0x25c] ss:$12 sps:$4 sm:$0xff]  }
 0x4c0   :  { %v10421_v45 = vpop.permute.xlu0 %2548  ;;  %7345 = vmatprep.subr.bf16.mxu1 %v8567_v7  ;;  %7493 = vmatprep.subr.bf16.mxu0 %v8570_v29  ;;  %v2355_v35 = vpop.permute.xlu1 %2354  ;;  %v2724_v32 = vld [vmem:[#allocation5 + $0x38] sm:$0xff] }
 0x4c1   :  { %2569 = vst.msk [vmem:[#allocation5 + $0x98] sm:$0xff] %vm2316_vm11, %v10421_v45  ;;  %3299 = vmatprep.mubr.f32.mxu1 %v2724_v32  ;;  %3583 = vmatprep.mubr.f32.mxu0 %v2724_v32  ;;  %v8603_v29 = vld [vmem:[%s11561_s5 + $0x258] ss:$12 sps:$4 sm:$0xff]  }
 0x4c2   :  { %3300 = vmatmul.mubr.f32.gmra.mrb[56].mxu1 %v10206_v9  ;;  %3584 = vmatmul.mubr.f32.gmra.mrb[38].mxu0 %v10206_v9  ;;  %v8577_v9 = vld [vmem:[%s11561_s5 + $0x1e4] ss:$12 sps:$4 sm:$0xff]  }
 0x4c3   :  { %7347 = vmatpush1.bf16.msra.mxu1 %v8569_v0  ;;  %7495 = vmatpush3.bf16.msra.mxu0 %v8571_v24  ;;  %v10537_v2 = vld [vmem:[#allocation5 + $0x10] sm:$0xff]  ;;  %v8604_v0 = vld [vmem:[%s11561_s5 + $0x320] ss:$12 sps:$4 sm:$0xff]  }
 0x4c4   :  { %v2353_v16 = vpop.permute.xlu0 %2352  ;;  %v10446_v33 = vpop.permute.xlu1 %2552  ;;  %7349 = vmatprep.subr.bf16.mxu1 %v8572_v61  ;;  %7497 = vmatprep.subr.bf16.mxu0 %v8575_v6  ;;  %v8605_v24 = vld [vmem:[%s11561_s5 + $0x274] ss:$12 sps:$4 sm:$0xff]   ;;  %v8607_v6 = vld [vmem:[%s11561_s5 + $0x270] ss:$12 sps:$4 sm:$0xff]  }
 0x4c5   :  { %v2361_v3 = vsel %vm1221_vm8, %v2353_v16, %v2355_v35  ;;  %v2730_v51 = vld [vmem:[#allocation5 + $0x68] sm:$0xff]  ;;  %2571 = vst.msk [vmem:[#allocation5 + $0xc8] sm:$0xff] %vm2316_vm11, %v10446_v33  ;;  %vm2616_vm11 = vcmask 1047812  }
 0x4c6   :  { %2374 = vst.msk [vmem:[#allocation5 + $0x48] sm:$0xff] %vm2371_vm12, %v2361_v3  ;;  %3305 = vmatprep.mubr.f32.mxu1 %v2730_v51  ;;  %3588 = vmatprep.mubr.f32.mxu0 %v2730_v51  ;;  %v8608_v3 = vld [vmem:[%s11561_s5 + $0x338] ss:$12 sps:$4 sm:$0xff]  }
 0x4c7   :  { %3306 = vmatmul.mubr.f32.gmra.mrb[58].mxu1 %v2729_v19  ;;  %3589 = vmatmul.mubr.f32.gmra.mrb[40].mxu0 %v2729_v19  ;;  %v8609_v51 = vld [vmem:[%s11561_s5 + $0x28c] ss:$12 sps:$4 sm:$0xff]   ;;  %v8611_v19 = vld [vmem:[%s11561_s5 + $0x288] ss:$12 sps:$4 sm:$0xff]  }
 0x4c8   :  { %7351 = vmatpush1.bf16.msra.mxu1 %v8574_v14  ;;  %7499 = vmatpush3.bf16.msra.mxu0 %v8576_v34  ;;  %v2302_v11 = vpop.permute.xlu0 %2301  ;;  %v2736_v12 = vld [vmem:[#allocation5 + $0x98] sm:$0xff]  ;;  %v10465_v22 = vpop.permute.xlu1 %2406 }
 0x4c9   :  { %v2308_v23 = vsel %vm2248_vm2, %v10395_v59, %v2302_v11  ;;  %3311 = vmatprep.mubr.f32.mxu1 %v2736_v12  ;;  %7353 = vmatprep.subr.bf16.mxu1 %v8577_v9  ;;  %2427 = vst.msk [vmem:[#allocation5 + $0x48] sm:$0xff] %vm2423_vm13, %v10465_v22  ;;  %v8600_v59 = vld [vmem:[%s11561_s5 + $0x308] ss:$12 sps:$4 sm:$0xff]  }
 0x4ca   :  { %2320 = vst.msk [vmem:[#allocation5 + $0x40] sm:$0xff] %vm1221_vm8, %v2308_v23  ;;  %3593 = vmatprep.mubr.f32.mxu0 %v2736_v12  ;;  %7501 = vmatprep.subr.bf16.mxu0 %v8580_v25  ;;  %v8612_v12 = vld [vmem:[%s11561_s5 + $0x350] ss:$12 sps:$4 sm:$0xff]  }
 0x4cb   :  { %2373 = vst.msk [vmem:[#allocation5 + $0x40] sm:$0xff] %vm2369_vm15, %v2353_v16  ;;  %3312 = vmatmul.mubr.f32.gmra.mrb[60].mxu1 %v10275_v10  ;;  %3594 = vmatmul.mubr.f32.gmra.mrb[42].mxu0 %v10275_v10  ;;  %v8587_v10 = vld [vmem:[%s11561_s5 + $0x214] ss:$12 sps:$4 sm:$0xff]  }
 0x4cc   :  { %7355 = vmatpush1.bf16.msra.mxu1 %v8579_v21  ;;  %7503 = vmatpush3.bf16.msra.mxu0 %v8581_v4  ;;  %v2357_v56 = vpop.permute.xlu0 %2356  ;;  %v2359_v47 = vpop.permute.xlu1 %2358  ;;  %v2742_v31 = vld [vmem:[#allocation5 + $0xc8] sm:$0xff]  ;;  %v8613_v21 = vld [vmem:[%s11561_s5 + $0x2a4] ss:$12 sps:$4 sm:$0xff]  }
 0x4cd   :  { %7357 = vmatprep.subr.bf16.mxu1 %v8582_v30  ;;  %7505 = vmatprep.subr.bf16.mxu0 %v8585_v48  ;;  %v2362_v50 = vsel %vm1221_vm8, %v2357_v56, %v2359_v47 }
 0x4ce   :  { %3317 = vmatprep.mubr.f32.mxu1 %v2742_v31  ;;  %3598 = vmatprep.mubr.f32.mxu0 %v2742_v31  ;;  %2378 = vst.msk [vmem:[#allocation5 + $0x78] sm:$0xf] %vm2377_vm4, %v2362_v50  ;;  %vm2425_vm4 = vcmask 523264   ;;  %v8619_v50 = vld [vmem:[%s11561_s5 + $0x2b8] ss:$12 sps:$4 sm:$0xff]  }
 0x4cf   :  { %3318 = vmatmul.mubr.f32.gmra.mrb[62].mxu1 %v10298_v46  ;;  %3599 = vmatmul.mubr.f32.gmra.mrb[44].mxu0 %v10298_v46  ;;  %v8592_v46 = vld [vmem:[%s11561_s5 + $0x22c] ss:$12 sps:$4 sm:$0xff]  }
 0x4d0   :  { %7359 = vmatpush1.bf16.msra.mxu1 %v8584_v26  ;;  %7507 = vmatpush3.bf16.msra.mxu0 %v8586_v42  ;;  %v2596_v27 = vpop.permute.xlu0 %2595  ;;  %v2598_v36 = vpop.permute.xlu1 %2597  ;;  %v8617_v26 = vld [vmem:[%s11561_s5 + $0x2bc] ss:$12 sps:$4 sm:$0xff]  }
 0x4d1   :  { %3388 = vmatprep.mubr.f32.mxu1 %v2720_v17  ;;  %3668 = vmatprep.mubr.f32.mxu0 %v2720_v17  ;;  %v2607_v52 = vsel %vm1221_vm8, %v2596_v27, %v2598_v36 }
 0x4d2   :  { %7361 = vmatprep.subr.bf16.mxu1 %v8587_v10  ;;  %7509 = vmatprep.subr.bf16.mxu0 %v8590_v53  ;;  %2619 = vst.msk [vmem:[#allocation5 + $0x78] sm:$0xf0] %vm2618_vm5, %v2607_v52  ;;  %v10553_v32 = vld [vmem:[#allocation5 + $0x40] sm:$0xff]  ;;  %vm2476_vm5 = vcmask 1048064  }
 0x4d3   :  { %v8620_v10 = vld [vmem:[%s11561_s5 + $0x380] ss:$12 sps:$4 sm:$0xff]  }
 0x4d4   :  { %7363 = vmatpush1.bf16.msra.mxu1 %v8589_v54  ;;  %7511 = vmatpush3.bf16.msra.mxu0 %v8591_v13  ;;  %v2306_v60 = vpop.permute.xlu0 %2305  ;;  %v2547_v62 = vpop.permute.xlu1 %2546  ;;  %v8621_v53 = vld [vmem:[%s11561_s5 + $0x2d4] ss:$12 sps:$4 sm:$0xff]   ;;  %v8623_v54 = vld [vmem:[%s11561_s5 + $0x2d0] ss:$12 sps:$4 sm:$0xff]  }
 0x4d5   :  { %v2309_v1 = vsel %vm2248_vm2, %v10409_v63, %v2306_v60  ;;  %7365 = vmatprep.subr.bf16.mxu1 %v8592_v46  ;;  %7513 = vmatprep.subr.bf16.mxu0 %v8595_v55  ;;  %v2556_v15 = vsel %vm2248_vm2, %v10418_v57, %v2547_v62  ;;  %v10540_v63 = vld [vmem:[#allocation5 + $0x48] sm:$0xff]  ;;  %v8624_v46 = vld [vmem:[%s11561_s5 + $0x398] ss:$12 sps:$4 sm:$0xff]  }
 0x4d6   :  { %2324 = vst.msk [vmem:[#allocation5 + $0x70] sm:$0xf] %vm2323_vm6, %v2309_v1  ;;  %v8625_v55 = vld [vmem:[%s11561_s5 + $0x2ec] ss:$12 sps:$4 sm:$0xff]   ;;  %v8627_v60 = vld [vmem:[%s11561_s5 + $0x2e8] ss:$12 sps:$4 sm:$0xff]  }
 0x4d7   :  { %2376 = vst.msk [vmem:[#allocation5 + $0x70] sm:$0xf] %vm2375_vm7, %v2357_v56  ;;  %vm2478_vm7 = vcmask 654336   ;;  %v8616_v56 = vld [vmem:[%s11561_s5 + $0x368] ss:$12 sps:$4 sm:$0xff]  }
 0x4d8   :  { %2568 = vst.msk [vmem:[#allocation5 + $0x70] sm:$0xf0] %vm2567_vm10, %v2556_v15  ;;  %7367 = vmatpush1.bf16.msra.mxu1 %v8594_v37  ;;  %7515 = vmatpush3.bf16.msra.mxu0 %v8596_v20  ;;  %v10521_v39 = vpop.permute.xlu0 %2410  ;;  %v10527_v18 = vpop.permute.xlu1 %2647  ;;  %vm2431_vm10 = vcmask 519168   ;;  %v8628_v20 = vld [vmem:[%s11561_s5 + $0x3b0] ss:$12 sps:$4 sm:$0xff]  }
 0x4d9   :  { %2617 = vst.msk [vmem:[#allocation5 + $0x70] sm:$0xf0] %vm2616_vm11, %v2596_v27  ;;  %7369 = vmatprep.subr.bf16.mxu1 %v8597_v49  ;;  %7516 = vmatprep.subr.bf16.mxu0 %v8778_v5  ;;  %v8629_v1 = vld [vmem:[%s11561_s5 + $0x304] ss:$12 sps:$4 sm:$0xff]   ;;  %vm2482_vm11 = vcmask 1043968  }
 0x4da   :  { %2430 = vst.msk [vmem:[#allocation5 + $0x78] sm:$0xf] %vm2429_vm0, %v10521_v39  ;;  %v8631_v15 = vld [vmem:[%s11561_s5 + $0x300] ss:$12 sps:$4 sm:$0xff]   ;;  %vm2711_vm0 = vcmask 654340  }
 0x4db   :  { %2669 = vst.msk [vmem:[#allocation5 + $0x78] sm:$0xf0] %vm2668_vm3, %v10527_v18  ;;  %3669 = vmatmul.mubr.f32.vlgmr.msra.gmra.mrb[46].mxu0 %v10537_v2  ;;  %vm8780_vm3 = vmmov 0  }
 0x4dc   :  { %7371 = vmatpush1.bf16.msra.mxu1 %v8599_v8  ;;  %3673 = vmatprep.mubr.f32.mxu0 %v10540_v63  ;;  %v2600_v7 = vpop.permute.xlu0 %2599  ;;  %v2602_v57 = vpop.permute.xlu1 %2601 }
 0x4dd   :  { %7518 = vmatpush1.bf16.msra.mxu0 %v8600_v59  ;;  %7373 = vmatprep.subr.bf16.mxu1 %v8601_v40  ;;  %v2608_v35 = vsel %vm1221_vm8, %v2600_v7, %v2602_v57  ;;  %v8632_v59 = vld [vmem:[%s11561_s5 + $0x3c8] ss:$12 sps:$4 sm:$0xff]  }
 0x4de   :  { %7519 = vmatprep.subr.bf16.mxu0 %v8778_v5  ;;  %2621 = vst.msk [vmem:[#allocation5 + $0xa8] sm:$0xff] %vm2371_vm12, %v2608_v35  ;;  %v8633_v40 = vld [vmem:[%s11561_s5 + $0x31c] ss:$12 sps:$4 sm:$0xff]  }
 0x4df   :  { %3674 = vmatmul.mubr.f32.gmra.mrb[48].mxu0 %v10553_v32 }
 0x4e0   :  { %7375 = vmatpush1.bf16.msra.mxu1 %v8603_v29  ;;  %v2551_v61 = vpop.permute.xlu0 %2550  ;;  %v10563_v14 = vpop.permute.xlu1 %2651 }
 0x4e1   :  { %7521 = vmatpush1.bf16.msra.mxu0 %v8604_v0  ;;  %v2557_v16 = vsel %vm2248_vm2, %v10421_v45, %v2551_v61  ;;  %7377 = vmatprep.subr.bf16.mxu1 %v8605_v24  ;;  %2672 = vst.msk [vmem:[#allocation5 + $0xa8] sm:$0xff] %vm2423_vm13, %v10563_v14  ;;  %v10578_v45 = vld [vmem:[#allocation5 + $0x70] sm:$0xff]  ;;  %v8636_v0 = vld [vmem:[%s11561_s5 + $0x3e0] ss:$12 sps:$4 sm:$0xff]  }
 0x4e2   :  { %v10565_v34 = vld [vmem:[#allocation5 + $0x78] sm:$0xff]  ;;  %2570 = vst.msk [vmem:[#allocation5 + $0xa0] sm:$0xff] %vm1221_vm8, %v2557_v16  ;;  %7522 = vmatprep.subr.bf16.mxu0 %v8778_v5 }
 0x4e3   :  { %3678 = vmatprep.mubr.f32.mxu0 %v10565_v34  ;;  %2620 = vst.msk [vmem:[#allocation5 + $0xa0] sm:$0xff] %vm2369_vm15, %v2600_v7  ;;  %v8635_v7 = vld [vmem:[%s11561_s5 + $0x318] ss:$12 sps:$4 sm:$0xff]  }
 0x4e4   :  { %3679 = vmatmul.mubr.f32.gmra.mrb[50].mxu0 %v10578_v45  ;;  %7379 = vmatpush1.bf16.msra.mxu1 %v8607_v6  ;;  %v2405_v9 = vpop.permute.xlu0 %2404  ;;  %v2456_v11 = vpop.permute.xlu1 %2455  ;;  %v8640_v6 = vld [vmem:[%s11561_s5 + $0x3f8] ss:$12 sps:$4 sm:$0xff]  }
 0x4e5   :  { %7524 = vmatpush1.bf16.msra.mxu0 %v8608_v3  ;;  %v2414_v25 = vsel %vm2371_vm12, %v10375_v28, %v2405_v9  ;;  %7381 = vmatprep.subr.bf16.mxu1 %v8609_v51  ;;  %v8615_v28 = vld [vmem:[%s11561_s5 + $0x2a0] ss:$12 sps:$4 sm:$0xff]   ;;  %v8643_v9 = vld [vmem:[%s11561_s5 + $0x348] ss:$12 sps:$4 sm:$0xff]  }
 0x4e6   :  { %2426 = vst.msk [vmem:[#allocation5 + $0x20] sm:$0xff] %vm2425_vm4, %v2414_v25  ;;  %7525 = vmatprep.subr.bf16.mxu0 %v8778_v5 }
 0x4e7   :  { %2477 = vst.msk [vmem:[#allocation5 + $0x20] sm:$0xff] %vm2476_vm5, %v2456_v11 }
 0x4e8   :  { %7383 = vmatpush1.bf16.msra.mxu1 %v8611_v19  ;;  %v2458_v4 = vpop.permute.xlu0 %2457  ;;  %v2409_v30 = vpop.permute.xlu1 %2408  ;;  %v10600_v48 = vld [vmem:[#allocation5 + $0xa8] sm:$0xff] }
 0x4e9   :  { %7527 = vmatpush1.bf16.msra.mxu0 %v8612_v12  ;;  %v2467_v23 = vsel %vm2425_vm4, %v2456_v11, %v2458_v4  ;;  %7385 = vmatprep.subr.bf16.mxu1 %v8613_v21  ;;  %v2415_v42 = vsel %vm2371_vm12, %v10465_v22, %v2409_v30  ;;  %v8645_v11 = vld [vmem:[%s11561_s5 + $0x364] ss:$12 sps:$4 sm:$0xff]   ;;  %v8647_v12 = vld [vmem:[%s11561_s5 + $0x360] ss:$12 sps:$4 sm:$0xff]  }
 0x4ea   :  { %2479 = vst.msk [vmem:[#allocation5 + $0x28] sm:$0xff] %vm2478_vm7, %v2467_v23  ;;  %3683 = vmatprep.mubr.f32.mxu0 %v10600_v48  ;;  %7528 = vmatprep.subr.bf16.mxu0 %v8778_v5  ;;  %v10613_v47 = vld [vmem:[#allocation5 + $0xa0] sm:$0xff]  ;;  %v8649_v23 = vld [vmem:[%s11561_s5 + $0x37c] ss:$12 sps:$4 sm:$0xff]  }
 0x4eb   :  { %2428 = vst.msk [vmem:[#allocation5 + $0x50] sm:$0xff] %vm2425_vm4, %v2415_v42  ;;  %3684 = vmatmul.mubr.f32.gmra.mrb[52].mxu0 %v10613_v47  ;;  %v8652_v42 = vld [vmem:[%s11561_s5 + $0x394] ss:$12 sps:$4 sm:$0xff]  }
 0x4ec   :  { %7387 = vmatpush1.bf16.msra.mxu1 %v8615_v28  ;;  %v2460_v31 = vpop.permute.xlu0 %2459  ;;  %v2462_v22 = vpop.permute.xlu1 %2461  ;;  %v8648_v28 = vld [vmem:[%s11561_s5 + $0x428] ss:$12 sps:$4 sm:$0xff]  }
 0x4ed   :  { %7530 = vmatpush1.bf16.msra.mxu0 %v8616_v56  ;;  %2480 = vst.msk [vmem:[#allocation5 + $0x50] sm:$0xff] %vm2476_vm5, %v2460_v31  ;;  %7389 = vmatprep.subr.bf16.mxu1 %v8617_v26  ;;  %v2468_v17 = vsel %vm2425_vm4, %v2460_v31, %v2462_v22  ;;  %v8651_v56 = vld [vmem:[%s11561_s5 + $0x378] ss:$12 sps:$4 sm:$0xff]   ;;  %v8654_v22 = vld [vmem:[%s11561_s5 + $0x390] ss:$12 sps:$4 sm:$0xff]  }
 0x4ee   :  { %7531 = vmatprep.subr.bf16.mxu0 %v8778_v5  ;;  %2481 = vst.msk [vmem:[#allocation5 + $0x58] sm:$0xff] %vm2478_vm7, %v2468_v17  ;;  %v2721_v31 = vld [vmem:[#allocation5 + $0x20] sm:$0xff] }
 0x4f0   :  { %7391 = vmatpush1.bf16.msra.mxu1 %v8619_v50  ;;  %v2413_v27 = vpop.permute.xlu0 %2412  ;;  %v10635_v36 = vpop.permute.xlu1 %2655 }
 0x4f1   :  { %7533 = vmatpush1.bf16.msra.mxu0 %v8620_v10  ;;  %v2416_v13 = vsel %vm2371_vm12, %v10521_v39, %v2413_v27  ;;  %7393 = vmatprep.subr.bf16.mxu1 %v8621_v53  ;;  %v2722_v51 = vld [vmem:[#allocation5 + $0x28] sm:$0xff] }
 0x4f2   :  { %2432 = vst.msk [vmem:[#allocation5 + $0x80] sm:$0xf] %vm2431_vm10, %v2416_v13  ;;  %7534 = vmatprep.subr.bf16.mxu0 %v8778_v5  ;;  %v8655_v10 = vld [vmem:[%s11561_s5 + $0x3ac] ss:$12 sps:$4 sm:$0xff]   ;;  %v8657_v27 = vld [vmem:[%s11561_s5 + $0x3a8] ss:$12 sps:$4 sm:$0xff]  }
 0x4f3   :  { %vm4528_vm10 = vcmask 1041920  }
 0x4f4   :  { %7395 = vmatpush1.bf16.msra.mxu1 %v8623_v54  ;;  %v2604_v52 = vpop.permute.xlu0 %2603  ;;  %v2606_v37 = vpop.permute.xlu1 %2605  ;;  %v2727_v53 = vld [vmem:[#allocation5 + $0x50] sm:$0xff] }
 0x4f5   :  { %7536 = vmatpush1.bf16.msra.mxu0 %v8624_v46  ;;  %7397 = vmatprep.subr.bf16.mxu1 %v8625_v55  ;;  %v2609_v62 = vsel %vm1221_vm8, %v2604_v52, %v2606_v37  ;;  %v2728_v50 = vld [vmem:[#allocation5 + $0x58] sm:$0xff]  ;;  %v8658_v54 = vld [vmem:[%s11561_s5 + $0x3c4] ss:$12 sps:$4 sm:$0xff]   ;;  %v8660_v46 = vld [vmem:[%s11561_s5 + $0x3c0] ss:$12 sps:$4 sm:$0xff]  }
 0x4f6   :  { %7537 = vmatprep.subr.bf16.mxu0 %v8778_v5  ;;  %2623 = vst.msk [vmem:[#allocation5 + $0xd8] sm:$0xff] %vm2371_vm12, %v2609_v62  ;;  %v8661_v55 = vld [vmem:[%s11561_s5 + $0x3dc] ss:$12 sps:$4 sm:$0xff]   ;;  %v8663_v37 = vld [vmem:[%s11561_s5 + $0x3d8] ss:$12 sps:$4 sm:$0xff]  }
 0x4f7   :  { %2674 = vst.msk [vmem:[#allocation5 + $0xd8] sm:$0xff] %vm2423_vm13, %v10635_v36  ;;  %vm2484_vm13 = vcmask 650240   ;;  %v8666_v62 = vld [vmem:[%s11561_s5 + $0x3f0] ss:$12 sps:$4 sm:$0xff]  }
 0x4f8   :  { %7399 = vmatpush1.bf16.msra.mxu1 %v8627_v60  ;;  %v2555_v49 = vpop.permute.xlu0 %2554  ;;  %v2464_v39 = vpop.permute.xlu1 %2463 }
 0x4f9   :  { %7539 = vmatpush1.bf16.msra.mxu0 %v8628_v20  ;;  %v2558_v8 = vsel %vm2248_vm2, %v10446_v33, %v2555_v49  ;;  %7401 = vmatprep.subr.bf16.mxu1 %v8629_v1  ;;  %2483 = vst.msk [vmem:[#allocation5 + $0x80] sm:$0xf] %vm2482_vm11, %v2464_v39  ;;  %vm2670_vm2 = vcmask 523268   ;;  %v8664_v20 = vld [vmem:[%s11561_s5 + $0x3f4] ss:$12 sps:$4 sm:$0xff]   ;;  %vm4529_vm11 = vcmask 781314  }
 0x4fa   :  { %2572 = vst.msk [vmem:[#allocation5 + $0xd0] sm:$0xff] %vm1221_vm8, %v2558_v8  ;;  %7540 = vmatprep.subr.bf16.mxu0 %v8778_v5  ;;  %v8667_v49 = vld [vmem:[%s11561_s5 + $0x40c] ss:$12 sps:$4 sm:$0xff]  }
 0x4fb   :  { %2622 = vst.msk [vmem:[#allocation5 + $0xd0] sm:$0xff] %vm2369_vm15, %v2604_v52  ;;  %3389 = vmatmul.mubr.f32.vlgmr.msra.gmra.mrb[54].mxu1 %v10537_v2  ;;  %vm2709_vm15 = vcmask 1048068   ;;  %v8672_v8 = vld [vmem:[%s11561_s5 + $0x420] ss:$12 sps:$4 sm:$0xff]  }
 0x4fc   :  { %3394 = vmatprep.mubr.f32.mxu1 %v10540_v63  ;;  %7403 = vmatpush1.bf16.msra.mxu1 %v8631_v15  ;;  %v2466_v33 = vpop.permute.xlu0 %2465  ;;  %v2650_v29 = vpop.permute.xlu1 %2649  ;;  %v8637_v63 = vld [vmem:[%s11561_s5 + $0x334] ss:$12 sps:$4 sm:$0xff]  }
 0x4fd   :  { %7542 = vmatpush1.bf16.msra.mxu0 %v8632_v59  ;;  %v2469_v57 = vsel %vm2425_vm4, %v2464_v39, %v2466_v33  ;;  %7405 = vmatprep.subr.bf16.mxu1 %v8633_v40  ;;  %v2659_v2 = vsel %vm2371_vm12, %v10527_v18, %v2650_v29  ;;  %v8639_v18 = vld [vmem:[%s11561_s5 + $0x330] ss:$12 sps:$4 sm:$0xff]   ;;  %v8669_v15 = vld [vmem:[%s11561_s5 + $0x408] ss:$12 sps:$4 sm:$0xff]  }
 0x4fe   :  { %2485 = vst.msk [vmem:[#allocation5 + $0x88] sm:$0xf] %vm2484_vm13, %v2469_v57  ;;  %7543 = vmatprep.subr.bf16.mxu0 %v8778_v5  ;;  %v2744_v24 = vld [vmem:[#allocation5 + $0xd8] sm:$0xff]  ;;  %v8670_v39 = vld [vmem:[%s11561_s5 + $0x424] ss:$12 sps:$4 sm:$0xff]  }
 0x4ff   :  { %2671 = vst.msk [vmem:[#allocation5 + $0x80] sm:$0xf0] %vm2670_vm2, %v2659_v2  ;;  %3395 = vmatmul.mubr.f32.gmra.mrb[56].mxu1 %v10553_v32  ;;  %3688 = vmatprep.mubr.f32.mxu0 %v2744_v24  ;;  %vm11188_vm2 = vmor %vm4529_vm11, %vm4528_vm10 }
 0x500   :  { %3400 = vmatprep.mubr.f32.mxu1 %v10565_v34  ;;  %7407 = vmatpush1.bf16.msra.mxu1 %v8635_v7  ;;  %v2689_v35 = vpop.permute.xlu0 %2688  ;;  %v2691_v61 = vpop.permute.xlu1 %2690  ;;  %v8641_v34 = vld [vmem:[%s11561_s5 + $0x34c] ss:$12 sps:$4 sm:$0xff]  }
 0x501   :  { %7545 = vmatpush1.bf16.msra.mxu0 %v8636_v0  ;;  %2710 = vst.msk [vmem:[#allocation5 + $0x80] sm:$0xf0] %vm2709_vm15, %v2689_v35  ;;  %v2700_v32 = vsel %vm2425_vm4, %v2689_v35, %v2691_v61  ;;  %7409 = vmatprep.subr.bf16.mxu1 %v8637_v63  ;;  %vm4551_vm15 = vcmask 1042176  }
 0x502   :  { %7546 = vmatprep.subr.bf16.mxu0 %v8778_v5  ;;  %v2743_v16 = vld [vmem:[#allocation5 + $0xd0] sm:$0xff]  ;;  %2712 = vst.msk [vmem:[#allocation5 + $0x88] sm:$0xf0] %vm2711_vm0, %v2700_v32  ;;  %vm4552_vm0 = vcmask 1043458  }
 0x503   :  { %3401 = vmatmul.mubr.f32.gmra.mrb[58].mxu1 %v10578_v45  ;;  %3689 = vmatmul.mubr.f32.gmra.mrb[54].mxu0 %v2743_v16  ;;  %v8644_v45 = vld [vmem:[%s11561_s5 + $0x410] ss:$12 sps:$4 sm:$0xff]  }
 0x504   :  { %3406 = vmatprep.mubr.f32.mxu1 %v10600_v48  ;;  %7411 = vmatpush1.bf16.msra.mxu1 %v8639_v18  ;;  %v2654_v3 = vpop.permute.xlu0 %2653  ;;  %v2693_v19 = vpop.permute.xlu1 %2692 }
 0x505   :  { %7548 = vmatpush1.bf16.msra.mxu0 %v8640_v6  ;;  %v2660_v25 = vsel %vm2371_vm12, %v10563_v14, %v2654_v3  ;;  %5929 = vmatprep.mubr.msk.f32.mxu0 %vm2478_vm7, %v2722_v51 }
 0x506   :  { %2673 = vst.msk [vmem:[#allocation5 + $0xb0] sm:$0xff] %vm2425_vm4, %v2660_v25  ;;  %7413 = vmatprep.subr.bf16.mxu1 %v8641_v34  ;;  %7549 = vmatprep.subr.bf16.mxu0 %v8778_v5 }
 0x507   :  { %2713 = vst.msk [vmem:[#allocation5 + $0xb0] sm:$0xff] %vm2476_vm5, %v2693_v19  ;;  %3407 = vmatmul.mubr.f32.gmra.mrb[60].mxu1 %v10613_v47 }
 0x508   :  { %3412 = vmatprep.mubr.f32.mxu1 %v2744_v24  ;;  %7415 = vmatpush1.bf16.msra.mxu1 %v8643_v9  ;;  %v2695_v14 = vpop.permute.xlu0 %2694  ;;  %v2658_v21 = vpop.permute.xlu1 %2657  ;;  %v2733_v13 = vld [vmem:[#allocation5 + $0x80] sm:$0xff] }
 0x509   :  { %7551 = vmatpush1.bf16.msra.mxu0 %v8644_v45  ;;  %v2701_v4 = vsel %vm2425_vm4, %v2693_v19, %v2695_v14  ;;  %7417 = vmatprep.subr.bf16.mxu1 %v8645_v11  ;;  %v2661_v30 = vsel %vm2371_vm12, %v10635_v36, %v2658_v21  ;;  %v2734_v17 = vld [vmem:[#allocation5 + $0x88] sm:$0xff] }
 0x50a   :  { %2714 = vst.msk [vmem:[#allocation5 + $0xb8] sm:$0xff] %vm2478_vm7, %v2701_v4  ;;  %7552 = vmatprep.subr.bf16.mxu0 %v8778_v5 }
 0x50b   :  { %2675 = vst.msk [vmem:[#allocation5 + $0xe0] sm:$0xff] %vm2425_vm4, %v2661_v30  ;;  %3413 = vmatmul.mubr.f32.gmra.mrb[62].mxu1 %v2743_v16  ;;  %v3197_v16 = vld [vmem:[%s11562_s6] sm:$0x7]  ;;  %s8779_s6 = smov 112  }
 0x50c   :  { %7419 = vmatpush1.bf16.msra.mxu1 %v8647_v12  ;;  %5924 = vmatprep.mubr.msk.f32.mxu1 %vm2478_vm7, %v2722_v51  ;;  %v2697_v48 = vpop.permute.xlu0 %2696  ;;  %v2699_v26 = vpop.permute.xlu1 %2698  ;;  %v3210_v34 = vrot.slane %v3197_v16, %v608_v41 }
 0x50d   :  { %7554 = vmatpush1.bf16.msra.mxu0 %v8648_v28  ;;  %2715 = vst.msk [vmem:[#allocation5 + $0xe0] sm:$0xff] %vm2476_vm5, %v2697_v48  ;;  %7421 = vmatprep.subr.bf16.mxu1 %v8649_v23  ;;  %v2702_v47 = vsel %vm2425_vm4, %v2697_v48, %v2699_v26  ;;  %vm3952_vm5 = vcmask 916480  }
 0x50e   :  { %7563 = vmatprep.subr.bf16.mxu0 %v8778_v5  ;;  %2716 = vst.msk [vmem:[#allocation5 + $0xe8] sm:$0xff] %vm2478_vm7, %v2702_v47  ;;  %v2739_v52 = vld [vmem:[#allocation5 + $0xb0] sm:$0xff] }
 0x510   :  { %3759 = vmatmul.mubr.f32.vlgmr.msra.gmra.mrb[56].mxu0 %v2721_v31  ;;  %7423 = vmatpush1.bf16.msra.mxu1 %v8651_v56 }
 0x511   :  { %5930 = vmatprep.mubr.msk.f32.mxu0 %vm2478_vm7, %v2728_v50  ;;  %7425 = vmatprep.subr.bf16.mxu1 %v8652_v42  ;;  %v2740_v36 = vld [vmem:[#allocation5 + $0xb8] sm:$0xff] }
 0x514   :  { %3764 = vmatmul.mubr.f32.gmra.mrb[58].mxu0 %v2727_v53  ;;  %7427 = vmatpush1.bf16.msra.mxu1 %v8654_v22  ;;  %v2745_v1 = vld [vmem:[#allocation5 + $0xe0] sm:$0xff] }
 0x515   :  { %5931 = vmatprep.mubr.msk.f32.mxu0 %vm2478_vm7, %v2734_v17  ;;  %7429 = vmatprep.subr.bf16.mxu1 %v8655_v10  ;;  %v2746_v60 = vld [vmem:[#allocation5 + $0xe8] sm:$0xff] }
 0x518   :  { %3769 = vmatmul.mubr.f32.gmra.mrb[60].mxu0 %v2733_v13  ;;  %7431 = vmatpush1.bf16.msra.mxu1 %v8657_v27 }
 0x519   :  { %5932 = vmatprep.mubr.msk.f32.mxu0 %vm2478_vm7, %v2740_v36  ;;  %7433 = vmatprep.subr.bf16.mxu1 %v8658_v54 }
 0x51c   :  { %3774 = vmatmul.mubr.f32.gmra.mrb[62].mxu0 %v2739_v52  ;;  %7435 = vmatpush1.bf16.msra.mxu1 %v8660_v46 }
 0x51d   :  { %5933 = vmatprep.mubr.msk.f32.mxu0 %vm2478_vm7, %v2746_v60  ;;  %7437 = vmatprep.subr.bf16.mxu1 %v8661_v55 }
 0x520   :  { %3779 = vmatmul.mubr.f32.gmra.mrb[64].mxu0 %v2745_v1  ;;  %7439 = vmatpush1.bf16.msra.mxu1 %v8663_v37 }
 0x521   :  { %7441 = vmatprep.subr.bf16.mxu1 %v8664_v20  ;;  %6964 = vmatprep.mubr.msk.f32.mxu0 %vm8780_vm3, %v8771_v58 }
 0x524   :  { %7443 = vmatpush1.bf16.msra.mxu1 %v8666_v62 }
 0x525   :  { %7445 = vmatprep.subr.bf16.mxu1 %v8667_v49 }
 0x528   :  { %7447 = vmatpush1.bf16.msra.mxu1 %v8669_v15 }
 0x529   :  { %7449 = vmatprep.subr.bf16.mxu1 %v8670_v39 }
 0x52c   :  { %7451 = vmatpush1.bf16.msra.mxu1 %v8672_v8 }
 0x52f   :  { %3484 = vmatmul.mubr.f32.vlgmr.msra.gmra.mrb[54].mxu1 %v2721_v31 }
 0x530   :  { %5925 = vmatprep.mubr.msk.f32.mxu1 %vm2478_vm7, %v2728_v50 }
 0x533   :  { %3490 = vmatmul.mubr.f32.gmra.mrb[56].mxu1 %v2727_v53 }
 0x534   :  { %5926 = vmatprep.mubr.msk.f32.mxu1 %vm2478_vm7, %v2734_v17 }
 0x537   :  { %3496 = vmatmul.mubr.f32.gmra.mrb[58].mxu1 %v2733_v13 }
 0x538   :  { %5927 = vmatprep.mubr.msk.f32.mxu1 %vm2478_vm7, %v2740_v36 }
 0x53b   :  { %3502 = vmatmul.mubr.f32.gmra.mrb[60].mxu1 %v2739_v52 }
 0x53c   :  { %5928 = vmatprep.mubr.msk.f32.mxu1 %vm2478_vm7, %v2746_v60  ;;  %vm3996_vm7 = vcmask 318464  }
 0x53f   :  { %3508 = vmatmul.mubr.f32.gmra.mrb[62].mxu1 %v2745_v1 }
 0x540   :  { %4079 = vmatprep.mubr.f32.mxu1 %v8771_v58 }
 0x58d   :  { %v6584_v59 = vpop.f32.mrb[36].mxu0 }
 0x58e   :  { %v6585_v40 = vpop.f32.mrb[37].mxu0 }
 0x58f   :  { %v6586_v33 = vadd.f32 %v6585_v40, %v6584_v59 }
 0x591   :  { %v3581_v9 = vadd.f32 %v6586_v33, %v3210_v34 }
 0x595   :  { %v6587_v7 = vpop.f32.mrb[38].mxu0 }
 0x596   :  { %v6588_v29 = vpop.f32.mrb[39].mxu0 }
 0x597   :  { %v6589_v57 = vadd.f32 %v6588_v29, %v6587_v7  ;;  %v3202_v7 = vrot.slane %v3197_v16, %v600_v43  ;;  %v3206_v29 = vrot.slane %v3197_v16, %v604_v44 }
 0x599   :  { %v3586_v14 = vadd.f32 %v6589_v57, %v3210_v34 }
 0x59a   :  { %v6590_v0 = vpop.f32.mrb[40].mxu0 }
 0x59b   :  { %v6591_v2 = vpop.f32.mrb[41].mxu0 }
 0x59c   :  { %v6592_v63 = vadd.f32 %v6591_v2, %v6590_v0 }
 0x59e   :  { %v6593_v24 = vpop.f32.mrb[42].mxu0  ;;  %v3591_v23 = vadd.f32 %v6592_v63, %v3210_v34 }
 0x59f   :  { %v6594_v35 = vpop.f32.mrb[43].mxu0 }
 0x5a0   :  { %v6595_v18 = vadd.f32 %v6594_v35, %v6593_v24 }
 0x5a2   :  { %v6596_v61 = vpop.f32.mrb[44].mxu0  ;;  %v3596_v42 = vadd.f32 %v6595_v18, %v3210_v34 }
 0x5a3   :  { %v6597_v6 = vpop.f32.mrb[45].mxu0 }
 0x5a4   :  { %v6598_v32 = vadd.f32 %v6597_v6, %v6596_v61 }
 0x5a6   :  { %v3601_v22 = vadd.f32 %v6598_v32, %v3210_v34 }
 0x5ae   :  { %v6631_v3 = vpop.f32.mrb[46].mxu0 }
 0x5af   :  { %v6632_v51 = vpop.f32.mrb[47].mxu0 }
 0x5b0   :  { %v6633_v19 = vadd.f32 %v6632_v51, %v6631_v3 }
 0x5b2   :  { %v6634_v25 = vpop.f32.mrb[48].mxu0  ;;  %v3671_v45 = vadd.f32 %v6633_v19, %v3581_v9 }
 0x5b3   :  { %v6635_v11 = vpop.f32.mrb[49].mxu0 }
 0x5b4   :  { %v6636_v12 = vadd.f32 %v6635_v11, %v6634_v25 }
 0x5b6   :  { %v3676_v4 = vadd.f32 %v6636_v12, %v3586_v14 }
 0x5b7   :  { %v6637_v21 = vpop.f32.mrb[50].mxu0 }
 0x5b8   :  { %v6638_v28 = vpop.f32.mrb[51].mxu0 }
 0x5b9   :  { %v6639_v30 = vadd.f32 %v6638_v28, %v6637_v21 }
 0x5bb   :  { %v3681_v48 = vadd.f32 %v6639_v30, %v3591_v23 }
 0x5be   :  { %v6640_v56 = vpop.f32.mrb[52].mxu0 }
 0x5bf   :  { %v6641_v26 = vpop.f32.mrb[53].mxu0 }
 0x5c0   :  { %v6642_v47 = vadd.f32 %v6641_v26, %v6640_v56 }
 0x5c2   :  { %v3686_v41 = vadd.f32 %v6642_v47, %v3596_v42 }
 0x5d6   :  { %v6643_v31 = vpop.f32.mrb[54].mxu0 }
 0x5d7   :  { %v6644_v50 = vpop.f32.mrb[55].mxu0 }
 0x5d8   :  { %v6645_v10 = vadd.f32 %v6644_v50, %v6643_v31 }
 0x5da   :  { %v3691_v53 = vadd.f32 %v6645_v10, %v3601_v22 }
 0x5e3   :  { %v3760_v17 = vpop.f32.mrb[56].mxu0 }
 0x5e4   :  { %v3761_v27 = vadd.f32 %v3760_v17, %v3671_v45  ;;  %v3762_v54 = vpop.f32.mrb[57].mxu0 }
 0x5e6   :  { %v3786_v13 = vmax.f32 %v3761_v27, 0.0 }
 0x5e7   :  { %v3765_v36 = vpop.f32.mrb[58].mxu0 }
 0x5e8   :  { %3801 = vst.msk [vmem:[#allocation6 + $0x10] sm:$0xff] %vm2425_vm4, %v3786_v13  ;;  %v3766_v46 = vadd.f32 %v3765_v36, %v3676_v4  ;;  %v3767_v55 = vpop.f32.mrb[59].mxu0 }
 0x5ea   :  { %v3789_v52 = vmax.f32 %v3766_v46, 0.0 }
 0x5eb   :  { %v3770_v60 = vpop.f32.mrb[60].mxu0 }
 0x5ec   :  { %3804 = vst.msk [vmem:[#allocation6 + $0x28] sm:$0xff] %vm2425_vm4, %v3789_v52  ;;  %v3771_v37 = vadd.f32 %v3770_v60, %v3681_v48  ;;  %v3772_v20 = vpop.f32.mrb[61].mxu0 }
 0x5ee   :  { %v3792_v1 = vmax.f32 %v3771_v37, 0.0 }
 0x5ef   :  { %v3775_v62 = vpop.f32.mrb[62].mxu0  ;;  %v3831_v32 = vld [vmem:[#allocation6 + $0x10] sm:$0xfe] }
 0x5f0   :  { %3807 = vst.msk [vmem:[#allocation6 + $0x40] sm:$0xff] %vm2425_vm4, %v3792_v1  ;;  %v3776_v49 = vadd.f32 %v3775_v62, %v3686_v41  ;;  %v3777_v15 = vpop.f32.mrb[63].mxu0  ;;  %v3856_v16 = vrot.slane %v3831_v32, 1  ;;  %v3816_v23 = vld [vmem:[#allocation6 + $0x10] sm:$0xff] }
 0x5f2   :  { %v3795_v39 = vmax.f32 %v3776_v49, 0.0 }
 0x5f3   :  { %v3780_v8 = vpop.f32.mrb[64].mxu0  ;;  %v3819_v24 = vld [vmem:[#allocation6 + $0x28] sm:$0xff] }
 0x5f4   :  { %3810 = vst.msk [vmem:[#allocation6 + $0x58] sm:$0xff] %vm2425_vm4, %v3795_v39  ;;  %v3781_v59 = vadd.f32 %v3780_v8, %v3691_v53  ;;  %v3782_v40 = vpop.f32.mrb[65].mxu0  ;;  %v3857_v51 = vrot.slane %v3819_v24, 1 }
 0x5f6   :  { %v3798_v33 = vmax.f32 %v3781_v59, 0.0  ;;  %v3858_v12 = vsel %vm1334_vm9, %v3856_v16, %v3857_v51 }
 0x5f7   :  { %v10806_v35 = vld [vmem:[#allocation6 + $0x40] sm:$0xff]  ;;  %v10814_v26 = vmax.f32 %v3816_v23, %v3858_v12 }
 0x5f8   :  { %3813 = vst.msk [vmem:[#allocation6 + $0x70] sm:$0xff] %vm2425_vm4, %v3798_v33  ;;  %v3863_v43 = vrot.slane %v10806_v35, 1 }
 0x5fa   :  { %v3864_v21 = vsel %vm1334_vm9, %v3857_v51, %v3863_v43 }
 0x5fb   :  { %v10809_v45 = vld [vmem:[#allocation6 + $0x58] sm:$0xff]  ;;  %v10816_v42 = vmax.f32 %v3819_v24, %v3864_v21 }
 0x5fc   :  { %v3869_v30 = vrot.slane %v10809_v45, 1 }
 0x5fe   :  { %v3870_v52 = vsel %vm1334_vm9, %v3863_v43, %v3869_v30 }
 0x5ff   :  { %v3834_v60 = vld [vmem:[#allocation6 + $0x70] sm:$0xff]  ;;  %v10842_v32 = vmax.f32 %v10806_v35, %v3870_v52 }
 0x602   :  { %v3485_v57 = vpop.f32.mrb[54].mxu1 }
 0x603   :  { %v7909_v0 = vadd.f32 %v3485_v57, %v3202_v7  ;;  %v3487_v2 = vpop.f32.mrb[55].mxu1 }
 0x604   :  { %v7910_v63 = vadd.f32 %v3487_v2, %v3206_v29  ;;  %v3875_v2 = vrot.slane %v3834_v60, 1 }
 0x605   :  { %v3784_v18 = vmax.f32 %v7909_v0, 0.0 }
 0x606   :  { %v3785_v61 = vmax.f32 %v7910_v63, 0.0  ;;  %v3491_v6 = vpop.f32.mrb[56].mxu1  ;;  %v3876_v43 = vsel %vm1334_vm9, %v3869_v30, %v3875_v2 }
 0x607   :  { %3799 = vst [vmem:[#allocation6] sm:$0xff] %v3784_v18  ;;  %v7911_v34 = vadd.f32 %v3491_v6, %v3202_v7  ;;  %v3493_v3 = vpop.f32.mrb[57].mxu1 }
 0x608   :  { %3800 = vst [vmem:[#allocation6 + $0x8] sm:$0xff] %v3785_v61  ;;  %v7912_v9 = vadd.f32 %v3493_v3, %v3206_v29 }
 0x609   :  { %v3787_v44 = vmax.f32 %v7911_v34, 0.0 }
 0x60a   :  { %v3788_v19 = vmax.f32 %v7912_v9, 0.0  ;;  %v3497_v25 = vpop.f32.mrb[58].mxu1 }
 0x60b   :  { %v7913_v11 = vadd.f32 %v3497_v25, %v3202_v7  ;;  %v3499_v14 = vpop.f32.mrb[59].mxu1  ;;  %v3851_v10 = vrot.slane %v3787_v44, 1 }
 0x60c   :  { %v7914_v4 = vadd.f32 %v3499_v14, %v3206_v29  ;;  %v3854_v54 = vrot.slane %v3788_v19, 1 }
 0x60d   :  { %v3790_v28 = vmax.f32 %v7913_v11, 0.0  ;;  %v3903_v11 = vmax.f32 %v10809_v45, %v3876_v43 }
 0x60e   :  { %v3791_v48 = vmax.f32 %v7914_v4, 0.0  ;;  %v3503_v56 = vpop.f32.mrb[60].mxu1  ;;  %v3829_v47 = vld [vmem:[#allocation6] sm:$0xfe]  ;;  %v3828_v4 = vld [vmem:[#allocation6 + $0x70] sm:$0x7f] }
 0x60f   :  { %v7915_v41 = vadd.f32 %v3503_v56, %v3202_v7  ;;  %v3505_v31 = vpop.f32.mrb[61].mxu1  ;;  %v3830_v50 = vld [vmem:[#allocation6 + $0x8] sm:$0xfe]  ;;  %v3850_v22 = vrot.slane %v3829_v47, 1  ;;  %v3859_v53 = vrot.slane %v3790_v28, 1  ;;  %v10867_v23 = vmax.f32 %v3828_v4, %v3875_v2  ;;  %v3994_v4 = vld [vmem:[%s11563_s7 + $0x8] sm:$0xff] }
 0x610   :  { %v7916_v17 = vadd.f32 %v3505_v31, %v3206_v29  ;;  %v3853_v27 = vrot.slane %v3830_v50, 1  ;;  %v3861_v13 = vrot.slane %v3791_v48, 1 }
 0x611   :  { %v3793_v36 = vmax.f32 %v7915_v41, 0.0  ;;  %v3852_v46 = vsel %vm1334_vm9, %v3850_v22, %v3851_v10  ;;  %v3860_v55 = vsel %vm1334_vm9, %v3851_v10, %v3859_v53 }
 0x612   :  { %v3794_v37 = vmax.f32 %v7916_v17, 0.0  ;;  %v3509_v20 = vpop.f32.mrb[62].mxu1  ;;  %v3855_v1 = vsel %vm1334_vm9, %v3853_v27, %v3854_v54  ;;  %v3862_v62 = vsel %vm1334_vm9, %v3854_v54, %v3861_v13  ;;  %v10823_v49 = vmax.f32 %v3784_v18, %v3852_v46 }
 0x613   :  { %v7917_v15 = vadd.f32 %v3509_v20, %v3202_v7  ;;  %v3511_v39 = vpop.f32.mrb[63].mxu1  ;;  %v10825_v8 = vmax.f32 %v3785_v61, %v3855_v1  ;;  %v10827_v59 = vmax.f32 %v3788_v19, %v3862_v62  ;;  %v10829_v40 = vmax.f32 %v3787_v44, %v3860_v55 }
 0x614   :  { %v7918_v33 = vadd.f32 %v3511_v39, %v3206_v29  ;;  %v3867_v57 = vrot.slane %v3794_v37, 1  ;;  %v3865_v0 = vrot.slane %v3793_v36, 1 }
 0x615   :  { %v3796_v63 = vmax.f32 %v7917_v15, 0.0  ;;  %v8345_v24 = vpack.i.bf16 %v10814_v26, %v10825_v8  ;;  %v8355_v18 = vpack.i.bf16 %v10816_v42, %v10827_v59  ;;  %v8350_v9 = vpack.i.bf16 %v10829_v40, %v10823_v49 }
 0x616   :  { %v3797_v6 = vmax.f32 %v7918_v33, 0.0  ;;  %v3868_v7 = vsel %vm1334_vm9, %v3861_v13, %v3867_v57  ;;  %v3866_v61 = vsel %vm1334_vm9, %v3859_v53, %v3865_v0 }
 0x617   :  { %3811 = vst [vmem:[#allocation6 + $0x60] sm:$0xff] %v3796_v63  ;;  %8346 = vrot.lane.b32.xlu0 %v8345_v24, %s8779_s6  ;;  %8356 = vrot.lane.b32.xlu1 %v8355_v18, %s8779_s6  ;;  %v10839_v29 = vmax.f32 %v3791_v48, %v3868_v7  ;;  %v3871_v34 = vrot.slane %v3796_v63, 1  ;;  %v10844_v3 = vmax.f32 %v3790_v28, %v3866_v61 }
 0x618   :  { %3812 = vst [vmem:[#allocation6 + $0x68] sm:$0xff] %v3797_v6  ;;  %v3873_v51 = vrot.slane %v3797_v6, 1 }
 0x619   :  { %v8360_v44 = vpack.i.bf16 %v10842_v32, %v10839_v29  ;;  %v3872_v16 = vsel %vm1334_vm9, %v3865_v0, %v3871_v34 }
 0x61a   :  { %v10852_v19 = vmax.f32 %v3793_v36, %v3872_v16  ;;  %v3874_v35 = vsel %vm1334_vm9, %v3867_v57, %v3873_v51 }
 0x61b   :  { %8351 = vrot.lane.b32.xlu0 %v8350_v9, %s8779_s6  ;;  %8361 = vrot.lane.b32.xlu1 %v8360_v44, %s8779_s6  ;;  %v10857_v25 = vmax.f32 %v3794_v37, %v3874_v35 }
 0x61c   :  { %v8365_v14 = vpack.i.bf16 %v10852_v19, %v10844_v3 }
 0x61d   :  { %v8370_v12 = vpack.i.bf16 %v3903_v11, %v10857_v25 }
 0x61e   :  { %v3826_v30 = vld [vmem:[#allocation6 + $0x60] sm:$0x7f] }
 0x61f   :  { %8366 = vrot.lane.b32.xlu1 %v8365_v14, %s8779_s6  ;;  %8371 = vrot.lane.b32.xlu0 %v8370_v12, %s8779_s6  ;;  %v3827_v21 = vld [vmem:[#allocation6 + $0x68] sm:$0x7f]  ;;  %v10873_v45 = vmax.f32 %v3826_v30, %v3871_v34  ;;  %v3993_v14 = vld [vmem:[%s11563_s7] sm:$0xff]  ;;  %v3995_v30 = vld [vmem:[%s11563_s7 + $0x10] sm:$0xf] }
 0x620   :  { %v10865_v28 = vmax.f32 %v3827_v21, %v3873_v51  ;;  %v8675_v12 = vld [vmem:[%s11564_s8] ss:$8 sps:$4 sm:$0xff]   ;;  %v8676_v21 = vld [vmem:[%s11564_s8 + $0x14] ss:$8 sps:$4 sm:$0xff]  }
 0x623   :  { %3950 = vrot.lane.b32.xlu1 %v10867_v23, %s8779_s6  ;;  %3948 = vrot.lane.b32.xlu0 %v10865_v28, %s8779_s6 }
 0x627   :  { %3946 = vrot.lane.b32.xlu0 %v10873_v45, %s8779_s6 }
 0x689   :  { %v8347_v48 = vpop.permute.xlu0 %8346  ;;  %v8357_v56 = vpop.permute.xlu1 %8356 }
 0x68a   :  { %v8349_v47 = vunpack.i.h.bf16 %v8347_v48  ;;  %v8348_v41 = vunpack.i.l.bf16 %v8347_v48  ;;  %v8359_v31 = vunpack.i.h.bf16 %v8357_v56  ;;  %v8358_v50 = vunpack.i.l.bf16 %v8357_v56  ;;  %v8682_v48 = vld [vmem:[%s11564_s8 + $0x34] ss:$8 sps:$4 sm:$0xff]   ;;  %v8684_v56 = vld [vmem:[%s11564_s8 + $0x30] ss:$8 sps:$4 sm:$0xff]  }
 0x68c   :  { %v3980_v22 = vmax.f32 %v10814_v26, %v8349_v47  ;;  %v3954_v10 = vsel %vm3952_vm5, %v8348_v41, %v8349_v47  ;;  %v3983_v53 = vmax.f32 %v10816_v42, %v8359_v31  ;;  %v3956_v17 = vsel %vm3952_vm5, %v8358_v50, %v8359_v31  ;;  %v8685_v47 = vld [vmem:[%s11564_s8 + $0x44] ss:$8 sps:$4 sm:$0xff]   ;;  %v8688_v31 = vld [vmem:[%s11564_s8 + $0x54] ss:$8 sps:$4 sm:$0xff]  }
 0x68d   :  { %v8352_v27 = vpop.permute.xlu0 %8351  ;;  %v8362_v54 = vpop.permute.xlu1 %8361  ;;  %v3979_v13 = vmax.f32 %v10825_v8, %v3954_v10  ;;  %v3982_v36 = vmax.f32 %v10827_v59, %v3956_v17  ;;  %v8693_v10 = vld [vmem:[%s11564_s8 + $0x60] ss:$8 sps:$4 sm:$0xff]   ;;  %v8696_v17 = vld [vmem:[%s11564_s8 + $0x70] ss:$8 sps:$4 sm:$0xff]  }
 0x68e   :  { %v7564_v46 = vpack.c.bf16 %v3983_v53, %v3980_v22  ;;  %v8354_v55 = vunpack.i.h.bf16 %v8352_v27  ;;  %v8353_v52 = vunpack.i.l.bf16 %v8352_v27  ;;  %v8364_v60 = vunpack.i.h.bf16 %v8362_v54  ;;  %v8691_v22 = vld [vmem:[%s11564_s8 + $0x64] ss:$8 sps:$4 sm:$0xff]   ;;  %v8694_v53 = vld [vmem:[%s11564_s8 + $0x74] ss:$8 sps:$4 sm:$0xff]  }
 0x68f   :  { %v8363_v37 = vunpack.i.l.bf16 %v8362_v54  ;;  %v7555_v20 = vpack.c.bf16 %v3982_v36, %v3979_v13  ;;  %v8697_v27 = vld [vmem:[%s11564_s8 + $0x84] ss:$8 sps:$4 sm:$0xff]   ;;  %v8699_v54 = vld [vmem:[%s11564_s8 + $0x80] ss:$8 sps:$4 sm:$0xff]   ;;  %v8700_v13 = vld [vmem:[%s11564_s8 + $0x94] ss:$8 sps:$4 sm:$0xff]  }
 0x690   :  { %v3955_v26 = vsel %vm3952_vm5, %v8354_v55, %v8358_v50  ;;  %v3953_v1 = vsel %vm3952_vm5, %v8353_v52, %v8348_v41  ;;  %7565 = vmatpush3.bf16.msra.mxu0 %v7564_v46  ;;  %v3986_v2 = vmax.f32 %v10842_v32, %v8364_v60  ;;  %v8687_v41 = vld [vmem:[%s11564_s8 + $0x40] ss:$8 sps:$4 sm:$0xff]   ;;  %v8690_v50 = vld [vmem:[%s11564_s8 + $0x50] ss:$8 sps:$4 sm:$0xff]   ;;  %v8703_v46 = vld [vmem:[%s11564_s8 + $0xa4] ss:$8 sps:$4 sm:$0xff]  }
 0x691   :  { %v3981_v42 = vmax.f32 %v10829_v40, %v3955_v26  ;;  %v3978_v62 = vmax.f32 %v10823_v49, %v3953_v1  ;;  %v3958_v15 = vsel %vm3952_vm5, %v8363_v37, %v8364_v60  ;;  %v8367_v39 = vpop.permute.xlu1 %8366  ;;  %7556 = vmatprep.subr.bf16.mxu1 %v7555_v20  ;;  %v8372_v8 = vpop.permute.xlu0 %8371  ;;  %7566 = vmatprep.subr.bf16.mxu0 %v8778_v5  ;;  %v8702_v36 = vld [vmem:[%s11564_s8 + $0x90] ss:$8 sps:$4 sm:$0xff]   ;;  %v8705_v55 = vld [vmem:[%s11564_s8 + $0xa0] ss:$8 sps:$4 sm:$0xff]   ;;  %v8706_v52 = vld [vmem:[%s11564_s8 + $0xb4] ss:$8 sps:$4 sm:$0xff]  }
 0x692   :  { %v8369_v59 = vunpack.i.h.bf16 %v8367_v39  ;;  %v8368_v33 = vunpack.i.l.bf16 %v8367_v39  ;;  %v8374_v57 = vunpack.i.h.bf16 %v8372_v8  ;;  %v8373_v0 = vunpack.i.l.bf16 %v8372_v8  ;;  %v8708_v60 = vld [vmem:[%s11564_s8 + $0xb0] ss:$8 sps:$4 sm:$0xff]   ;;  %v8711_v20 = vld [vmem:[%s11564_s8 + $0xc0] ss:$8 sps:$4 sm:$0xff]   ;;  %v8712_v26 = vld [vmem:[%s11564_s8 + $0xd4] ss:$8 sps:$4 sm:$0xff]  }
 0x693   :  { %v7557_v63 = vpack.c.bf16 %v3981_v42, %v3978_v62  ;;  %v3985_v51 = vmax.f32 %v10839_v29, %v3958_v15  ;;  %v8714_v1 = vld [vmem:[%s11564_s8 + $0xd0] ss:$8 sps:$4 sm:$0xff]   ;;  %v8715_v42 = vld [vmem:[%s11564_s8 + $0xe4] ss:$8 sps:$4 sm:$0xff]   ;;  %v8717_v62 = vld [vmem:[%s11564_s8 + $0xe0] ss:$8 sps:$4 sm:$0xff]  }
 0x694   :  { %v3957_v24 = vsel %vm3952_vm5, %v8368_v33, %v8363_v37  ;;  %v3989_v18 = vmax.f32 %v3903_v11, %v8374_v57  ;;  %v3959_v40 = vsel %vm3952_vm5, %v8369_v59, %v8373_v0  ;;  %v3960_v49 = vsel %vm3952_vm5, %v8373_v0, %v8374_v57  ;;  %v8709_v37 = vld [vmem:[%s11564_s8 + $0xc4] ss:$8 sps:$4 sm:$0xff]   ;;  %v8718_v15 = vld [vmem:[%s11564_s8 + $0xf4] ss:$8 sps:$4 sm:$0xff]   ;;  %v8720_v39 = vld [vmem:[%s11564_s8 + $0xf0] ss:$8 sps:$4 sm:$0xff]  }
 0x695   :  { %v3984_v6 = vmax.f32 %v10844_v3, %v3957_v24  ;;  %v3987_v7 = vmax.f32 %v10852_v19, %v3959_v40  ;;  %7558 = vmatpush1.bf16.msra.mxu1 %v7557_v63  ;;  %v3951_v61 = vpop.permute.xlu1 %3950  ;;  %v3949_v34 = vpop.permute.xlu0 %3948  ;;  %v3988_v43 = vmax.f32 %v10857_v25, %v3960_v49  ;;  %v8673_v25 = vld [vmem:[%s11564_s8 + $0x4] ss:$8 sps:$4 sm:$0xff]   ;;  %v8723_v0 = vld [vmem:[%s11564_s8 + $0x100] ss:$8 sps:$4 sm:$0xff]   ;;  %v8724_v63 = vld [vmem:[%s11564_s8 + $0x114] ss:$8 sps:$4 sm:$0xff]  }
 0x696   :  { %v7567_v32 = vpack.c.bf16 %v3989_v18, %v3986_v2  ;;  %v3962_v9 = vsel %vm3952_vm5, %v3949_v34, %v3951_v61  ;;  %v3992_v3 = vmax.f32 %v10867_v23, %v3951_v61  ;;  %v8679_v23 = vld [vmem:[%s11564_s8 + $0x24] ss:$8 sps:$4 sm:$0xff]   ;;  %v8726_v49 = vld [vmem:[%s11564_s8 + $0x110] ss:$8 sps:$4 sm:$0xff]  }
 0x697   :  { %v7559_v44 = vpack.c.bf16 %v3988_v43, %v3985_v51  ;;  %v7561_v16 = vpack.c.bf16 %v3987_v7, %v3984_v6  ;;  %v3991_v35 = vmax.f32 %v10865_v28, %v3962_v9  ;;  %v8678_v28 = vld [vmem:[%s11564_s8 + $0x10] ss:$8 sps:$4 sm:$0xff]   ;;  %v8721_v8 = vld [vmem:[%s11564_s8 + $0x104] ss:$8 sps:$4 sm:$0xff]   ;;  %v8729_v43 = vld [vmem:[%s11564_s8 + $0x120] ss:$8 sps:$4 sm:$0xff]  }
 0x698   :  { %7568 = vmatpush3.bf16.msra.mxu0 %v7567_v32  ;;  %v8727_v7 = vld [vmem:[%s11564_s8 + $0x124] ss:$8 sps:$4 sm:$0xff]  }
 0x699   :  { %v3947_v11 = vpop.permute.xlu0 %3946  ;;  %7560 = vmatprep.subr.bf16.mxu1 %v7559_v44  ;;  %6962 = vmatprep.subr.mxu0 %v8771_v58  ;;  %v6361_v9 = vld [vmem:[%s11565_s9 + $0x40] sm:$0xff]  }
 0x69a   :  { %v3961_v19 = vsel %vm3952_vm5, %v3947_v11, %v3949_v34  ;;  %7562 = vmatpush1.bf16.msra.mxu1 %v7561_v16  ;;  %v5955_v44 = vld [vmem:[%s11565_s9] sm:$0xff]   ;;  %v6362_v16 = vld [vmem:[%s11565_s9 + $0x48] sm:$0xff]   ;;  %vm4548_vm5 = vcmask 785408  }
 0x69b   :  { %v3990_v29 = vmax.f32 %v10873_v45, %v3961_v19  ;;  %5934 = vmatprep.subr.msk.mxu1 %vm1334_vm9, %v3991_v35  ;;  %v8681_v45 = vld [vmem:[%s11564_s8 + $0x20] ss:$8 sps:$4 sm:$0xff]   ;;  %s8782_s8 = smov 96  }
 0x69c   :  { %6963 = vmatpush3.msk.msra.mxu0 %vm1334_vm9, %v3992_v3  ;;  %v6409_v35 = vld [vmem:[%s11565_s9 + $0x1c0] sm:$0xff]   ;;  %v6410_v3 = vld [vmem:[%s11565_s9 + $0x1c8] sm:$0xff]  }
 0x69d   :  { %6965 = vmatmul.mubr.msk.f32.vlgmr.msra.gmra.mrb[66].mxu0 %vm3996_vm7, %v3993_v14  ;;  %7646 = vmatprep.subr.bf16.mxu0 %v6361_v9  ;;  %v6401_v11 = vld [vmem:[%s11565_s9 + $0x180] sm:$0xff]   ;;  %v6354_v19 = vld [vmem:[%s11565_s9 + $0x8] sm:$0xff]  }
 0x69e   :  { %5935 = vmatpush1.msk.msra.mxu1 %vm1334_vm9, %v3990_v29  ;;  %6967 = vmatprep.mubr.msk.f32.mxu0 %vm8780_vm3, %v8771_v58  ;;  %v6363_v29 = vld [vmem:[%s11565_s9 + $0x50] sm:$0xff]   ;;  %vm4486_vm9 = vcmask 257026  }
 0x69f   :  { %5936 = vmatmul.mubr.msk.f32.vlgmr.msra.gmra.mrb[64].mxu1 %vm3996_vm7, %v3993_v14  ;;  %7570 = vmatprep.subr.bf16.mxu1 %v8673_v25  ;;  %v6355_v25 = vld [vmem:[%s11565_s9 + $0x10] sm:$0xff]   ;;  %v8781_v14 = vmov 1983009808  }
 0x6a0   :  { %4085 = vmatprep.mubr.f32.mxu1 %v8771_v58  ;;  %7572 = vmatpush1.bf16.msra.mxu1 %v8675_v12  ;;  %v4479_v12 = vunpack.c.l.s4 %v8781_v14 }
 0x6a1   :  { %6968 = vmatmul.mubr.msk.f32.gmra.mrb[68].mxu0 %vm3996_vm7, %v3994_v4  ;;  %7574 = vmatprep.subr.bf16.mxu1 %v8676_v21 }
 0x6a2   :  { %6970 = vmatprep.mubr.msk.f32.mxu0 %vm8780_vm3, %v8771_v58  ;;  %7648 = vmatpush3.bf16.msra.mxu0 %v5955_v44  ;;  %v6415_v44 = vld [vmem:[%s11565_s9 + $0x1f0] sm:$0xff]  }
 0x6a3   :  { %5937 = vmatmul.mubr.msk.f32.gmra.mrb[66].mxu1 %vm3996_vm7, %v3994_v4  ;;  %7650 = vmatprep.subr.bf16.mxu0 %v6362_v16  ;;  %v6377_v16 = vld [vmem:[%s11565_s9 + $0xc0] sm:$0xff]  }
 0x6a4   :  { %4091 = vmatprep.mubr.f32.mxu1 %v8771_v58  ;;  %7576 = vmatpush1.bf16.msra.mxu1 %v8678_v28  ;;  %v6402_v28 = vld [vmem:[%s11565_s9 + $0x188] sm:$0xff]  }
 0x6a5   :  { %6971 = vmatmul.mubr.msk.f32.gmra.mrb[70].mxu0 %vm3996_vm7, %v3995_v30  ;;  %7578 = vmatprep.subr.bf16.mxu1 %v8679_v23  ;;  %v6364_v23 = vld [vmem:[%s11565_s9 + $0x58] sm:$0xff]  }
 0x6a6   :  { %7652 = vmatpush3.bf16.msra.mxu0 %v6354_v19  ;;  %v6408_v19 = vld [vmem:[%s11565_s9 + $0x1b8] sm:$0xff]  }
 0x6a7   :  { %5938 = vmatmul.mubr.msk.f32.gmra.mrb[68].mxu1 %vm3996_vm7, %v3995_v30  ;;  %7654 = vmatprep.subr.bf16.mxu0 %v6363_v29  ;;  %v4480_v30 = vunpack.c.0.s8 %v4479_v12  ;;  %v6441_v29 = vld [vmem:[%s11565_s9 + $0x2c0] sm:$0xff]   ;;  %vm4553_vm7 = vmor %vm4552_vm0, %vm4551_vm15 }
 0x6a8   :  { %7580 = vmatpush1.bf16.msra.mxu1 %v8681_v45 }
 0x6a9   :  { %7582 = vmatprep.subr.bf16.mxu1 %v8682_v48 }
 0x6aa   :  { %7656 = vmatpush3.bf16.msra.mxu0 %v6355_v25 }
 0x6ab   :  { %7658 = vmatprep.subr.bf16.mxu0 %v6364_v23 }
 0x6ac   :  { %7584 = vmatpush1.bf16.msra.mxu1 %v8684_v56  ;;  %v6356_v56 = vld [vmem:[%s11565_s9 + $0x18] sm:$0xff]  }
 0x6ad   :  { %7586 = vmatprep.subr.bf16.mxu1 %v8685_v47  ;;  %v6411_v47 = vld [vmem:[%s11565_s9 + $0x1d0] sm:$0xff]  }
 0x6ae   :  { %7660 = vmatpush3.bf16.msra.mxu0 %v6356_v56 }
 0x6b0   :  { %7588 = vmatpush1.bf16.msra.mxu1 %v8687_v41  ;;  %v6403_v41 = vld [vmem:[%s11565_s9 + $0x190] sm:$0xff]  }
 0x6b1   :  { %7590 = vmatprep.subr.bf16.mxu1 %v8688_v31  ;;  %v11094_v31 = vsub.s32 %v4480_v30, %v9388_v38  ;;  %v6357_v38 = vld [vmem:[%s11565_s9 + $0x20] sm:$0xff]  }
 0x6b4   :  { %7592 = vmatpush1.bf16.msra.mxu1 %v8690_v50  ;;  %v6365_v50 = vld [vmem:[%s11565_s9 + $0x60] sm:$0xff]  }
 0x6b5   :  { %7594 = vmatprep.subr.bf16.mxu1 %v8691_v22  ;;  %7662 = vmatprep.subr.bf16.mxu0 %v6365_v50 }
 0x6b6   :  { %7664 = vmatpush3.bf16.msra.mxu0 %v6357_v38 }
 0x6b8   :  { %7596 = vmatpush1.bf16.msra.mxu1 %v8693_v10 }
 0x6b9   :  { %7598 = vmatprep.subr.bf16.mxu1 %v8694_v53 }
 0x6bc   :  { %7600 = vmatpush1.bf16.msra.mxu1 %v8696_v17 }
 0x6bd   :  { %7602 = vmatprep.subr.bf16.mxu1 %v8697_v27 }
 0x6c0   :  { %7604 = vmatpush1.bf16.msra.mxu1 %v8699_v54 }
 0x6c1   :  { %7606 = vmatprep.subr.bf16.mxu1 %v8700_v13 }
 0x6c4   :  { %7608 = vmatpush1.bf16.msra.mxu1 %v8702_v36  ;;  %v6412_v36 = vld [vmem:[%s11565_s9 + $0x1d8] sm:$0xff]  }
 0x6c5   :  { %7610 = vmatprep.subr.bf16.mxu1 %v8703_v46 }
 0x6c8   :  { %7612 = vmatpush1.bf16.msra.mxu1 %v8705_v55  ;;  %v6404_v55 = vld [vmem:[%s11565_s9 + $0x198] sm:$0xff]  }
 0x6c9   :  { %7614 = vmatprep.subr.bf16.mxu1 %v8706_v52 }
 0x6cc   :  { %7616 = vmatpush1.bf16.msra.mxu1 %v8708_v60 }
 0x6cd   :  { %7618 = vmatprep.subr.bf16.mxu1 %v8709_v37 }
 0x6d0   :  { %7620 = vmatpush1.bf16.msra.mxu1 %v8711_v20  ;;  %v6369_v20 = vld [vmem:[%s11565_s9 + $0x80] sm:$0xff]  }
 0x6d1   :  { %7622 = vmatprep.subr.bf16.mxu1 %v8712_v26  ;;  %v6366_v26 = vld [vmem:[%s11565_s9 + $0x68] sm:$0xff]  }
 0x6d2   :  { %7666 = vmatprep.subr.bf16.mxu0 %v6366_v26 }
 0x6d4   :  { %7624 = vmatpush1.bf16.msra.mxu1 %v8714_v1 }
 0x6d5   :  { %7626 = vmatprep.subr.bf16.mxu1 %v8715_v42 }
 0x6d8   :  { %7628 = vmatpush1.bf16.msra.mxu1 %v8717_v62  ;;  %v6358_v62 = vld [vmem:[%s11565_s9 + $0x28] sm:$0xff]  }
 0x6d9   :  { %7630 = vmatprep.subr.bf16.mxu1 %v8718_v15  ;;  %7668 = vmatpush3.bf16.msra.mxu0 %v6358_v62 }
 0x6dc   :  { %7632 = vmatpush1.bf16.msra.mxu1 %v8720_v39 }
 0x6dd   :  { %7634 = vmatprep.subr.bf16.mxu1 %v8721_v8  ;;  %v6413_v8 = vld [vmem:[%s11565_s9 + $0x1e0] sm:$0xff]  }
 0x770   :  { %v4164_v59 = vpop.f32.mrb[66].mxu0 }
 0x771   :  { %v6966_v33 = vpop.f32.mrb[67].mxu0 }
 0x772   :  { %v4081_v57 = vpop.f32.mrb[64].mxu1 }
 0x773   :  { %v4083_v2 = vpop.f32.mrb[65].mxu1 }
 0x774   :  { %4365 = vmatprep.mubr.f32.mxu1 %v4083_v2  ;;  %v4169_v24 = vpop.f32.mrb[68].mxu0  ;;  %v6367_v2 = vld [vmem:[%s11565_s9 + $0x70] sm:$0xff]  }
 0x775   :  { %4366 = vmatmul.mubr.f32.vlgmr.msra.gmra.mrb[70].mxu1 %v4081_v57  ;;  %v6969_v18 = vpop.f32.mrb[69].mxu0  ;;  %7670 = vmatprep.subr.bf16.mxu0 %v6367_v2  ;;  %v6442_v2 = vld [vmem:[%s11565_s9 + $0x2c8] sm:$0xff]  }
 0x776   :  { %v4087_v40 = vpop.f32.mrb[66].mxu1  ;;  %7636 = vmatpush1.bf16.msra.mxu1 %v8723_v0  ;;  %v6405_v0 = vld [vmem:[%s11565_s9 + $0x1a0] sm:$0xff]   ;;  %v6359_v18 = vld [vmem:[%s11565_s9 + $0x30] sm:$0xff]  }
 0x777   :  { %v4089_v6 = vpop.f32.mrb[67].mxu1  ;;  %7638 = vmatprep.subr.bf16.mxu1 %v8724_v63  ;;  %7672 = vmatpush3.bf16.msra.mxu0 %v6359_v18 }
 0x778   :  { %4371 = vmatprep.mubr.f32.mxu1 %v4089_v6  ;;  %v4174_v61 = vpop.f32.mrb[70].mxu0  ;;  %v6414_v6 = vld [vmem:[%s11565_s9 + $0x1e8] sm:$0xff]  }
 0x779   :  { %4372 = vmatmul.mubr.f32.gmra.mrb[72].mxu1 %v4087_v40  ;;  %v6972_v34 = vpop.f32.mrb[71].mxu0 }
 0x77a   :  { %v4093_v51 = vpop.f32.mrb[68].mxu1  ;;  %7640 = vmatpush1.bf16.msra.mxu1 %v8726_v49 }
 0x77b   :  { %v4095_v32 = vpop.f32.mrb[69].mxu1  ;;  %7642 = vmatprep.subr.bf16.mxu1 %v8727_v7 }
 0x77c   :  { %4377 = vmatprep.mubr.f32.mxu1 %v4095_v32  ;;  %v6360_v32 = vld [vmem:[%s11565_s9 + $0x38] sm:$0xff]  }
 0x77d   :  { %4378 = vmatmul.mubr.f32.gmra.mrb[74].mxu1 %v4093_v51  ;;  %v6406_v51 = vld [vmem:[%s11565_s9 + $0x1a8] sm:$0xff]  }
 0x77e   :  { %7644 = vmatpush1.bf16.msra.mxu1 %v8729_v43  ;;  %4448 = vmatprep.mubr.f32.mxu1 %v8771_v58  ;;  %v6368_v43 = vld [vmem:[%s11565_s9 + $0x78] sm:$0xff]  }
 0x77f   :  { %7742 = vmatprep.subr.bf16.mxu1 %v6409_v35  ;;  %7674 = vmatprep.subr.bf16.mxu0 %v6368_v43  ;;  %v6407_v35 = vld [vmem:[%s11565_s9 + $0x1b0] sm:$0xff]   ;;  %v6373_v43 = vld [vmem:[%s11565_s9 + $0xa0] sm:$0xff]  }
 0x780   :  { %7676 = vmatpush3.bf16.msra.mxu0 %v6360_v32  ;;  %v6382_v32 = vld [vmem:[%s11565_s9 + $0xe8] sm:$0xff]  }
 0x781   :  { %5943 = vmatmul.mubr.msk.f32.vlgmr.msra.gmra.mrb[70].mxu1 %vm2371_vm12, %v4164_v59  ;;  %7678 = vmatprep.subr.bf16.mxu0 %v6377_v16  ;;  %v6374_v16 = vld [vmem:[%s11565_s9 + $0xa8] sm:$0xff]  }
 0x782   :  { %4454 = vmatprep.mubr.f32.mxu1 %v8771_v58  ;;  %7744 = vmatpush3.bf16.msra.mxu1 %v6401_v11  ;;  %v6416_v11 = vld [vmem:[%s11565_s9 + $0x1f8] sm:$0xff]  }
 0x783   :  { %7746 = vmatprep.subr.bf16.mxu1 %v6410_v3 }
 0x785   :  { %5944 = vmatmul.mubr.msk.f32.gmra.mrb[72].mxu1 %vm2371_vm12, %v4169_v24 }
 0x786   :  { %4460 = vmatprep.mubr.f32.mxu1 %v8771_v58  ;;  %7748 = vmatpush3.bf16.msra.mxu1 %v6402_v28  ;;  %v6439_v28 = vld [vmem:[%s11565_s9 + $0x2b0] sm:$0xff]  }
 0x787   :  { %7750 = vmatprep.subr.bf16.mxu1 %v6411_v47 }
 0x789   :  { %5945 = vmatmul.mubr.msk.f32.gmra.mrb[74].mxu1 %vm2371_vm12, %v4174_v61  ;;  %vm11116_vm12 = vmor %vm4486_vm9, %vm2038_vm14  ;;  %vm4507_vm14 = vcmask 1041664  }
 0x78a   :  { %7752 = vmatpush3.bf16.msra.mxu1 %v6403_v41 }
 0x78b   :  { %7754 = vmatprep.subr.bf16.mxu1 %v6412_v36 }
 0x78e   :  { %7756 = vmatpush3.bf16.msra.mxu1 %v6404_v55 }
 0x78f   :  { %7758 = vmatprep.subr.bf16.mxu1 %v6413_v8 }
 0x792   :  { %7760 = vmatpush3.bf16.msra.mxu1 %v6405_v0  ;;  %v6433_v0 = vld [vmem:[%s11565_s9 + $0x280] sm:$0xff]  }
 0x793   :  { %7762 = vmatprep.subr.bf16.mxu1 %v6414_v6  ;;  %v6443_v6 = vld [vmem:[%s11565_s9 + $0x2d0] sm:$0xff]  }
 0x796   :  { %7764 = vmatpush3.bf16.msra.mxu1 %v6406_v51  ;;  %v6444_v51 = vld [vmem:[%s11565_s9 + $0x2d8] sm:$0xff]  }
 0x797   :  { %7766 = vmatprep.subr.bf16.mxu1 %v6415_v44  ;;  %v6445_v44 = vld [vmem:[%s11565_s9 + $0x2e0] sm:$0xff]  }
 0x79a   :  { %7768 = vmatpush3.bf16.msra.mxu1 %v6407_v35  ;;  %v6383_v35 = vld [vmem:[%s11565_s9 + $0xf0] sm:$0xff]  }
 0x79b   :  { %7770 = vmatprep.subr.bf16.mxu1 %v6416_v11  ;;  %v6437_v11 = vld [vmem:[%s11565_s9 + $0x2a0] sm:$0xff]  }
 0x79e   :  { %7772 = vmatpush3.bf16.msra.mxu1 %v6408_v19  ;;  %v6375_v19 = vld [vmem:[%s11565_s9 + $0xb0] sm:$0xff]  }
 0x79f   :  { %7806 = vmatprep.subr.bf16.mxu1 %v6441_v29  ;;  %v6384_v29 = vld [vmem:[%s11565_s9 + $0xf8] sm:$0xff]  }
 0x854   :  { %v4450_v21 = vpop.f32.mrb[70].mxu1 }
 0x855   :  { %4467 = vst [vmem:[#allocation7] sm:$0xff] %v4450_v21  ;;  %v4452_v4 = vpop.f32.mrb[71].mxu1  ;;  %v6393_v21 = vld [vmem:[%s11565_s9 + $0x140] sm:$0xff]  }
 0x856   :  { %4468 = vst.msk [vmem:[#allocation7 + $0x8] sm:$0xff] %vm1221_vm8, %v4452_v4 }
 0x858   :  { %v4456_v45 = vpop.f32.mrb[72].mxu1 }
 0x859   :  { %4469 = vst [vmem:[#allocation7 + $0x10] sm:$0xff] %v4456_v45  ;;  %v4458_v48 = vpop.f32.mrb[73].mxu1 }
 0x85a   :  { %4470 = vst.msk [vmem:[#allocation7 + $0x18] sm:$0xff] %vm1221_vm8, %v4458_v48 }
 0x85c   :  { %v4462_v22 = vpop.f32.mrb[74].mxu1 }
 0x85d   :  { %4471 = vst [vmem:[#allocation7 + $0x20] sm:$0xf] %v4462_v22  ;;  %v4464_v10 = vpop.f32.mrb[75].mxu1  ;;  %v8730_v53 = vld [vmem:[#allocation7 + $0x4] ss:$8 sps:$4 sm:$0x33]  }
 0x85e   :  { %4472 = vst.msk [vmem:[#allocation7 + $0x28] sm:$0xf] %vm2323_vm6, %v4464_v10  ;;  %v8731_v17 = vld [vmem:[#allocation7] ss:$8 sps:$4 sm:$0xcc]   ;;  %v4522_v27 = vrot.slane %v8730_v53, %v11094_v31  ;;  %vm4508_vm6 = vcmask 519170  }
 0x85f   :  { %v4500_v54 = vrot.slane %v8731_v17, %v11094_v31  ;;  %v8732_v13 = vld [vmem:[#allocation7 + $0x4] ss:$8 sps:$4 sm:$0xcc]   ;;  %v8737_v57 = vld [vmem:[#allocation7] ss:$8 sps:$4 sm:$0x33]   ;;  %vm11184_vm13 = vmor %vm4508_vm6, %vm4507_vm14 }
 0x860   :  { %4523 = vrot.lane.b32.xlu0 %v4522_v27, %s8777_s27  ;;  %v4543_v60 = vrot.slane %v8732_v13, %v11094_v31  ;;  %v4484_v63 = vrot.slane %v8737_v57, %v11094_v31 }
 0x861   :  { %v8733_v46 = vld [vmem:[#allocation7 + $0x10] ss:$8 sps:$4 sm:$0xcc]   ;;  %v4501_v52 = vcombine.high %v4500_v54, %v4500_v54  ;;  %v8734_v1 = vld [vmem:[#allocation7 + $0x14] ss:$8 sps:$4 sm:$0x33]  }
 0x862   :  { %v4580_v37 = vrot.slane %v8733_v46, %v11094_v31  ;;  %v8735_v42 = vld [vmem:[#allocation7 + $0x14] ss:$8 sps:$4 sm:$0xcc]   ;;  %v4544_v59 = vcombine.high %v4543_v60, %v4543_v60  ;;  %v8738_v24 = vld [vmem:[#allocation7 + $0x10] ss:$8 sps:$4 sm:$0x33]   ;;  %v4599_v7 = vrot.slane %v8734_v1, %v11094_v31 }
 0x863   :  { %4502 = vrot.lane.b32.xlu1 %v4501_v52, %s8776_s26  ;;  %v4617_v33 = vrot.slane %v8735_v42, %v11094_v31  ;;  %4488 = vst.msk [vmem:[#allocation8] sm:$0xf] %vm11116_vm12, %v4484_v63  ;;  %v4566_v34 = vrot.slane %v8738_v24, %v11094_v31  ;;  %v6378_v42 = vld [vmem:[%s11565_s9 + $0xc8] sm:$0xff]   ;;  %v6371_v24 = vld [vmem:[%s11565_s9 + $0x90] sm:$0xff]  }
 0x864   :  { %v4581_v15 = vcombine.high %v4580_v37, %v4580_v37 }
 0x865   :  { %v8736_v39 = vld [vmem:[#allocation7 + $0x20] ss:$8 sps:$4 sm:$0xcc]   ;;  %v4618_v40 = vcombine.high %v4617_v33, %v4617_v33  ;;  %v8739_v49 = vld [vmem:[#allocation7 + $0x20] ss:$8 sps:$4 sm:$0x33]  }
 0x866   :  { %4582 = vrot.lane.b32.xlu0 %v4581_v15, %s8776_s26  ;;  %v4650_v61 = vrot.slane %v8736_v39, %v11094_v31  ;;  %v4636_v9 = vrot.slane %v8739_v49, %v11094_v31  ;;  %4568 = vst.msk [vmem:[#allocation8 + $0xa] sm:$0xf] %vm11116_vm12, %v4566_v34  ;;  %v6370_v39 = vld [vmem:[%s11565_s9 + $0x88] sm:$0xff]   ;;  %v6379_v33 = vld [vmem:[%s11565_s9 + $0xd0] sm:$0xff]  }
 0x867   :  { %4545 = vrot.lane.b32.xlu1 %v4544_v59, %s8782_s8  ;;  %v6434_v49 = vld [vmem:[%s11565_s9 + $0x288] sm:$0xff]   ;;  %v6435_v34 = vld [vmem:[%s11565_s9 + $0x290] sm:$0xff]  }
 0x868   :  { %4638 = vst.msk [vmem:[#allocation8 + $0x14] sm:$0xf] %vm11116_vm12, %v4636_v9  ;;  %v4651_v3 = vcombine.high %v4650_v61, %v4650_v61  ;;  %v6381_v61 = vld [vmem:[%s11565_s9 + $0xe0] sm:$0xff]   ;;  %v6436_v9 = vld [vmem:[%s11565_s9 + $0x298] sm:$0xff]  }
 0x86a   :  { %4619 = vrot.lane.b32.xlu0 %v4618_v40, %s8782_s8  ;;  %v6380_v40 = vld [vmem:[%s11565_s9 + $0xd8] sm:$0xff]  }
 0x86b   :  { %4600 = vrot.lane.b32.xlu1 %v4599_v7, %s8777_s27  ;;  %v6372_v7 = vld [vmem:[%s11565_s9 + $0x98] sm:$0xff]  }
 0x86f   :  { %4652 = vrot.lane.b32.xlu1 %v4651_v3, %s8776_s26  ;;  %v6446_v3 = vld [vmem:[%s11565_s9 + $0x2e8] sm:$0xff]  }
 0x8d2   :  { %v4524_v25 = vpop.permute.xlu0 %4523 }
 0x8d3   :  { %v4525_v14 = vrot.slane %v4524_v25, 6 }
 0x8d5   :  { %v4503_v12 = vpop.permute.xlu1 %4502  ;;  %v4526_v45 = vsel %vm2425_vm4, %v4525_v14, %v4524_v25  ;;  %v6438_v25 = vld [vmem:[%s11565_s9 + $0x2a8] sm:$0xff]   ;;  %v6447_v14 = vld [vmem:[%s11565_s9 + $0x2f0] sm:$0xff]  }
 0x8d6   :  { %v4504_v4 = vrot.slane %v4503_v12, 6 }
 0x8d8   :  { %v4505_v23 = vsel %vm1221_vm8, %v4504_v4, %v4503_v12  ;;  %v4583_v30 = vpop.permute.xlu0 %4582  ;;  %v6376_v12 = vld [vmem:[%s11565_s9 + $0xb8] sm:$0xff]  }
 0x8d9   :  { %4510 = vst.msk [vmem:[#allocation8 + $0x2] sm:$0xf] %vm11184_vm13, %v4505_v23  ;;  %v4546_v48 = vpop.permute.xlu1 %4545  ;;  %v4584_v56 = vrot.slane %v4583_v30, 6  ;;  %v6448_v23 = vld [vmem:[%s11565_s9 + $0x2f8] sm:$0xff]  }
 0x8da   :  { %4531 = vst.msk [vmem:[#allocation8 + $0x4] sm:$0xf] %vm11188_vm2, %v4526_v45  ;;  %v4547_v47 = vrot.slane %v4546_v48, 6 }
 0x8db   :  { %v4585_v41 = vsel %vm1221_vm8, %v4584_v56, %v4583_v30  ;;  %v6385_v30 = vld [vmem:[%s11565_s9 + $0x100] sm:$0xff]   ;;  %v6440_v56 = vld [vmem:[%s11565_s9 + $0x2b8] sm:$0xff]  }
 0x8dc   :  { %v4549_v50 = vsel %vm4548_vm5, %v4547_v47, %v4546_v48  ;;  %4587 = vst.msk [vmem:[#allocation8 + $0xc] sm:$0xf] %vm11184_vm13, %v4585_v41  ;;  %v4620_v22 = vpop.permute.xlu0 %4619  ;;  %v6394_v48 = vld [vmem:[%s11565_s9 + $0x148] sm:$0xff]   ;;  %v6395_v41 = vld [vmem:[%s11565_s9 + $0x150] sm:$0xff]  }
 0x8dd   :  { %4554 = vst.msk [vmem:[#allocation8 + $0x6] sm:$0xf] %vm4553_vm7, %v4549_v50  ;;  %v4601_v10 = vpop.permute.xlu1 %4600  ;;  %v4621_v53 = vrot.slane %v4620_v22, 6  ;;  %v6386_v47 = vld [vmem:[%s11565_s9 + $0x108] sm:$0xff]   ;;  %v6387_v50 = vld [vmem:[%s11565_s9 + $0x110] sm:$0xff]  }
 0x8de   :  { %v4602_v17 = vrot.slane %v4601_v10, 6 }
 0x8df   :  { %v4622_v38 = vsel %vm4548_vm5, %v4621_v53, %v4620_v22  ;;  %v6396_v22 = vld [vmem:[%s11565_s9 + $0x158] sm:$0xff]   ;;  %v6397_v53 = vld [vmem:[%s11565_s9 + $0x160] sm:$0xff]  }
 0x8e0   :  { %v4603_v27 = vsel %vm2425_vm4, %v4602_v17, %v4601_v10  ;;  %v6388_v10 = vld [vmem:[%s11565_s9 + $0x118] sm:$0xff]   ;;  %v6389_v17 = vld [vmem:[%s11565_s9 + $0x120] sm:$0xff]  }
 0x8e1   :  { %4605 = vst.msk [vmem:[#allocation8 + $0xe] sm:$0xf] %vm11188_vm2, %v4603_v27  ;;  %v4653_v54 = vpop.permute.xlu1 %4652  ;;  %v6390_v27 = vld [vmem:[%s11565_s9 + $0x128] sm:$0xff]  }
 0x8e2   :  { %4624 = vst.msk [vmem:[#allocation8 + $0x10] sm:$0xf] %vm4553_vm7, %v4622_v38  ;;  %v4654_v13 = vrot.slane %v4653_v54, 6  ;;  %v6398_v38 = vld [vmem:[%s11565_s9 + $0x168] sm:$0xff]  }
 0x8e4   :  { %v4655_v36 = vsel %vm1221_vm8, %v4654_v13, %v4653_v54  ;;  %v4658_v46 = vld [vmem:[#allocation8] sm:$0xff]  ;;  %v6399_v54 = vld [vmem:[%s11565_s9 + $0x170] sm:$0xff]   ;;  %vm5658_vm8 = vcmask 982016  }
 0x8e5   :  { %4657 = vst.msk [vmem:[#allocation8 + $0x16] sm:$0xf] %vm11184_vm13, %v4655_v36  ;;  %v5080_v55 = vrot.slane %v4658_v46, %v11094_v31  ;;  %v5073_v52 = vcombine.high %v4658_v46, %v4658_v46  ;;  %v6391_v13 = vld [vmem:[%s11565_s9 + $0x130] sm:$0xff]   ;;  %v6400_v36 = vld [vmem:[%s11565_s9 + $0x178] sm:$0xff]  }
 0x8e6   :  { %v6392_v46 = vld [vmem:[%s11565_s9 + $0x138] sm:$0xff]  }
 0x8e7   :  { %v5088_v60 = vcombine.high %v5080_v55, %v5080_v55  ;;  %v11209_v37 = vrot.slane %v5073_v52, %v11094_v31 }
 0x8e8   :  { %v11214_v26 = vld [vmem:[#allocation8 + $0x8] sm:$0xff] }
 0x8e9   :  { %5209 = vmatprep.mubr.f32.mxu0 %v5088_v60  ;;  %v5089_v1 = vcombine.high %v11209_v37, %v11209_v37  ;;  %v5090_v62 = vcombine.high %v11214_v26, %v11214_v26  ;;  %v5097_v4 = vrot.slane %v11214_v26, %v11094_v31  ;;  %v6417_v60 = vld [vmem:[%s11565_s9 + $0x200] sm:$0xff]   ;;  %v6418_v26 = vld [vmem:[%s11565_s9 + $0x208] sm:$0xff]  }
 0x8ea   :  { %5210 = vmatmul.mubr.f32.vlgmr.msra.gmra.mrb[72].mxu0 %v5080_v55  ;;  %v6425_v55 = vld [vmem:[%s11565_s9 + $0x240] sm:$0xff]  }
 0x8eb   :  { %7680 = vmatpush3.bf16.msra.mxu0 %v6369_v20  ;;  %5279 = vmatprep.mubr.f32.mxu0 %v5089_v1  ;;  %v5104_v15 = vrot.slane %v5090_v62, %v11094_v31  ;;  %v5105_v45 = vcombine.high %v5097_v4, %v5097_v4  ;;  %v6426_v20 = vld [vmem:[%s11565_s9 + $0x248] sm:$0xff]   ;;  %v6419_v1 = vld [vmem:[%s11565_s9 + $0x210] sm:$0xff]   ;;  %v6420_v62 = vld [vmem:[%s11565_s9 + $0x218] sm:$0xff]  }
 0x8ec   :  { %7682 = vmatprep.subr.bf16.mxu0 %v6378_v42  ;;  %v11227_v8 = vld [vmem:[#allocation8 + $0x10] sm:$0xff]  ;;  %v6428_v42 = vld [vmem:[%s11565_s9 + $0x258] sm:$0xff]  }
 0x8ed   :  { %v5106_v59 = vcombine.high %v5104_v15, %v5104_v15  ;;  %v5107_v57 = vcombine.high %v11227_v8, %v11227_v8  ;;  %v5114_v52 = vrot.slane %v11227_v8, %v11094_v31  ;;  %v6430_v8 = vld [vmem:[%s11565_s9 + $0x268] sm:$0xff]  }
 0x8ef   :  { %7684 = vmatpush3.bf16.msra.mxu0 %v6370_v39  ;;  %5419 = vmatprep.mubr.f32.mxu1 %v5106_v59  ;;  %v11241_v63 = vrot.slane %v5107_v57, %v11094_v31  ;;  %v6427_v31 = vld [vmem:[%s11565_s9 + $0x250] sm:$0xff]   ;;  %v6421_v39 = vld [vmem:[%s11565_s9 + $0x220] sm:$0xff]   ;;  %v6422_v59 = vld [vmem:[%s11565_s9 + $0x228] sm:$0xff]  }
 0x8f0   :  { %5420 = vmatmul.mubr.f32.vlgmr.msra.gmra.mrb[76].mxu1 %v5104_v15  ;;  %7686 = vmatprep.subr.bf16.mxu0 %v6379_v33  ;;  %v6429_v15 = vld [vmem:[%s11565_s9 + $0x260] sm:$0xff]   ;;  %v6431_v33 = vld [vmem:[%s11565_s9 + $0x270] sm:$0xff]  }
 0x8f1   :  { %7808 = vmatpush3.bf16.msra.mxu1 %v6433_v0  ;;  %v5123_v18 = vcombine.high %v11241_v63, %v11241_v63  ;;  %v6423_v57 = vld [vmem:[%s11565_s9 + $0x230] sm:$0xff]   ;;  %v6432_v0 = vld [vmem:[%s11565_s9 + $0x278] sm:$0xff]  }
 0x8f2   :  { %7810 = vmatprep.subr.bf16.mxu1 %v6442_v2  ;;  %v6424_v2 = vld [vmem:[%s11565_s9 + $0x238] sm:$0xff]  }
 0x8f3   :  { %7688 = vmatpush3.bf16.msra.mxu0 %v6371_v24  ;;  %5559 = vmatprep.mubr.f32.mxu1 %v5123_v18  ;;  %v6450_v24 = vld [vmem:[%s11565_s9 + $0x308] sm:$0xff]   ;;  %v6451_v18 = vld [vmem:[%s11565_s9 + $0x310] sm:$0xff]  }
 0x8f4   :  { %7690 = vmatprep.subr.bf16.mxu0 %v6380_v40  ;;  %v6452_v40 = vld [vmem:[%s11565_s9 + $0x318] sm:$0xff]  }
 0x8f5   :  { %7812 = vmatpush3.bf16.msra.mxu1 %v6434_v49  ;;  %v5947_v49 = vld.sshfl [vmem:[#allocation8 + $0x18] sm:$0x3 pattern:$0x76325410] }
 0x8f6   :  { %7814 = vmatprep.subr.bf16.mxu1 %v6443_v6  ;;  %v5636_v6 = vld [vmem:[%s11567_s11] sm:$0xff] }
 0x8f7   :  { %7692 = vmatpush3.bf16.msra.mxu0 %v6372_v7  ;;  %v5637_v7 = vld [vmem:[%s11567_s11 + $0x8] sm:$0xff] }
 0x8f8   :  { %7694 = vmatprep.subr.bf16.mxu0 %v6381_v61  ;;  %v5638_v61 = vld [vmem:[%s11567_s11 + $0x10] sm:$0xff] }
 0x8f9   :  { %7816 = vmatpush3.bf16.msra.mxu1 %v6435_v34  ;;  %v7850_v34 = vpack.c.bf16 %v5637_v7, %v5636_v6  ;;  %v5741_v6 = vld [vmem:[%s11569_s13 + $0x40] sm:$0xff]  ;;  %v5742_v7 = vld [vmem:[%s11569_s13 + $0x48] sm:$0xff] }
 0x8fa   :  { %7818 = vmatprep.subr.bf16.mxu1 %v6444_v51  ;;  %v5639_v51 = vld [vmem:[%s11567_s11 + $0x18] sm:$0xff] }
 0x8fb   :  { %7696 = vmatpush3.bf16.msra.mxu0 %v6373_v43  ;;  %v7853_v43 = vpack.c.bf16 %v5639_v51, %v5638_v61  ;;  %v7883_v61 = vpack.c.bf16 %v5742_v7, %v5741_v6  ;;  %v5949_v51 = vld [vmem:[%s11568_s12] ss:$0 sm:$0xff] }
 0x8fc   :  { %7698 = vmatprep.subr.bf16.mxu0 %v6382_v32  ;;  %v5640_v32 = vld [vmem:[%s11567_s11 + $0x20] sm:$0xff] }
 0x8fd   :  { %7820 = vmatpush3.bf16.msra.mxu1 %v6436_v9  ;;  %v5641_v9 = vld [vmem:[%s11567_s11 + $0x28] sm:$0xff] }
 0x8fe   :  { %7822 = vmatprep.subr.bf16.mxu1 %v6445_v44  ;;  %v7856_v44 = vpack.c.bf16 %v5641_v9, %v5640_v32 }
 0x8ff   :  { %7700 = vmatpush3.bf16.msra.mxu0 %v6374_v16  ;;  %v5642_v16 = vld [vmem:[%s11567_s11 + $0x30] sm:$0xff] }
 0x900   :  { %7702 = vmatprep.subr.bf16.mxu0 %v6383_v35  ;;  %v5643_v35 = vld [vmem:[%s11567_s11 + $0x38] sm:$0xff] }
 0x901   :  { %7824 = vmatpush3.bf16.msra.mxu1 %v6437_v11  ;;  %v5644_v11 = vld [vmem:[%s11567_s11 + $0x40] sm:$0xff] }
 0x902   :  { %7826 = vmatprep.subr.bf16.mxu1 %v6446_v3  ;;  %v7859_v3 = vpack.c.bf16 %v5643_v35, %v5642_v16 }
 0x903   :  { %7704 = vmatpush3.bf16.msra.mxu0 %v6375_v19  ;;  %v5645_v19 = vld [vmem:[%s11567_s11 + $0x48] sm:$0xff] }
 0x904   :  { %7706 = vmatprep.subr.bf16.mxu0 %v6384_v29  ;;  %v7862_v29 = vpack.c.bf16 %v5645_v19, %v5644_v11 }
 0x905   :  { %7828 = vmatpush3.bf16.msra.mxu1 %v6438_v25  ;;  %v5646_v25 = vld [vmem:[%s11567_s11 + $0x50] sm:$0xff] }
 0x906   :  { %7830 = vmatprep.subr.bf16.mxu1 %v6447_v14  ;;  %v5647_v14 = vld [vmem:[%s11567_s11 + $0x58] sm:$0xff] }
 0x907   :  { %7708 = vmatpush3.bf16.msra.mxu0 %v6376_v12  ;;  %v7865_v12 = vpack.c.bf16 %v5647_v14, %v5646_v25 }
 0x908   :  { %7710 = vmatprep.subr.bf16.mxu0 %v6393_v21  ;;  %v5648_v21 = vld [vmem:[%s11567_s11 + $0x60] sm:$0xff] }
 0x909   :  { %7832 = vmatpush3.bf16.msra.mxu1 %v6439_v28 }
 0x90a   :  { %5280 = vmatmul.mubr.f32.vlgmr.msra.gmra.mrb[74].mxu0 %v11209_v37  ;;  %7834 = vmatprep.subr.bf16.mxu1 %v6448_v23  ;;  %v5122_v37 = vcombine.high %v5114_v52, %v5114_v52  ;;  %v5733_v23 = vld [vmem:[%s11569_s13] sm:$0xff] }
 0x90b   :  { %7712 = vmatpush3.bf16.msra.mxu0 %v6385_v30  ;;  %5349 = vmatprep.mubr.f32.mxu0 %v5105_v45  ;;  %v5734_v30 = vld [vmem:[%s11569_s13 + $0x8] sm:$0xff]  ;;  %v5735_v45 = vld [vmem:[%s11569_s13 + $0x10] sm:$0xff] }
 0x90c   :  { %7714 = vmatprep.subr.bf16.mxu0 %v6394_v48  ;;  %v7871_v48 = vpack.c.bf16 %v5734_v30, %v5733_v23 }
 0x90d   :  { %7836 = vmatpush3.bf16.msra.mxu1 %v6440_v56  ;;  %v5736_v56 = vld [vmem:[%s11569_s13 + $0x18] sm:$0xff] }
 0x90e   :  { %7849 = vmatprep.subr.bf16.mxu1 %v8778_v5 }
 0x90f   :  { %7716 = vmatpush3.bf16.msra.mxu0 %v6386_v47  ;;  %v5650_v47 = vld [vmem:[%s11567_s11 + $0x70] sm:$0xff] }
 0x910   :  { %5560 = vmatmul.mubr.f32.vlgmr.msra.gmra.mrb[78].mxu1 %v11241_v63  ;;  %7718 = vmatprep.subr.bf16.mxu0 %v6395_v41  ;;  %v6449_v63 = vld [vmem:[%s11565_s9 + $0x300] sm:$0xff]   ;;  %v7874_v41 = vpack.c.bf16 %v5736_v56, %v5735_v45  ;;  %s8783_s9 = smov [#allocation9]  }
 0x911   :  { %7022 = vmatprep.mubr.msk.f32.mxu1 %vm8780_vm3, %v8771_v58  ;;  %7851 = vmatpush3.bf16.msra.mxu1 %v7850_v34  ;;  %v5743_v34 = vld [vmem:[%s11569_s13 + $0x50] sm:$0xf]  ;;  %s5836_s16 = sshll.u32 %s8783_s9, 4  ;;  %s5837_s16 = int_to_ptr.vmem [resolvable:$true] %s5836_s16 }
 0x912   :  { %7852 = vmatprep.subr.bf16.mxu1 %v8778_v5  ;;  %p8748_p1 = scmp.lt.s32.totalorder %s5837_s16, %s5837_s16 }
 0x913   :  { %7720 = vmatpush3.bf16.msra.mxu0 %v6387_v50  ;;  %v5737_v50 = vld [vmem:[%s11569_s13 + $0x20] sm:$0xff] }
 0x914   :  { %7722 = vmatprep.subr.bf16.mxu0 %v6396_v22  ;;  %v5738_v22 = vld [vmem:[%s11569_s13 + $0x28] sm:$0xff] }
 0x915   :  { %7854 = vmatpush3.bf16.msra.mxu1 %v7853_v43 }
 0x916   :  { %7855 = vmatprep.subr.bf16.mxu1 %v8778_v5 }
 0x917   :  { %7724 = vmatpush3.bf16.msra.mxu0 %v6388_v10  ;;  %v7877_v10 = vpack.c.bf16 %v5738_v22, %v5737_v50 }
 0x918   :  { %7726 = vmatprep.subr.bf16.mxu0 %v6397_v53  ;;  %v5739_v53 = vld [vmem:[%s11569_s13 + $0x30] sm:$0xff] }
 0x919   :  { %7857 = vmatpush3.bf16.msra.mxu1 %v7856_v44 }
 0x91a   :  { %7858 = vmatprep.subr.bf16.mxu1 %v8778_v5 }
 0x91b   :  { %7728 = vmatpush3.bf16.msra.mxu0 %v6389_v17  ;;  %v5740_v17 = vld [vmem:[%s11569_s13 + $0x38] sm:$0xff]  ;;  %s8743_s13 = scalar_lea.vmem %s5837_s16, 32 }
 0x91c   :  { %7730 = vmatprep.subr.bf16.mxu0 %v6398_v38  ;;  %p8744_p0 = scmp.ne.s32.totalorder %s5837_s16, %s8743_s13  ;;  %p8749_p2 = scmp.lt.s32.totalorder %s8743_s13, %s8743_s13 }
 0x91d   :  { %7860 = vmatpush3.bf16.msra.mxu1 %v7859_v3 }
 0x91e   :  { %7861 = vmatprep.subr.bf16.mxu1 %v8778_v5  ;;  %p8750_p3 = por %p8749_p2, %p8748_p1 }
 0x91f   :  { %7732 = vmatpush3.bf16.msra.mxu0 %v6390_v27  ;;  %v7880_v27 = vpack.c.bf16 %v5740_v17, %v5739_v53 }
 0x920   :  { %7734 = vmatprep.subr.bf16.mxu0 %v6399_v54  ;;  %p8751_p4 = pnand %p8750_p3, %p8744_p0 }
 0x921   :  { %7863 = vmatpush3.bf16.msra.mxu1 %v7862_v29 }
 0x922   :  { %7864 = vmatprep.subr.bf16.mxu1 %v8778_v5 }
 0x923   :  { %7736 = vmatpush3.bf16.msra.mxu0 %v6391_v13 }
 0x924   :  { %7738 = vmatprep.subr.bf16.mxu0 %v6400_v36 }
 0x925   :  { %7866 = vmatpush3.bf16.msra.mxu1 %v7865_v12 }
 0x926   :  { %7867 = vmatprep.subr.bf16.mxu1 %v8778_v5 }
 0x927   :  { %7740 = vmatpush3.bf16.msra.mxu0 %v6392_v46 }
 0x928   :  { %7774 = vmatprep.subr.bf16.mxu0 %v6425_v55 }
 0x92a   :  { %5350 = vmatmul.mubr.f32.vlgmr.msra.gmra.mrb[76].mxu0 %v5097_v4  ;;  %v5649_v4 = vld [vmem:[%s11567_s11 + $0x68] sm:$0xff] }
 0x92b   :  { %7776 = vmatpush3.bf16.msra.mxu0 %v6417_v60  ;;  %5489 = vmatprep.mubr.f32.mxu0 %v5122_v37  ;;  %v7868_v28 = vpack.c.bf16 %v5649_v4, %v5648_v21 }
 0x92c   :  { %7778 = vmatprep.subr.bf16.mxu0 %v6426_v20 }
 0x92d   :  { %7869 = vmatpush3.bf16.msra.mxu1 %v7868_v28 }
 0x92e   :  { %7020 = vmatprep.subr.mxu1 %v8771_v58 }
 0x92f   :  { %7780 = vmatpush3.bf16.msra.mxu0 %v6418_v26 }
 0x930   :  { %7782 = vmatprep.subr.bf16.mxu0 %v6427_v31 }
 0x931   :  { %7021 = vmatpush3.msra.mxu1 %v5650_v47 }
 0x933   :  { %7784 = vmatpush3.bf16.msra.mxu0 %v6419_v1 }
 0x934   :  { %7786 = vmatprep.subr.bf16.mxu0 %v6428_v42 }
 0x937   :  { %7788 = vmatpush3.bf16.msra.mxu0 %v6420_v62 }
 0x938   :  { %7790 = vmatprep.subr.bf16.mxu0 %v6429_v15 }
 0x93b   :  { %7792 = vmatpush3.bf16.msra.mxu0 %v6421_v39 }
 0x93c   :  { %7794 = vmatprep.subr.bf16.mxu0 %v6430_v8 }
 0x93f   :  { %7796 = vmatpush3.bf16.msra.mxu0 %v6422_v59 }
 0x940   :  { %7798 = vmatprep.subr.bf16.mxu0 %v6431_v33 }
 0x943   :  { %7800 = vmatpush3.bf16.msra.mxu0 %v6423_v57 }
 0x944   :  { %7802 = vmatprep.subr.bf16.mxu0 %v6432_v0 }
 0x947   :  { %7804 = vmatpush3.bf16.msra.mxu0 %v6424_v2 }
 0x948   :  { %7837 = vmatprep.subr.bf16.mxu0 %v8778_v5 }
 0x94a   :  { %5490 = vmatmul.mubr.f32.vlgmr.msra.gmra.mrb[78].mxu0 %v5114_v52  ;;  %v5946_v52 = vld [vmem:[%s11566_s10] ss:$0 sm:$0xff] }
 0x94b   :  { %7839 = vmatpush3.bf16.msra.mxu0 %v6449_v63  ;;  %6989 = vmatprep.mubr.msk.f32.mxu0 %vm8780_vm3, %v8771_v58 }
 0x94c   :  { %7840 = vmatprep.subr.bf16.mxu0 %v8778_v5 }
 0x94f   :  { %7842 = vmatpush3.bf16.msra.mxu0 %v6450_v24 }
 0x950   :  { %7843 = vmatprep.subr.bf16.mxu0 %v8778_v5 }
 0x953   :  { %7845 = vmatpush3.bf16.msra.mxu0 %v6451_v18 }
 0x954   :  { %7846 = vmatprep.subr.bf16.mxu0 %v8778_v5 }
 0x957   :  { %7848 = vmatpush3.bf16.msra.mxu0 %v6452_v40 }
 0x958   :  { %7870 = vmatprep.subr.bf16.mxu0 %v8778_v5 }
 0x95a   :  { %6990 = vmatmul.mubr.msk.f32.vlgmr.msra.gmra.mrb[80].mxu0 %vm2425_vm4, %v5947_v49  ;;  %vm5751_vm4 = vcmask 687104  }
 0x95b   :  { %7047 = vmatprep.mubr.msk.f32.mxu0 %vm8780_vm3, %v8771_v58  ;;  %7872 = vmatpush3.bf16.msra.mxu0 %v7871_v48  ;;  %vm5828_vm3 = vcmask 74752  }
 0x95c   :  { %7873 = vmatprep.subr.bf16.mxu0 %v8778_v5 }
 0x95f   :  { %7875 = vmatpush3.bf16.msra.mxu0 %v7874_v41 }
 0x960   :  { %7876 = vmatprep.subr.bf16.mxu0 %v8778_v5 }
 0x963   :  { %7878 = vmatpush3.bf16.msra.mxu0 %v7877_v10 }
 0x964   :  { %7879 = vmatprep.subr.bf16.mxu0 %v8778_v5 }
 0x967   :  { %7881 = vmatpush3.bf16.msra.mxu0 %v7880_v27 }
 0x968   :  { %7882 = vmatprep.subr.bf16.mxu0 %v8778_v5 }
 0x96b   :  { %7884 = vmatpush3.bf16.msra.mxu0 %v7883_v61 }
 0x96c   :  { %7045 = vmatprep.subr.mxu0 %v8771_v58  ;;  %v5951_v58 = vld [vmem:[%s11570_s14] ss:$0 sm:$0xff] }
 0x96f   :  { %7046 = vmatpush3.msk.msra.mxu0 %vm649_vm1, %v5743_v34 }
 0x9bd   :  { %v6686_v38 = vpop.f32.mrb[72].mxu0 }
 0x9be   :  { %v6687_v54 = vpop.f32.mrb[73].mxu0 }
 0x9bf   :  { %v6688_v13 = vadd.f32 %v6687_v54, %v6686_v38 }
 0x9c1   :  { %v5212_v20 = vadd.f32 %v6688_v13, %v5946_v52 }
 0x9c3   :  { %v6791_v36 = vpop.f32.mrb[76].mxu1 }
 0x9c4   :  { %v6792_v46 = vpop.f32.mrb[77].mxu1 }
 0x9c5   :  { %v6793_v55 = vadd.f32 %v6792_v46, %v6791_v36 }
 0x9dd   :  { %v6721_v60 = vpop.f32.mrb[74].mxu0 }
 0x9de   :  { %v6722_v37 = vpop.f32.mrb[75].mxu0 }
 0x9df   :  { %v6723_v26 = vadd.f32 %v6722_v37, %v6721_v60 }
 0x9e1   :  { %v5282_v31 = vadd.f32 %v6723_v26, %v5212_v20 }
 0x9e3   :  { %v6861_v1 = vpop.f32.mrb[78].mxu1 }
 0x9e4   :  { %v6862_v42 = vpop.f32.mrb[79].mxu1 }
 0x9e5   :  { %v6863_v62 = vadd.f32 %v6862_v42, %v6861_v1 }
 0x9fd   :  { %v6756_v15 = vpop.f32.mrb[76].mxu0 }
 0x9fe   :  { %v6757_v39 = vpop.f32.mrb[77].mxu0 }
 0x9ff   :  { %v6758_v8 = vadd.f32 %v6757_v39, %v6756_v15 }
 0xa01   :  { %v5352_v59 = vadd.f32 %v6758_v8, %v5282_v31 }
 0xa03   :  { %v5422_v5 = vadd.f32 %v6793_v55, %v5352_v59 }
 0xa1d   :  { %v6826_v33 = vpop.f32.mrb[78].mxu0 }
 0xa1e   :  { %v6827_v57 = vpop.f32.mrb[79].mxu0 }
 0xa1f   :  { %v6828_v0 = vadd.f32 %v6827_v57, %v6826_v33 }
 0xa21   :  { %v5492_v2 = vadd.f32 %v6828_v0, %v5422_v5 }
 0xa23   :  { %v5562_v63 = vadd.f32 %v6863_v62, %v5492_v2 }
 0xa2d   :  { %v5631_v24 = vpop.f32.mrb[80].mxu0 }
 0xa2e   :  { %v5632_v18 = vadd.f32 %v5631_v24, %v5562_v63  ;;  %v6991_v40 = vpop.f32.mrb[81].mxu0 }
 0xa30   :  { %v5635_v49 = vmax.f32 %v5632_v18, 0.0 }
 0xa32   :  { %7023 = vmatmul.mubr.msk.f32.vlgmr.msra.gmra.mrb[80].mxu1 %vm5658_vm8, %v5635_v49 }
 0xb05   :  { %v5728_v43 = vpop.f32.mrb[80].mxu1 }
 0xb06   :  { %v5729_v32 = vadd.f32 %v5949_v51, %v5728_v43  ;;  %v7024_v9 = vpop.f32.mrb[81].mxu1 }
 0xb08   :  { %v5732_v44 = vmax.f32 %v5729_v32, 0.0 }
 0xb0a   :  { %7048 = vmatmul.mubr.msk.f32.vlgmr.msra.gmra.mrb[82].mxu0 %vm5751_vm4, %v5732_v44 }
 0xbdd   :  { %v5824_v16 = vpop.f32.mrb[82].mxu0 }
 0xbde   :  { %v5825_v35 = vadd.f32 %v5951_v58, %v5824_v16  ;;  %v7049_v11 = vpop.f32.mrb[83].mxu0 }
 0xbe0   :  { %5829 = vst.msk [vmem:[#allocation9] sm:$0x3] %vm5828_vm3, %v5825_v35 }
 0xbe1   :  { %8754 = shalt.err (!%p8751_p4)
}
 0xbe2   :  { %s8755_s27 = scalar_lea.hbm %s11571_s15, 32 }
 0xbe3   :  { %p8756_p5 = scmp.ne.s32.totalorder %s11571_s15, %s8755_s27  ;;  %p8759_p6 = scmp.lt.u32.totalorder %s8755_s27, %s11571_s15 }
 0xbe5   :  { %p8761_p7 = pnand %p8759_p6, %p8756_p5 }
 0xbe7   :  { %8764 = shalt.err (!%p8761_p7)
}
 0xbe8   :  { %5839 = dma.vmem_to_hbm [thread:$0]  %s5837_s16, 32, %s11571_s15, [#allocation10]  }
 0xbe9   :  { %8765 = dma.done.wait [#allocation10], 32  }
 0xbea   :  { %8766 = vsyncadd [#allocation10], 4294967264 }
 0xbeb   :  { %5843 = vsyncpa [#allocation10], 1 }

</bundles_post_ra>
